<compile_context>
chip_gen: v5e
topology: v5e:2x2
jax: 0.10.0
libtpu: 0.0.40
codegen_flags: <defaults>
</compile_context>

<pallas_src>
import functools

import jax
import jax.numpy as jnp
from jax.experimental import pallas as pl
from jax.experimental.pallas import tpu as pltpu


# =============================================================================
# Kernels
# =============================================================================
def _conv_bias_stats_kernel(*refs, K, H, W, fuse_prelu):
    """Pass 1 of a ConvLayer: (optional PReLU on input) + KxK conv + bias, plus per-block
    BatchNorm partial statistics computed while the output block is still in VMEM.

    refs per grid step (one batch element):
      [alpha (1,1) if fuse_prelu,] xp (1, Cin, HWpad), w2d (Cout, K*K*Cin), b (Cout, 1),
      y (1, Cout, HW), ssum (1, Cout, 1), ssq (1, Cout, 1)
    """
    if fuse_prelu:
        a_ref, xp_ref, w_ref, b_ref, y_ref, su_ref, sq_ref = refs
    else:
        xp_ref, w_ref, b_ref, y_ref, su_ref, sq_ref = refs

    x = xp_ref[0]                                    # (Cin, HWpad)
    if fuse_prelu:
        # prelu(0) == 0, so applying PReLU after zero-padding the flat row axis is exact.
        x = jnp.where(x >= 0.0, x, a_ref[...] * x)

    HW = H * W
    if K > 1:
        # Flattened-row conv: a tap shifted by kw-1 wraps to the previous/next image row at the
        # left/right image border; those columns must read the (implicit) zero padding instead.
        col = jax.lax.broadcasted_iota(jnp.int32, (1, HW), 1) % W
        not_left = col != 0
        not_right = col != (W - 1)

    taps = []
    for kh in range(K):
        for kw in range(K):
            off = (kh * W + kw) if K > 1 else 0      # static lane offset into the padded row axis
            t = x[:, off:off + HW]                   # (Cin, HW)
            if K > 1 and kw == 0:
                t = jnp.where(not_left, t, 0.0)
            elif K > 1 and kw == K - 1:
                t = jnp.where(not_right, t, 0.0)
            taps.append(t)
    p = taps[0] if len(taps) == 1 else jnp.concatenate(taps, axis=0)    # (K*K*Cin, HW)

    acc = jnp.dot(w_ref[...], p, preferred_element_type=jnp.float32)    # (Cout, HW)  MXU
    acc = acc + b_ref[...]                                              # bias, lane-broadcast

    y_ref[0] = acc                                                      # lane-dense store
    su_ref[0] = jnp.sum(acc, axis=1, keepdims=True)                     # partial BN stats
    sq_ref[0] = jnp.sum(acc * acc, axis=1, keepdims=True)


def _bn_act_kernel(y_ref, sc_ref, sh_ref, o_ref, *, relu):
    """Pass 2 of a ConvLayer: apply the combined BatchNorm affine + optional ReLU."""
    o = y_ref[0] * sc_ref[...] + sh_ref[...]
    if relu:
        o = jnp.maximum(o, 0.0)
    o_ref[0] = o


def _prelu_channel_sum_kernel(*refs, fuse_prelu):
    """(optional PReLU) + sum over channels for a FourierLayer (FFT-linearity optimisation)."""
    if fuse_prelu:
        a_ref, x_ref, o_ref = refs
    else:
        x_ref, o_ref = refs
    x = x_ref[0]                                     # (C, HW)
    if fuse_prelu:
        x = jnp.where(x >= 0.0, x, a_ref[...] * x)
    o_ref[0] = jnp.sum(x, axis=0, keepdims=True)     # (1, HW)


def _fourier_mix_kernel(sre_ref, sim_ref, wre_ref, wim_ref, ore_ref, oim_ref):
    """Complex pointwise mode mixing for BOTH (top, bottom) mode blocks at once.

    s: (2, B, M) channel-summed FFT modes; w: (2, Cout, M); out: (2, B, Cout, M), where
    out[t,b,o,m] = s[t,b,m] * w[t,o,m] (complex), M = modes1*modes2 (lane-dense minor dim).
    """
    sre = sre_ref[...][:, :, None, :]
    sim = sim_ref[...][:, :, None, :]
    wre = wre_ref[...][:, None, :, :]
    wim = wim_ref[...][:, None, :, :]
    ore_ref[...] = sre * wre - sim * wim
    oim_ref[...] = sre * wim + sim * wre


# =============================================================================
# Layer wrappers (layout: activations are (B, C, H*W) float32, "channels-second, flat spatial")
# =============================================================================
def conv_layer(x, layer_params, *, K, pad, H, W, relu=True, prelu_alpha=None):
    """Conv2d(KxK, stride 1, pad) + BatchNorm2d(batch stats) + optional ReLU.
    Optional PReLU (single shared slope) is applied to the *input* inside the kernel."""
    w, b, gamma, beta = layer_params                 # w: (K*K, Cout, Cin)
    B, Cin, HW = x.shape
    KK, Cout, _ = w.shape
    assert KK == K * K and HW == H * W

    if pad > 0:
        flat_pad = pad * (W + 1)                     # covers row offsets in [-(pad*W+pad), +..]
        xp = jnp.pad(x, ((0, 0), (0, 0), (flat_pad, flat_pad)))
    else:
        xp = x
    HWp = xp.shape[-1]
    # tap-major, Cin-minor weight matrix matching the in-kernel tap concatenation order
    w2d = jnp.transpose(w, (1, 0, 2)).reshape(Cout, KK * Cin)

    fuse = prelu_alpha is not None
    kern = functools.partial(_conv_bias_stats_kernel, K=K, H=H, W=W, fuse_prelu=fuse)

    in_specs, args = [], []
    if fuse:
        in_specs.append(pl.BlockSpec((1, 1), lambda bi: (0, 0)))
        args.append(prelu_alpha.reshape(1, 1).astype(jnp.float32))
    in_specs += [
        pl.BlockSpec((1, Cin, HWp), lambda bi: (bi, 0, 0)),
        pl.BlockSpec((Cout, KK * Cin), lambda bi: (0, 0)),
        pl.BlockSpec((Cout, 1), lambda bi: (0, 0)),
    ]
    args += [xp, w2d, b.reshape(Cout, 1)]

    y, ssum, ssq = pl.pallas_call(
        kern,
        grid=(B,),
        in_specs=in_specs,
        out_specs=[
            pl.BlockSpec((1, Cout, HW), lambda bi: (bi, 0, 0)),
            pl.BlockSpec((1, Cout, 1), lambda bi: (bi, 0, 0)),
            pl.BlockSpec((1, Cout, 1), lambda bi: (bi, 0, 0)),
        ],
        out_shape=[
            jax.ShapeDtypeStruct((B, Cout, HW), jnp.float32),
            jax.ShapeDtypeStruct((B, Cout, 1), jnp.float32),
            jax.ShapeDtypeStruct((B, Cout, 1), jnp.float32),
        ],
        compiler_params=pltpu.CompilerParams(
            dimension_semantics=("parallel",),
            vmem_limit_bytes=32 * 1024 * 1024,
        ),
    )(*args)

    # Combine the tiny per-batch-element partials -> exact whole-batch statistics (PyTorch BN
    # training mode: biased variance, eps=1e-5).
    n = B * HW
    mean = jnp.sum(ssum, axis=0) / n                                   # (Cout, 1)
    var = jnp.maximum(jnp.sum(ssq, axis=0) / n - mean * mean, 0.0)
    scale = gamma[:, None] * jax.lax.rsqrt(var + 1e-5)
    shift = beta[:, None] - mean * scale

    return pl.pallas_call(
        functools.partial(_bn_act_kernel, relu=relu),
        grid=(B,),
        in_specs=[
            pl.BlockSpec((1, Cout, HW), lambda bi: (bi, 0, 0)),
            pl.BlockSpec((Cout, 1), lambda bi: (0, 0)),
            pl.BlockSpec((Cout, 1), lambda bi: (0, 0)),
        ],
        out_specs=pl.BlockSpec((1, Cout, HW), lambda bi: (bi, 0, 0)),
        out_shape=jax.ShapeDtypeStruct((B, Cout, HW), jnp.float32),
        compiler_params=pltpu.CompilerParams(dimension_semantics=("parallel",)),
    )(y, scale, shift)


def channel_sum(x, prelu_alpha=None):
    """(optional PReLU) + sum over channels.  x: (B, C, HW) -> (B, 1, HW)."""
    B, C, HW = x.shape
    fuse = prelu_alpha is not None
    kern = functools.partial(_prelu_channel_sum_kernel, fuse_prelu=fuse)
    in_specs, args = [], []
    if fuse:
        in_specs.append(pl.BlockSpec((1, 1), lambda bi: (0, 0)))
        args.append(prelu_alpha.reshape(1, 1).astype(jnp.float32))
    in_specs.append(pl.BlockSpec((1, C, HW), lambda bi: (bi, 0, 0)))
    args.append(x)
    return pl.pallas_call(
        kern,
        grid=(B,),
        in_specs=in_specs,
        out_specs=pl.BlockSpec((1, 1, HW), lambda bi: (bi, 0, 0)),
        out_shape=jax.ShapeDtypeStruct((B, 1, HW), jnp.float32),
        compiler_params=pltpu.CompilerParams(dimension_semantics=("parallel",)),
    )(*args)


def fourier_mix(s_re, s_im, w_re, w_im):
    _, B, M = s_re.shape
    Cout = w_re.shape[1]
    oshape = jax.ShapeDtypeStruct((2, B, Cout, M), jnp.float32)
    return pl.pallas_call(_fourier_mix_kernel, out_shape=(oshape, oshape))(s_re, s_im, w_re, w_im)


def fourier_layer(x, layer_params, *, H, W, m1, m2, prelu_alpha=None):
    """FourierLayer.forward.  x: (B, Cin, H*W) -> (B, Cout, H*W).

    The reference einsum 'bixy,ioxy->boxy' with weights (1, Cout, m1, m2) broadcasts the size-1
    input-channel dim, i.e. out[b,o] = (sum_i x_ft[b,i]) * w[0,o]; by FFT linearity the channel
    sum is taken BEFORE the FFT (exact), so only one rfft2 per batch element is needed.
    """
    w_re, w_im = layer_params                        # each (2, Cout, m1, m2): [weights1, weights2]
    B, _, HW = x.shape
    Cout = w_re.shape[1]
    Wf = W // 2 + 1
    assert H >= 2 * m1 and Wf >= m2, "modes too large for the spatial size"

    s = channel_sum(x, prelu_alpha).reshape(B, H, W)
    # TODO(synk): no Pallas/Mosaic FFT primitive -- rfft2/irfft2 stay in jnp.fft (XLA).
    s_ft = jnp.fft.rfft2(s)                          # (B, H, Wf) complex64

    top = s_ft[:, :m1, :m2]
    bot = s_ft[:, H - m1:, :m2]
    sm = jnp.stack([top, bot], axis=0).reshape(2, B, m1 * m2)

    o_re, o_im = fourier_mix(
        jnp.real(sm), jnp.imag(sm),
        w_re.reshape(2, Cout, m1 * m2), w_im.reshape(2, Cout, m1 * m2))
    o = jax.lax.complex(o_re, o_im).reshape(2, B, Cout, m1, m2)

    # Build out_ft with pad + concat (no zeros-buffer + scatter passes).
    o = jnp.pad(o, ((0, 0), (0, 0), (0, 0), (0, 0), (0, Wf - m2)))
    mid = jnp.zeros((B, Cout, H - 2 * m1, Wf), jnp.complex64)
    out_ft = jnp.concatenate([o[0], mid, o[1]], axis=2)        # (B, Cout, H, Wf)

    y = jnp.fft.irfft2(out_ft, s=(H, W))                       # (B, Cout, H, W) float32
    return y.reshape(B, Cout, H * W).astype(jnp.float32)


# =============================================================================
# Parameter init (deterministic, synthetic -- shapes follow the PyTorch __init__)
# =============================================================================
def init_params(key, modes):
    keys = iter(jax.random.split(key, 64))

    def conv_p(cin, cout, K):
        # weights stored tap-major: (K*K, Cout, Cin), tap index = kh*K + kw
        w = jax.random.normal(next(keys), (K * K, cout, cin), jnp.float32) / jnp.sqrt(K * K * cin)
        b = 0.01 * jax.random.normal(next(keys), (cout,), jnp.float32)
        return (w, b, jnp.ones((cout,), jnp.float32), jnp.zeros((cout,), jnp.float32))

    def fourier_p(cin, cout):
        scale = (1.0 / cin) * cout
        shp = (2, cout, modes, modes)                # index 0 = weights1 (top), 1 = weights2 (bot)
        w_re = scale * jax.random.uniform(next(keys), shp, jnp.float32)
        w_im = scale * jax.random.uniform(next(keys), shp, jnp.float32)
        return (w_re, w_im)

    return {
        "conv1": conv_p(1, 4, 3),
        "conv2": conv_p(4, 8, 3),
        "fl1": fourier_p(8, 16),
        "conv3": conv_p(8, 16, 3),
        "fl2": fourier_p(32, 16),
        "prelu1": jnp.full((1,), 0.25, jnp.float32),
        "fl3": fourier_p(16, 8),
        "conv4": conv_p(8, 4, 3),
        "fl4": fourier_p(8, 4),
        "prelu2": jnp.full((1,), 0.25, jnp.float32),
        "fl5": fourier_p(8, 16),
        "conv5": conv_p(8, 16, 3),
        "fl6": fourier_p(32, 8),
        "prelu3": jnp.full((1,), 0.25, jnp.float32),
        "conv6": conv_p(8, 4, 3),
        "conv_end": conv_p(4, 1, 1),   # 1x1 conv; gamma/beta slots hold bn_end's params
    }


# =============================================================================
# Generator forward (mirrors the PyTorch Generator.forward exactly)
# =============================================================================
def generator_forward(params, x_nchw, *, modes):
    B, C, H, W = x_nchw.shape
    x = x_nchw.reshape(B, C, H * W)                  # channels-second, flattened spatial (free)

    conv1 = conv_layer(x, params["conv1"], K=3, pad=1, H=H, W=W)
    conv2 = conv_layer(conv1, params["conv2"], K=3, pad=1, H=H, W=W)
    fl1 = fourier_layer(conv2, params["fl1"], H=H, W=W, m1=modes, m2=modes)
    conv3 = conv_layer(conv2, params["conv3"], K=3, pad=1, H=H, W=W)
    merge1 = jnp.concatenate([conv3, fl1], axis=1)   # torch.cat(dim=1)

    fl2 = fourier_layer(merge1, params["fl2"], H=H, W=W, m1=modes, m2=modes)
    # prelu1(fl2) is only consumed by fl3 -> fused into fl3's channel-sum kernel.
    fl3 = fourier_layer(fl2, params["fl3"], H=H, W=W, m1=modes, m2=modes,
                        prelu_alpha=params["prelu1"])
    fl4 = fourier_layer(fl3, params["fl4"], H=H, W=W, m1=modes, m2=modes)
    conv4 = conv_layer(fl3, params["conv4"], K=3, pad=1, H=H, W=W)
    merge2 = jnp.concatenate([conv4, fl4], axis=1)

    # prelu2(merge2) feeds fl5 and conv5 -> fused into both consumers (never materialised).
    fl5 = fourier_layer(merge2, params["fl5"], H=H, W=W, m1=modes, m2=modes,
                        prelu_alpha=params["prelu2"])
    conv5 = conv_layer(merge2, params["conv5"], K=3, pad=1, H=H, W=W,
                       prelu_alpha=params["prelu2"])
    merge3 = jnp.concatenate([conv5, fl5], axis=1)

    fl6 = fourier_layer(merge3, params["fl6"], H=H, W=W, m1=modes, m2=modes)
    # prelu3(fl6) is only consumed by conv6 -> fused into conv6's input.
    conv6 = conv_layer(fl6, params["conv6"], K=3, pad=1, H=H, W=W,
                       prelu_alpha=params["prelu3"])

    # conv_end (1x1, no activation) followed by bn_end, same two-pass kernels with relu=False.
    out = conv_layer(conv6, params["conv_end"], K=1, pad=0, relu=False, H=H, W=W)
    return out.reshape(B, 1, H, W)


# =============================================================================
if __name__ == "__main__":
    key = jax.random.PRNGKey(0)
    pkey, xkey = jax.random.split(key)

    # Module default modes=64 requires >=128x128 inputs; same semantics with modes=4 on a 16x16
    # grid (needs H >= 2*modes and W//2+1 >= modes).
    B, C, H, W = 2, 1, 16, 16
    modes = 4

    params = init_params(pkey, modes)
    x = jax.random.normal(xkey, (B, C, H, W), jnp.float32)

    fwd = jax.jit(functools.partial(generator_forward, modes=modes))
    y = fwd(params, x)
    jax.block_until_ready(y)

    assert y.shape == (B, 1, H, W), y.shape
    assert y.dtype == jnp.float32
    assert bool(jnp.all(jnp.isfinite(y)))
    print("KERNEL_OK")
</pallas_src>

<mosaic_0001>
module attributes {stable_mosaic.version = 11 : i64} {
  func.func @_conv_bias_stats_kernel(%arg0: i32, %arg1: memref<1x1x290xf32, #tpu.memory_space<vmem>>, %arg2: memref<4x9xf32, #tpu.memory_space<vmem>>, %arg3: memref<4x1xf32, #tpu.memory_space<vmem>>, %arg4: memref<1x4x256xf32, #tpu.memory_space<vmem>>, %arg5: memref<1x4x1xf32, #tpu.memory_space<vmem>>, %arg6: memref<1x4x1xf32, #tpu.memory_space<vmem>>) attributes {dimension_semantics = [#tpu.dimension_semantics<parallel>], iteration_bounds = array<i64: 2>, scalar_prefetch = 0 : i64, scratch_operands = 0 : i64, tpu.core_type = #tpu.core_type<tc>, window_params = [{transform_indices = @transform_0, window_bounds = array<i64: 1, 1, 290>}, {pipeline_mode = #tpu.pipeline_mode<synchronous>, transform_indices = @transform_1, window_bounds = array<i64: 4, 9>}, {pipeline_mode = #tpu.pipeline_mode<synchronous>, transform_indices = @transform_2, window_bounds = array<i64: 4, 1>}, {transform_indices = @transform_3, window_bounds = array<i64: 1, 4, 256>}, {transform_indices = @transform_4, window_bounds = array<i64: 1, 4, 1>}, {transform_indices = @transform_5, window_bounds = array<i64: 1, 4, 1>}]} {
    %c0 = arith.constant 0 : index
    %c0_0 = arith.constant 0 : index
    %c0_1 = arith.constant 0 : index
    %0 = vector.load %arg1[%c0, %c0_0, %c0_1] : memref<1x1x290xf32, #tpu.memory_space<vmem>>, vector<1x1x290xf32>
    %1 = vector.shape_cast %0 : vector<1x1x290xf32> to vector<1x290xf32>
    %2 = tpu.iota {dimensions = array<i32: 1>} : vector<1x256xi32>
    %c16_i32 = arith.constant 16 : i32
    %c0_i32 = arith.constant 0 : i32
    %3 = arith.cmpi eq, %c16_i32, %c0_i32 : i32
    %c1_i32 = arith.constant 1 : i32
    %4 = arith.select %3, %c1_i32, %c16_i32 : i32
    %5 = vector.broadcast %4 : i32 to vector<1x256xi32>
    %6 = arith.remsi %2, %5 : vector<1x256xi32>
    %c0_i32_2 = arith.constant 0 : i32
    %7 = vector.broadcast %c0_i32_2 : i32 to vector<1x256xi32>
    %8 = arith.cmpi ne, %6, %7 : vector<1x256xi32>
    %c0_i32_3 = arith.constant 0 : i32
    %9 = vector.broadcast %c0_i32_3 : i32 to vector<1x256xi32>
    %10 = arith.cmpi slt, %6, %9 : vector<1x256xi32>
    %c0_i32_4 = arith.constant 0 : i32
    %11 = arith.cmpi slt, %4, %c0_i32_4 : i32
    %12 = vector.broadcast %11 : i1 to vector<1x256xi1>
    %13 = vector.broadcast %12 : vector<1x256xi1> to vector<1x256xi1>
    %14 = arith.xori %10, %13 : vector<1x256xi1>
    %15 = arith.andi %14, %8 : vector<1x256xi1>
    %16 = vector.broadcast %4 : i32 to vector<1x256xi32>
    %17 = arith.addi %6, %16 : vector<1x256xi32>
    %18 = arith.select %15, %17, %6 : vector<1x256xi1>, vector<1x256xi32>
    %c0_i32_5 = arith.constant 0 : i32
    %19 = vector.broadcast %c0_i32_5 : i32 to vector<1x256xi32>
    %20 = arith.cmpi ne, %18, %19 : vector<1x256xi32>
    %c15_i32 = arith.constant 15 : i32
    %21 = vector.broadcast %c15_i32 : i32 to vector<1x256xi32>
    %22 = arith.cmpi ne, %18, %21 : vector<1x256xi32>
    %23 = vector.extract_strided_slice %1 {offsets = [0, 0], sizes = [1, 256], strides = [1, 1]} : vector<1x290xf32> to vector<1x256xf32>
    %cst = arith.constant 0.000000e+00 : f32
    %24 = vector.broadcast %cst : f32 to vector<1x256xf32>
    %25 = arith.select %20, %23, %24 : vector<1x256xi1>, vector<1x256xf32>
    %26 = vector.extract_strided_slice %1 {offsets = [0, 1], sizes = [1, 256], strides = [1, 1]} : vector<1x290xf32> to vector<1x256xf32>
    %27 = vector.extract_strided_slice %1 {offsets = [0, 2], sizes = [1, 256], strides = [1, 1]} : vector<1x290xf32> to vector<1x256xf32>
    %cst_6 = arith.constant 0.000000e+00 : f32
    %28 = vector.broadcast %cst_6 : f32 to vector<1x256xf32>
    %29 = arith.select %22, %27, %28 : vector<1x256xi1>, vector<1x256xf32>
    %30 = vector.extract_strided_slice %1 {offsets = [0, 16], sizes = [1, 256], strides = [1, 1]} : vector<1x290xf32> to vector<1x256xf32>
    %cst_7 = arith.constant 0.000000e+00 : f32
    %31 = vector.broadcast %cst_7 : f32 to vector<1x256xf32>
    %32 = arith.select %20, %30, %31 : vector<1x256xi1>, vector<1x256xf32>
    %33 = vector.extract_strided_slice %1 {offsets = [0, 17], sizes = [1, 256], strides = [1, 1]} : vector<1x290xf32> to vector<1x256xf32>
    %34 = vector.extract_strided_slice %1 {offsets = [0, 18], sizes = [1, 256], strides = [1, 1]} : vector<1x290xf32> to vector<1x256xf32>
    %cst_8 = arith.constant 0.000000e+00 : f32
    %35 = vector.broadcast %cst_8 : f32 to vector<1x256xf32>
    %36 = arith.select %22, %34, %35 : vector<1x256xi1>, vector<1x256xf32>
    %37 = vector.extract_strided_slice %1 {offsets = [0, 32], sizes = [1, 256], strides = [1, 1]} : vector<1x290xf32> to vector<1x256xf32>
    %cst_9 = arith.constant 0.000000e+00 : f32
    %38 = vector.broadcast %cst_9 : f32 to vector<1x256xf32>
    %39 = arith.select %20, %37, %38 : vector<1x256xi1>, vector<1x256xf32>
    %40 = vector.extract_strided_slice %1 {offsets = [0, 33], sizes = [1, 256], strides = [1, 1]} : vector<1x290xf32> to vector<1x256xf32>
    %41 = vector.extract_strided_slice %1 {offsets = [0, 34], sizes = [1, 256], strides = [1, 1]} : vector<1x290xf32> to vector<1x256xf32>
    %cst_10 = arith.constant 0.000000e+00 : f32
    %42 = vector.broadcast %cst_10 : f32 to vector<1x256xf32>
    %43 = arith.select %22, %41, %42 : vector<1x256xi1>, vector<1x256xf32>
    %44 = tpu.concatenate %25, %26, %29, %32, %33, %36, %39, %40, %43 in 0 : vector<1x256xf32>, vector<1x256xf32>, vector<1x256xf32>, vector<1x256xf32>, vector<1x256xf32>, vector<1x256xf32>, vector<1x256xf32>, vector<1x256xf32>, vector<1x256xf32> -> vector<9x256xf32>
    %c0_11 = arith.constant 0 : index
    %c0_12 = arith.constant 0 : index
    %45 = vector.load %arg2[%c0_11, %c0_12] : memref<4x9xf32, #tpu.memory_space<vmem>>, vector<4x9xf32>
    %cst_13 = arith.constant dense<0.000000e+00> : vector<4x256xf32>
    %46 = tpu.matmul %45, %44, %cst_13 {dimension_numbers = #tpu.dot_dimension_numbers<[1], [0], [0], [1], [0, 0, 1, 1], [], []>} : vector<4x9xf32>, vector<9x256xf32>, vector<4x256xf32> -> vector<4x256xf32>
    %c0_14 = arith.constant 0 : index
    %c0_15 = arith.constant 0 : index
    %47 = vector.load %arg3[%c0_14, %c0_15] : memref<4x1xf32, #tpu.memory_space<vmem>>, vector<4x1xf32>
    %48 = vector.broadcast %47 : vector<4x1xf32> to vector<4x256xf32>
    %49 = arith.addf %46, %48 : vector<4x256xf32>
    %c0_16 = arith.constant 0 : index
    %c0_17 = arith.constant 0 : index
    %c0_18 = arith.constant 0 : index
    %50 = vector.load %arg4[%c0_16, %c0_17, %c0_18] : memref<1x4x256xf32, #tpu.memory_space<vmem>>, vector<1x4x256xf32>
    %51 = vector.shape_cast %50 : vector<1x4x256xf32> to vector<4x256xf32>
    %52 = vector.shape_cast %49 : vector<4x256xf32> to vector<1x4x256xf32>
    tpu.vector_store %arg4[%c0_16, %c0_17, %c0_18], %52 {strides = array<i32>} : memref<1x4x256xf32, #tpu.memory_space<vmem>>, vector<1x4x256xf32>,
    %cst_19 = arith.constant dense<0.000000e+00> : vector<4xf32>
    %53 = vector.multi_reduction <add>, %49, %cst_19 [1] : vector<4x256xf32> to vector<4xf32>
    %54 = vector.shape_cast %53 : vector<4xf32> to vector<4x1xf32>
    %c0_20 = arith.constant 0 : index
    %c0_21 = arith.constant 0 : index
    %c0_22 = arith.constant 0 : index
    %55 = vector.load %arg5[%c0_20, %c0_21, %c0_22] : memref<1x4x1xf32, #tpu.memory_space<vmem>>, vector<1x4x1xf32>
    %56 = vector.shape_cast %55 : vector<1x4x1xf32> to vector<4x1xf32>
    %57 = vector.shape_cast %54 : vector<4x1xf32> to vector<1x4x1xf32>
    tpu.vector_store %arg5[%c0_20, %c0_21, %c0_22], %57 {strides = array<i32>} : memref<1x4x1xf32, #tpu.memory_space<vmem>>, vector<1x4x1xf32>,
    %58 = arith.mulf %49, %49 : vector<4x256xf32>
    %cst_23 = arith.constant dense<0.000000e+00> : vector<4xf32>
    %59 = vector.multi_reduction <add>, %58, %cst_23 [1] : vector<4x256xf32> to vector<4xf32>
    %60 = vector.shape_cast %59 : vector<4xf32> to vector<4x1xf32>
    %c0_24 = arith.constant 0 : index
    %c0_25 = arith.constant 0 : index
    %c0_26 = arith.constant 0 : index
    %61 = vector.load %arg6[%c0_24, %c0_25, %c0_26] : memref<1x4x1xf32, #tpu.memory_space<vmem>>, vector<1x4x1xf32>
    %62 = vector.shape_cast %61 : vector<1x4x1xf32> to vector<4x1xf32>
    %63 = vector.shape_cast %60 : vector<4x1xf32> to vector<1x4x1xf32>
    tpu.vector_store %arg6[%c0_24, %c0_25, %c0_26], %63 {strides = array<i32>} : memref<1x4x1xf32, #tpu.memory_space<vmem>>, vector<1x4x1xf32>,
    return
  }
  func.func @transform_0(%arg0: i32) -> (i32, i32, i32) {
    %c0_i32 = arith.constant 0 : i32
    %c0_i32_0 = arith.constant 0 : i32
    %c0_i32_1 = arith.constant 0 : i32
    return %arg0, %c0_i32, %c0_i32_0 : i32, i32, i32
  }
  func.func @transform_1(%arg0: i32) -> (i32, i32) {
    %c0_i32 = arith.constant 0 : i32
    %c0_i32_0 = arith.constant 0 : i32
    %c0_i32_1 = arith.constant 0 : i32
    return %c0_i32, %c0_i32_0 : i32, i32
  }
  func.func @transform_2(%arg0: i32) -> (i32, i32) {
    %c0_i32 = arith.constant 0 : i32
    %c0_i32_0 = arith.constant 0 : i32
    %c0_i32_1 = arith.constant 0 : i32
    return %c0_i32, %c0_i32_0 : i32, i32
  }
  func.func @transform_3(%arg0: i32) -> (i32, i32, i32) {
    %c0_i32 = arith.constant 0 : i32
    %c0_i32_0 = arith.constant 0 : i32
    %c0_i32_1 = arith.constant 0 : i32
    return %arg0, %c0_i32, %c0_i32_0 : i32, i32, i32
  }
  func.func @transform_4(%arg0: i32) -> (i32, i32, i32) {
    %c0_i32 = arith.constant 0 : i32
    %c0_i32_0 = arith.constant 0 : i32
    %c0_i32_1 = arith.constant 0 : i32
    return %arg0, %c0_i32, %c0_i32_0 : i32, i32, i32
  }
  func.func @transform_5(%arg0: i32) -> (i32, i32, i32) {
    %c0_i32 = arith.constant 0 : i32
    %c0_i32_0 = arith.constant 0 : i32
    %c0_i32_1 = arith.constant 0 : i32
    return %arg0, %c0_i32, %c0_i32_0 : i32, i32, i32
  }
}

module attributes {stable_mosaic.version = 11 : i64} {
  func.func @_bn_act_kernel(%arg0: i32, %arg1: memref<1x4x256xf32, #tpu.memory_space<vmem>>, %arg2: memref<4x1xf32, #tpu.memory_space<vmem>>, %arg3: memref<4x1xf32, #tpu.memory_space<vmem>>, %arg4: memref<1x4x256xf32, #tpu.memory_space<vmem>>) attributes {dimension_semantics = [#tpu.dimension_semantics<parallel>], iteration_bounds = array<i64: 2>, scalar_prefetch = 0 : i64, scratch_operands = 0 : i64, tpu.core_type = #tpu.core_type<tc>, window_params = [{transform_indices = @transform_0, window_bounds = array<i64: 1, 4, 256>}, {pipeline_mode = #tpu.pipeline_mode<synchronous>, transform_indices = @transform_1, window_bounds = array<i64: 4, 1>}, {pipeline_mode = #tpu.pipeline_mode<synchronous>, transform_indices = @transform_2, window_bounds = array<i64: 4, 1>}, {transform_indices = @transform_3, window_bounds = array<i64: 1, 4, 256>}]} {
    %c0 = arith.constant 0 : index
    %c0_0 = arith.constant 0 : index
    %c0_1 = arith.constant 0 : index
    %0 = vector.load %arg1[%c0, %c0_0, %c0_1] : memref<1x4x256xf32, #tpu.memory_space<vmem>>, vector<1x4x256xf32>
    %1 = vector.shape_cast %0 : vector<1x4x256xf32> to vector<4x256xf32>
    %c0_2 = arith.constant 0 : index
    %c0_3 = arith.constant 0 : index
    %2 = vector.load %arg2[%c0_2, %c0_3] : memref<4x1xf32, #tpu.memory_space<vmem>>, vector<4x1xf32>
    %3 = vector.broadcast %2 : vector<4x1xf32> to vector<4x256xf32>
    %4 = arith.mulf %1, %3 : vector<4x256xf32>
    %c0_4 = arith.constant 0 : index
    %c0_5 = arith.constant 0 : index
    %5 = vector.load %arg3[%c0_4, %c0_5] : memref<4x1xf32, #tpu.memory_space<vmem>>, vector<4x1xf32>
    %6 = vector.broadcast %5 : vector<4x1xf32> to vector<4x256xf32>
    %7 = arith.addf %4, %6 : vector<4x256xf32>
    %cst = arith.constant 0.000000e+00 : f32
    %8 = vector.broadcast %cst : f32 to vector<4x256xf32>
    %9 = arith.maximumf %7, %8 : vector<4x256xf32>
    %c0_6 = arith.constant 0 : index
    %c0_7 = arith.constant 0 : index
    %c0_8 = arith.constant 0 : index
    %10 = vector.load %arg4[%c0_6, %c0_7, %c0_8] : memref<1x4x256xf32, #tpu.memory_space<vmem>>, vector<1x4x256xf32>
    %11 = vector.shape_cast %10 : vector<1x4x256xf32> to vector<4x256xf32>
    %12 = vector.shape_cast %9 : vector<4x256xf32> to vector<1x4x256xf32>
    tpu.vector_store %arg4[%c0_6, %c0_7, %c0_8], %12 {strides = array<i32>} : memref<1x4x256xf32, #tpu.memory_space<vmem>>, vector<1x4x256xf32>,
    return
  }
  func.func @transform_0(%arg0: i32) -> (i32, i32, i32) {
    %c0_i32 = arith.constant 0 : i32
    %c0_i32_0 = arith.constant 0 : i32
    %c0_i32_1 = arith.constant 0 : i32
    return %arg0, %c0_i32, %c0_i32_0 : i32, i32, i32
  }
  func.func @transform_1(%arg0: i32) -> (i32, i32) {
    %c0_i32 = arith.constant 0 : i32
    %c0_i32_0 = arith.constant 0 : i32
    %c0_i32_1 = arith.constant 0 : i32
    return %c0_i32, %c0_i32_0 : i32, i32
  }
  func.func @transform_2(%arg0: i32) -> (i32, i32) {
    %c0_i32 = arith.constant 0 : i32
    %c0_i32_0 = arith.constant 0 : i32
    %c0_i32_1 = arith.constant 0 : i32
    return %c0_i32, %c0_i32_0 : i32, i32
  }
  func.func @transform_3(%arg0: i32) -> (i32, i32, i32) {
    %c0_i32 = arith.constant 0 : i32
    %c0_i32_0 = arith.constant 0 : i32
    %c0_i32_1 = arith.constant 0 : i32
    return %arg0, %c0_i32, %c0_i32_0 : i32, i32, i32
  }
}

module attributes {stable_mosaic.version = 11 : i64} {
  func.func @_conv_bias_stats_kernel(%arg0: i32, %arg1: memref<1x4x290xf32, #tpu.memory_space<vmem>>, %arg2: memref<8x36xf32, #tpu.memory_space<vmem>>, %arg3: memref<8x1xf32, #tpu.memory_space<vmem>>, %arg4: memref<1x8x256xf32, #tpu.memory_space<vmem>>, %arg5: memref<1x8x1xf32, #tpu.memory_space<vmem>>, %arg6: memref<1x8x1xf32, #tpu.memory_space<vmem>>) attributes {dimension_semantics = [#tpu.dimension_semantics<parallel>], iteration_bounds = array<i64: 2>, scalar_prefetch = 0 : i64, scratch_operands = 0 : i64, tpu.core_type = #tpu.core_type<tc>, window_params = [{transform_indices = @transform_0, window_bounds = array<i64: 1, 4, 290>}, {pipeline_mode = #tpu.pipeline_mode<synchronous>, transform_indices = @transform_1, window_bounds = array<i64: 8, 36>}, {pipeline_mode = #tpu.pipeline_mode<synchronous>, transform_indices = @transform_2, window_bounds = array<i64: 8, 1>}, {transform_indices = @transform_3, window_bounds = array<i64: 1, 8, 256>}, {transform_indices = @transform_4, window_bounds = array<i64: 1, 8, 1>}, {transform_indices = @transform_5, window_bounds = array<i64: 1, 8, 1>}]} {
    %c0 = arith.constant 0 : index
    %c0_0 = arith.constant 0 : index
    %c0_1 = arith.constant 0 : index
    %0 = vector.load %arg1[%c0, %c0_0, %c0_1] : memref<1x4x290xf32, #tpu.memory_space<vmem>>, vector<1x4x290xf32>
    %1 = vector.shape_cast %0 : vector<1x4x290xf32> to vector<4x290xf32>
    %2 = tpu.iota {dimensions = array<i32: 1>} : vector<1x256xi32>
    %c16_i32 = arith.constant 16 : i32
    %c0_i32 = arith.constant 0 : i32
    %3 = arith.cmpi eq, %c16_i32, %c0_i32 : i32
    %c1_i32 = arith.constant 1 : i32
    %4 = arith.select %3, %c1_i32, %c16_i32 : i32
    %5 = vector.broadcast %4 : i32 to vector<1x256xi32>
    %6 = arith.remsi %2, %5 : vector<1x256xi32>
    %c0_i32_2 = arith.constant 0 : i32
    %7 = vector.broadcast %c0_i32_2 : i32 to vector<1x256xi32>
    %8 = arith.cmpi ne, %6, %7 : vector<1x256xi32>
    %c0_i32_3 = arith.constant 0 : i32
    %9 = vector.broadcast %c0_i32_3 : i32 to vector<1x256xi32>
    %10 = arith.cmpi slt, %6, %9 : vector<1x256xi32>
    %c0_i32_4 = arith.constant 0 : i32
    %11 = arith.cmpi slt, %4, %c0_i32_4 : i32
    %12 = vector.broadcast %11 : i1 to vector<1x256xi1>
    %13 = vector.broadcast %12 : vector<1x256xi1> to vector<1x256xi1>
    %14 = arith.xori %10, %13 : vector<1x256xi1>
    %15 = arith.andi %14, %8 : vector<1x256xi1>
    %16 = vector.broadcast %4 : i32 to vector<1x256xi32>
    %17 = arith.addi %6, %16 : vector<1x256xi32>
    %18 = arith.select %15, %17, %6 : vector<1x256xi1>, vector<1x256xi32>
    %c0_i32_5 = arith.constant 0 : i32
    %19 = vector.broadcast %c0_i32_5 : i32 to vector<1x256xi32>
    %20 = arith.cmpi ne, %18, %19 : vector<1x256xi32>
    %c15_i32 = arith.constant 15 : i32
    %21 = vector.broadcast %c15_i32 : i32 to vector<1x256xi32>
    %22 = arith.cmpi ne, %18, %21 : vector<1x256xi32>
    %23 = vector.extract_strided_slice %1 {offsets = [0, 0], sizes = [4, 256], strides = [1, 1]} : vector<4x290xf32> to vector<4x256xf32>
    %cst = arith.constant 0.000000e+00 : f32
    %24 = vector.shape_cast %20 : vector<1x256xi1> to vector<1x256xi1>
    %25 = vector.broadcast %24 : vector<1x256xi1> to vector<4x256xi1>
    %26 = vector.broadcast %cst : f32 to vector<4x256xf32>
    %27 = arith.select %25, %23, %26 : vector<4x256xi1>, vector<4x256xf32>
    %28 = vector.extract_strided_slice %1 {offsets = [0, 1], sizes = [4, 256], strides = [1, 1]} : vector<4x290xf32> to vector<4x256xf32>
    %29 = vector.extract_strided_slice %1 {offsets = [0, 2], sizes = [4, 256], strides = [1, 1]} : vector<4x290xf32> to vector<4x256xf32>
    %cst_6 = arith.constant 0.000000e+00 : f32
    %30 = vector.shape_cast %22 : vector<1x256xi1> to vector<1x256xi1>
    %31 = vector.broadcast %30 : vector<1x256xi1> to vector<4x256xi1>
    %32 = vector.broadcast %cst_6 : f32 to vector<4x256xf32>
    %33 = arith.select %31, %29, %32 : vector<4x256xi1>, vector<4x256xf32>
    %34 = vector.extract_strided_slice %1 {offsets = [0, 16], sizes = [4, 256], strides = [1, 1]} : vector<4x290xf32> to vector<4x256xf32>
    %cst_7 = arith.constant 0.000000e+00 : f32
    %35 = vector.shape_cast %20 : vector<1x256xi1> to vector<1x256xi1>
    %36 = vector.broadcast %35 : vector<1x256xi1> to vector<4x256xi1>
    %37 = vector.broadcast %cst_7 : f32 to vector<4x256xf32>
    %38 = arith.select %36, %34, %37 : vector<4x256xi1>, vector<4x256xf32>
    %39 = vector.extract_strided_slice %1 {offsets = [0, 17], sizes = [4, 256], strides = [1, 1]} : vector<4x290xf32> to vector<4x256xf32>
    %40 = vector.extract_strided_slice %1 {offsets = [0, 18], sizes = [4, 256], strides = [1, 1]} : vector<4x290xf32> to vector<4x256xf32>
    %cst_8 = arith.constant 0.000000e+00 : f32
    %41 = vector.shape_cast %22 : vector<1x256xi1> to vector<1x256xi1>
    %42 = vector.broadcast %41 : vector<1x256xi1> to vector<4x256xi1>
    %43 = vector.broadcast %cst_8 : f32 to vector<4x256xf32>
    %44 = arith.select %42, %40, %43 : vector<4x256xi1>, vector<4x256xf32>
    %45 = vector.extract_strided_slice %1 {offsets = [0, 32], sizes = [4, 256], strides = [1, 1]} : vector<4x290xf32> to vector<4x256xf32>
    %cst_9 = arith.constant 0.000000e+00 : f32
    %46 = vector.shape_cast %20 : vector<1x256xi1> to vector<1x256xi1>
    %47 = vector.broadcast %46 : vector<1x256xi1> to vector<4x256xi1>
    %48 = vector.broadcast %cst_9 : f32 to vector<4x256xf32>
    %49 = arith.select %47, %45, %48 : vector<4x256xi1>, vector<4x256xf32>
    %50 = vector.extract_strided_slice %1 {offsets = [0, 33], sizes = [4, 256], strides = [1, 1]} : vector<4x290xf32> to vector<4x256xf32>
    %51 = vector.extract_strided_slice %1 {offsets = [0, 34], sizes = [4, 256], strides = [1, 1]} : vector<4x290xf32> to vector<4x256xf32>
    %cst_10 = arith.constant 0.000000e+00 : f32
    %52 = vector.shape_cast %22 : vector<1x256xi1> to vector<1x256xi1>
    %53 = vector.broadcast %52 : vector<1x256xi1> to vector<4x256xi1>
    %54 = vector.broadcast %cst_10 : f32 to vector<4x256xf32>
    %55 = arith.select %53, %51, %54 : vector<4x256xi1>, vector<4x256xf32>
    %56 = tpu.concatenate %27, %28, %33, %38, %39, %44, %49, %50, %55 in 0 : vector<4x256xf32>, vector<4x256xf32>, vector<4x256xf32>, vector<4x256xf32>, vector<4x256xf32>, vector<4x256xf32>, vector<4x256xf32>, vector<4x256xf32>, vector<4x256xf32> -> vector<36x256xf32>
    %c0_11 = arith.constant 0 : index
    %c0_12 = arith.constant 0 : index
    %57 = vector.load %arg2[%c0_11, %c0_12] : memref<8x36xf32, #tpu.memory_space<vmem>>, vector<8x36xf32>
    %cst_13 = arith.constant dense<0.000000e+00> : vector<8x256xf32>
    %58 = tpu.matmul %57, %56, %cst_13 {dimension_numbers = #tpu.dot_dimension_numbers<[1], [0], [0], [1], [0, 0, 1, 1], [], []>} : vector<8x36xf32>, vector<36x256xf32>, vector<8x256xf32> -> vector<8x256xf32>
    %c0_14 = arith.constant 0 : index
    %c0_15 = arith.constant 0 : index
    %59 = vector.load %arg3[%c0_14, %c0_15] : memref<8x1xf32, #tpu.memory_space<vmem>>, vector<8x1xf32>
    %60 = vector.broadcast %59 : vector<8x1xf32> to vector<8x256xf32>
    %61 = arith.addf %58, %60 : vector<8x256xf32>
    %c0_16 = arith.constant 0 : index
    %c0_17 = arith.constant 0 : index
    %c0_18 = arith.constant 0 : index
    %62 = vector.load %arg4[%c0_16, %c0_17, %c0_18] : memref<1x8x256xf32, #tpu.memory_space<vmem>>, vector<1x8x256xf32>
    %63 = vector.shape_cast %62 : vector<1x8x256xf32> to vector<8x256xf32>
    %64 = vector.shape_cast %61 : vector<8x256xf32> to vector<1x8x256xf32>
    tpu.vector_store %arg4[%c0_16, %c0_17, %c0_18], %64 {strides = array<i32>} : memref<1x8x256xf32, #tpu.memory_space<vmem>>, vector<1x8x256xf32>,
    %cst_19 = arith.constant dense<0.000000e+00> : vector<8xf32>
    %65 = vector.multi_reduction <add>, %61, %cst_19 [1] : vector<8x256xf32> to vector<8xf32>
    %66 = vector.shape_cast %65 : vector<8xf32> to vector<8x1xf32>
    %c0_20 = arith.constant 0 : index
    %c0_21 = arith.constant 0 : index
    %c0_22 = arith.constant 0 : index
    %67 = vector.load %arg5[%c0_20, %c0_21, %c0_22] : memref<1x8x1xf32, #tpu.memory_space<vmem>>, vector<1x8x1xf32>
    %68 = vector.shape_cast %67 : vector<1x8x1xf32> to vector<8x1xf32>
    %69 = vector.shape_cast %66 : vector<8x1xf32> to vector<1x8x1xf32>
    tpu.vector_store %arg5[%c0_20, %c0_21, %c0_22], %69 {strides = array<i32>} : memref<1x8x1xf32, #tpu.memory_space<vmem>>, vector<1x8x1xf32>,
    %70 = arith.mulf %61, %61 : vector<8x256xf32>
    %cst_23 = arith.constant dense<0.000000e+00> : vector<8xf32>
    %71 = vector.multi_reduction <add>, %70, %cst_23 [1] : vector<8x256xf32> to vector<8xf32>
    %72 = vector.shape_cast %71 : vector<8xf32> to vector<8x1xf32>
    %c0_24 = arith.constant 0 : index
    %c0_25 = arith.constant 0 : index
    %c0_26 = arith.constant 0 : index
    %73 = vector.load %arg6[%c0_24, %c0_25, %c0_26] : memref<1x8x1xf32, #tpu.memory_space<vmem>>, vector<1x8x1xf32>
    %74 = vector.shape_cast %73 : vector<1x8x1xf32> to vector<8x1xf32>
    %75 = vector.shape_cast %72 : vector<8x1xf32> to vector<1x8x1xf32>
    tpu.vector_store %arg6[%c0_24, %c0_25, %c0_26], %75 {strides = array<i32>} : memref<1x8x1xf32, #tpu.memory_space<vmem>>, vector<1x8x1xf32>,
    return
  }
  func.func @transform_0(%arg0: i32) -> (i32, i32, i32) {
    %c0_i32 = arith.constant 0 : i32
    %c0_i32_0 = arith.constant 0 : i32
    %c0_i32_1 = arith.constant 0 : i32
    return %arg0, %c0_i32, %c0_i32_0 : i32, i32, i32
  }
  func.func @transform_1(%arg0: i32) -> (i32, i32) {
    %c0_i32 = arith.constant 0 : i32
    %c0_i32_0 = arith.constant 0 : i32
    %c0_i32_1 = arith.constant 0 : i32
    return %c0_i32, %c0_i32_0 : i32, i32
  }
  func.func @transform_2(%arg0: i32) -> (i32, i32) {
    %c0_i32 = arith.constant 0 : i32
    %c0_i32_0 = arith.constant 0 : i32
    %c0_i32_1 = arith.constant 0 : i32
    return %c0_i32, %c0_i32_0 : i32, i32
  }
  func.func @transform_3(%arg0: i32) -> (i32, i32, i32) {
    %c0_i32 = arith.constant 0 : i32
    %c0_i32_0 = arith.constant 0 : i32
    %c0_i32_1 = arith.constant 0 : i32
    return %arg0, %c0_i32, %c0_i32_0 : i32, i32, i32
  }
  func.func @transform_4(%arg0: i32) -> (i32, i32, i32) {
    %c0_i32 = arith.constant 0 : i32
    %c0_i32_0 = arith.constant 0 : i32
    %c0_i32_1 = arith.constant 0 : i32
    return %arg0, %c0_i32, %c0_i32_0 : i32, i32, i32
  }
  func.func @transform_5(%arg0: i32) -> (i32, i32, i32) {
    %c0_i32 = arith.constant 0 : i32
    %c0_i32_0 = arith.constant 0 : i32
    %c0_i32_1 = arith.constant 0 : i32
    return %arg0, %c0_i32, %c0_i32_0 : i32, i32, i32
  }
}

module attributes {stable_mosaic.version = 11 : i64} {
  func.func @_bn_act_kernel(%arg0: i32, %arg1: memref<1x8x256xf32, #tpu.memory_space<vmem>>, %arg2: memref<8x1xf32, #tpu.memory_space<vmem>>, %arg3: memref<8x1xf32, #tpu.memory_space<vmem>>, %arg4: memref<1x8x256xf32, #tpu.memory_space<vmem>>) attributes {dimension_semantics = [#tpu.dimension_semantics<parallel>], iteration_bounds = array<i64: 2>, scalar_prefetch = 0 : i64, scratch_operands = 0 : i64, tpu.core_type = #tpu.core_type<tc>, window_params = [{transform_indices = @transform_0, window_bounds = array<i64: 1, 8, 256>}, {pipeline_mode = #tpu.pipeline_mode<synchronous>, transform_indices = @transform_1, window_bounds = array<i64: 8, 1>}, {pipeline_mode = #tpu.pipeline_mode<synchronous>, transform_indices = @transform_2, window_bounds = array<i64: 8, 1>}, {transform_indices = @transform_3, window_bounds = array<i64: 1, 8, 256>}]} {
    %c0 = arith.constant 0 : index
    %c0_0 = arith.constant 0 : index
    %c0_1 = arith.constant 0 : index
    %0 = vector.load %arg1[%c0, %c0_0, %c0_1] : memref<1x8x256xf32, #tpu.memory_space<vmem>>, vector<1x8x256xf32>
    %1 = vector.shape_cast %0 : vector<1x8x256xf32> to vector<8x256xf32>
    %c0_2 = arith.constant 0 : index
    %c0_3 = arith.constant 0 : index
    %2 = vector.load %arg2[%c0_2, %c0_3] : memref<8x1xf32, #tpu.memory_space<vmem>>, vector<8x1xf32>
    %3 = vector.broadcast %2 : vector<8x1xf32> to vector<8x256xf32>
    %4 = arith.mulf %1, %3 : vector<8x256xf32>
    %c0_4 = arith.constant 0 : index
    %c0_5 = arith.constant 0 : index
    %5 = vector.load %arg3[%c0_4, %c0_5] : memref<8x1xf32, #tpu.memory_space<vmem>>, vector<8x1xf32>
    %6 = vector.broadcast %5 : vector<8x1xf32> to vector<8x256xf32>
    %7 = arith.addf %4, %6 : vector<8x256xf32>
    %cst = arith.constant 0.000000e+00 : f32
    %8 = vector.broadcast %cst : f32 to vector<8x256xf32>
    %9 = arith.maximumf %7, %8 : vector<8x256xf32>
    %c0_6 = arith.constant 0 : index
    %c0_7 = arith.constant 0 : index
    %c0_8 = arith.constant 0 : index
    %10 = vector.load %arg4[%c0_6, %c0_7, %c0_8] : memref<1x8x256xf32, #tpu.memory_space<vmem>>, vector<1x8x256xf32>
    %11 = vector.shape_cast %10 : vector<1x8x256xf32> to vector<8x256xf32>
    %12 = vector.shape_cast %9 : vector<8x256xf32> to vector<1x8x256xf32>
    tpu.vector_store %arg4[%c0_6, %c0_7, %c0_8], %12 {strides = array<i32>} : memref<1x8x256xf32, #tpu.memory_space<vmem>>, vector<1x8x256xf32>,
    return
  }
  func.func @transform_0(%arg0: i32) -> (i32, i32, i32) {
    %c0_i32 = arith.constant 0 : i32
    %c0_i32_0 = arith.constant 0 : i32
    %c0_i32_1 = arith.constant 0 : i32
    return %arg0, %c0_i32, %c0_i32_0 : i32, i32, i32
  }
  func.func @transform_1(%arg0: i32) -> (i32, i32) {
    %c0_i32 = arith.constant 0 : i32
    %c0_i32_0 = arith.constant 0 : i32
    %c0_i32_1 = arith.constant 0 : i32
    return %c0_i32, %c0_i32_0 : i32, i32
  }
  func.func @transform_2(%arg0: i32) -> (i32, i32) {
    %c0_i32 = arith.constant 0 : i32
    %c0_i32_0 = arith.constant 0 : i32
    %c0_i32_1 = arith.constant 0 : i32
    return %c0_i32, %c0_i32_0 : i32, i32
  }
  func.func @transform_3(%arg0: i32) -> (i32, i32, i32) {
    %c0_i32 = arith.constant 0 : i32
    %c0_i32_0 = arith.constant 0 : i32
    %c0_i32_1 = arith.constant 0 : i32
    return %arg0, %c0_i32, %c0_i32_0 : i32, i32, i32
  }
}

module attributes {stable_mosaic.version = 11 : i64} {
  func.func @_prelu_channel_sum_kernel(%arg0: i32, %arg1: memref<1x8x256xf32, #tpu.memory_space<vmem>>, %arg2: memref<1x1x256xf32, #tpu.memory_space<vmem>>) attributes {dimension_semantics = [#tpu.dimension_semantics<parallel>], iteration_bounds = array<i64: 2>, scalar_prefetch = 0 : i64, scratch_operands = 0 : i64, tpu.core_type = #tpu.core_type<tc>, window_params = [{transform_indices = @transform_0, window_bounds = array<i64: 1, 8, 256>}, {transform_indices = @transform_1, window_bounds = array<i64: 1, 1, 256>}]} {
    %c0 = arith.constant 0 : index
    %c0_0 = arith.constant 0 : index
    %c0_1 = arith.constant 0 : index
    %0 = vector.load %arg1[%c0, %c0_0, %c0_1] : memref<1x8x256xf32, #tpu.memory_space<vmem>>, vector<1x8x256xf32>
    %1 = vector.shape_cast %0 : vector<1x8x256xf32> to vector<8x256xf32>
    %cst = arith.constant dense<0.000000e+00> : vector<256xf32>
    %2 = vector.multi_reduction <add>, %1, %cst [0] : vector<8x256xf32> to vector<256xf32>
    %3 = vector.shape_cast %2 : vector<256xf32> to vector<1x256xf32>
    %c0_2 = arith.constant 0 : index
    %c0_3 = arith.constant 0 : index
    %c0_4 = arith.constant 0 : index
    %4 = vector.load %arg2[%c0_2, %c0_3, %c0_4] : memref<1x1x256xf32, #tpu.memory_space<vmem>>, vector<1x1x256xf32>
    %5 = vector.shape_cast %4 : vector<1x1x256xf32> to vector<1x256xf32>
    %6 = vector.shape_cast %3 : vector<1x256xf32> to vector<1x1x256xf32>
    tpu.vector_store %arg2[%c0_2, %c0_3, %c0_4], %6 {strides = array<i32>} : memref<1x1x256xf32, #tpu.memory_space<vmem>>, vector<1x1x256xf32>,
    return
  }
  func.func @transform_0(%arg0: i32) -> (i32, i32, i32) {
    %c0_i32 = arith.constant 0 : i32
    %c0_i32_0 = arith.constant 0 : i32
    %c0_i32_1 = arith.constant 0 : i32
    return %arg0, %c0_i32, %c0_i32_0 : i32, i32, i32
  }
  func.func @transform_1(%arg0: i32) -> (i32, i32, i32) {
    %c0_i32 = arith.constant 0 : i32
    %c0_i32_0 = arith.constant 0 : i32
    %c0_i32_1 = arith.constant 0 : i32
    return %arg0, %c0_i32, %c0_i32_0 : i32, i32, i32
  }
}

module attributes {stable_mosaic.version = 11 : i64} {
  func.func @_fourier_mix_kernel(%arg0: memref<2x2x16xf32, #tpu.memory_space<vmem>>, %arg1: memref<2x2x16xf32, #tpu.memory_space<vmem>>, %arg2: memref<2x16x16xf32, #tpu.memory_space<vmem>>, %arg3: memref<2x16x16xf32, #tpu.memory_space<vmem>>, %arg4: memref<2x2x16x16xf32, #tpu.memory_space<vmem>>, %arg5: memref<2x2x16x16xf32, #tpu.memory_space<vmem>>) attributes {dimension_semantics = [], scalar_prefetch = 0 : i64, scratch_operands = 0 : i64, tpu.core_type = #tpu.core_type<tc>} {
    %c0 = arith.constant 0 : index
    %c0_0 = arith.constant 0 : index
    %c0_1 = arith.constant 0 : index
    %0 = vector.load %arg0[%c0, %c0_0, %c0_1] : memref<2x2x16xf32, #tpu.memory_space<vmem>>, vector<2x2x16xf32>
    %1 = vector.shape_cast %0 : vector<2x2x16xf32> to vector<2x2x1x16xf32>
    %c0_2 = arith.constant 0 : index
    %c0_3 = arith.constant 0 : index
    %c0_4 = arith.constant 0 : index
    %2 = vector.load %arg1[%c0_2, %c0_3, %c0_4] : memref<2x2x16xf32, #tpu.memory_space<vmem>>, vector<2x2x16xf32>
    %3 = vector.shape_cast %2 : vector<2x2x16xf32> to vector<2x2x1x16xf32>
    %c0_5 = arith.constant 0 : index
    %c0_6 = arith.constant 0 : index
    %c0_7 = arith.constant 0 : index
    %4 = vector.load %arg2[%c0_5, %c0_6, %c0_7] : memref<2x16x16xf32, #tpu.memory_space<vmem>>, vector<2x16x16xf32>
    %5 = vector.shape_cast %4 : vector<2x16x16xf32> to vector<2x1x16x16xf32>
    %c0_8 = arith.constant 0 : index
    %c0_9 = arith.constant 0 : index
    %c0_10 = arith.constant 0 : index
    %6 = vector.load %arg3[%c0_8, %c0_9, %c0_10] : memref<2x16x16xf32, #tpu.memory_space<vmem>>, vector<2x16x16xf32>
    %7 = vector.shape_cast %6 : vector<2x16x16xf32> to vector<2x1x16x16xf32>
    %8 = vector.broadcast %1 : vector<2x2x1x16xf32> to vector<2x2x16x16xf32>
    %9 = vector.broadcast %5 : vector<2x1x16x16xf32> to vector<2x2x16x16xf32>
    %10 = arith.mulf %8, %9 : vector<2x2x16x16xf32>
    %11 = vector.broadcast %3 : vector<2x2x1x16xf32> to vector<2x2x16x16xf32>
    %12 = vector.broadcast %7 : vector<2x1x16x16xf32> to vector<2x2x16x16xf32>
    %13 = arith.mulf %11, %12 : vector<2x2x16x16xf32>
    %14 = arith.subf %10, %13 : vector<2x2x16x16xf32>
    %c0_11 = arith.constant 0 : index
    %c0_12 = arith.constant 0 : index
    %c0_13 = arith.constant 0 : index
    %c0_14 = arith.constant 0 : index
    %15 = vector.load %arg4[%c0_11, %c0_12, %c0_13, %c0_14] : memref<2x2x16x16xf32, #tpu.memory_space<vmem>>, vector<2x2x16x16xf32>
    tpu.vector_store %arg4[%c0_11, %c0_12, %c0_13, %c0_14], %14 {strides = array<i32>} : memref<2x2x16x16xf32, #tpu.memory_space<vmem>>, vector<2x2x16x16xf32>,
    %16 = vector.broadcast %1 : vector<2x2x1x16xf32> to vector<2x2x16x16xf32>
    %17 = vector.broadcast %7 : vector<2x1x16x16xf32> to vector<2x2x16x16xf32>
    %18 = arith.mulf %16, %17 : vector<2x2x16x16xf32>
    %19 = vector.broadcast %3 : vector<2x2x1x16xf32> to vector<2x2x16x16xf32>
    %20 = vector.broadcast %5 : vector<2x1x16x16xf32> to vector<2x2x16x16xf32>
    %21 = arith.mulf %19, %20 : vector<2x2x16x16xf32>
    %22 = arith.addf %18, %21 : vector<2x2x16x16xf32>
    %c0_15 = arith.constant 0 : index
    %c0_16 = arith.constant 0 : index
    %c0_17 = arith.constant 0 : index
    %c0_18 = arith.constant 0 : index
    %23 = vector.load %arg5[%c0_15, %c0_16, %c0_17, %c0_18] : memref<2x2x16x16xf32, #tpu.memory_space<vmem>>, vector<2x2x16x16xf32>
    tpu.vector_store %arg5[%c0_15, %c0_16, %c0_17, %c0_18], %22 {strides = array<i32>} : memref<2x2x16x16xf32, #tpu.memory_space<vmem>>, vector<2x2x16x16xf32>,
    return
  }
}

module attributes {stable_mosaic.version = 11 : i64} {
  func.func @_conv_bias_stats_kernel(%arg0: i32, %arg1: memref<1x8x290xf32, #tpu.memory_space<vmem>>, %arg2: memref<16x72xf32, #tpu.memory_space<vmem>>, %arg3: memref<16x1xf32, #tpu.memory_space<vmem>>, %arg4: memref<1x16x256xf32, #tpu.memory_space<vmem>>, %arg5: memref<1x16x1xf32, #tpu.memory_space<vmem>>, %arg6: memref<1x16x1xf32, #tpu.memory_space<vmem>>) attributes {dimension_semantics = [#tpu.dimension_semantics<parallel>], iteration_bounds = array<i64: 2>, scalar_prefetch = 0 : i64, scratch_operands = 0 : i64, tpu.core_type = #tpu.core_type<tc>, window_params = [{transform_indices = @transform_0, window_bounds = array<i64: 1, 8, 290>}, {pipeline_mode = #tpu.pipeline_mode<synchronous>, transform_indices = @transform_1, window_bounds = array<i64: 16, 72>}, {pipeline_mode = #tpu.pipeline_mode<synchronous>, transform_indices = @transform_2, window_bounds = array<i64: 16, 1>}, {transform_indices = @transform_3, window_bounds = array<i64: 1, 16, 256>}, {transform_indices = @transform_4, window_bounds = array<i64: 1, 16, 1>}, {transform_indices = @transform_5, window_bounds = array<i64: 1, 16, 1>}]} {
    %c0 = arith.constant 0 : index
    %c0_0 = arith.constant 0 : index
    %c0_1 = arith.constant 0 : index
    %0 = vector.load %arg1[%c0, %c0_0, %c0_1] : memref<1x8x290xf32, #tpu.memory_space<vmem>>, vector<1x8x290xf32>
    %1 = vector.shape_cast %0 : vector<1x8x290xf32> to vector<8x290xf32>
    %2 = tpu.iota {dimensions = array<i32: 1>} : vector<1x256xi32>
    %c16_i32 = arith.constant 16 : i32
    %c0_i32 = arith.constant 0 : i32
    %3 = arith.cmpi eq, %c16_i32, %c0_i32 : i32
    %c1_i32 = arith.constant 1 : i32
    %4 = arith.select %3, %c1_i32, %c16_i32 : i32
    %5 = vector.broadcast %4 : i32 to vector<1x256xi32>
    %6 = arith.remsi %2, %5 : vector<1x256xi32>
    %c0_i32_2 = arith.constant 0 : i32
    %7 = vector.broadcast %c0_i32_2 : i32 to vector<1x256xi32>
    %8 = arith.cmpi ne, %6, %7 : vector<1x256xi32>
    %c0_i32_3 = arith.constant 0 : i32
    %9 = vector.broadcast %c0_i32_3 : i32 to vector<1x256xi32>
    %10 = arith.cmpi slt, %6, %9 : vector<1x256xi32>
    %c0_i32_4 = arith.constant 0 : i32
    %11 = arith.cmpi slt, %4, %c0_i32_4 : i32
    %12 = vector.broadcast %11 : i1 to vector<1x256xi1>
    %13 = vector.broadcast %12 : vector<1x256xi1> to vector<1x256xi1>
    %14 = arith.xori %10, %13 : vector<1x256xi1>
    %15 = arith.andi %14, %8 : vector<1x256xi1>
    %16 = vector.broadcast %4 : i32 to vector<1x256xi32>
    %17 = arith.addi %6, %16 : vector<1x256xi32>
    %18 = arith.select %15, %17, %6 : vector<1x256xi1>, vector<1x256xi32>
    %c0_i32_5 = arith.constant 0 : i32
    %19 = vector.broadcast %c0_i32_5 : i32 to vector<1x256xi32>
    %20 = arith.cmpi ne, %18, %19 : vector<1x256xi32>
    %c15_i32 = arith.constant 15 : i32
    %21 = vector.broadcast %c15_i32 : i32 to vector<1x256xi32>
    %22 = arith.cmpi ne, %18, %21 : vector<1x256xi32>
    %23 = vector.extract_strided_slice %1 {offsets = [0, 0], sizes = [8, 256], strides = [1, 1]} : vector<8x290xf32> to vector<8x256xf32>
    %cst = arith.constant 0.000000e+00 : f32
    %24 = vector.shape_cast %20 : vector<1x256xi1> to vector<1x256xi1>
    %25 = vector.broadcast %24 : vector<1x256xi1> to vector<8x256xi1>
    %26 = vector.broadcast %cst : f32 to vector<8x256xf32>
    %27 = arith.select %25, %23, %26 : vector<8x256xi1>, vector<8x256xf32>
    %28 = vector.extract_strided_slice %1 {offsets = [0, 1], sizes = [8, 256], strides = [1, 1]} : vector<8x290xf32> to vector<8x256xf32>
    %29 = vector.extract_strided_slice %1 {offsets = [0, 2], sizes = [8, 256], strides = [1, 1]} : vector<8x290xf32> to vector<8x256xf32>
    %cst_6 = arith.constant 0.000000e+00 : f32
    %30 = vector.shape_cast %22 : vector<1x256xi1> to vector<1x256xi1>
    %31 = vector.broadcast %30 : vector<1x256xi1> to vector<8x256xi1>
    %32 = vector.broadcast %cst_6 : f32 to vector<8x256xf32>
    %33 = arith.select %31, %29, %32 : vector<8x256xi1>, vector<8x256xf32>
    %34 = vector.extract_strided_slice %1 {offsets = [0, 16], sizes = [8, 256], strides = [1, 1]} : vector<8x290xf32> to vector<8x256xf32>
    %cst_7 = arith.constant 0.000000e+00 : f32
    %35 = vector.shape_cast %20 : vector<1x256xi1> to vector<1x256xi1>
    %36 = vector.broadcast %35 : vector<1x256xi1> to vector<8x256xi1>
    %37 = vector.broadcast %cst_7 : f32 to vector<8x256xf32>
    %38 = arith.select %36, %34, %37 : vector<8x256xi1>, vector<8x256xf32>
    %39 = vector.extract_strided_slice %1 {offsets = [0, 17], sizes = [8, 256], strides = [1, 1]} : vector<8x290xf32> to vector<8x256xf32>
    %40 = vector.extract_strided_slice %1 {offsets = [0, 18], sizes = [8, 256], strides = [1, 1]} : vector<8x290xf32> to vector<8x256xf32>
    %cst_8 = arith.constant 0.000000e+00 : f32
    %41 = vector.shape_cast %22 : vector<1x256xi1> to vector<1x256xi1>
    %42 = vector.broadcast %41 : vector<1x256xi1> to vector<8x256xi1>
    %43 = vector.broadcast %cst_8 : f32 to vector<8x256xf32>
    %44 = arith.select %42, %40, %43 : vector<8x256xi1>, vector<8x256xf32>
    %45 = vector.extract_strided_slice %1 {offsets = [0, 32], sizes = [8, 256], strides = [1, 1]} : vector<8x290xf32> to vector<8x256xf32>
    %cst_9 = arith.constant 0.000000e+00 : f32
    %46 = vector.shape_cast %20 : vector<1x256xi1> to vector<1x256xi1>
    %47 = vector.broadcast %46 : vector<1x256xi1> to vector<8x256xi1>
    %48 = vector.broadcast %cst_9 : f32 to vector<8x256xf32>
    %49 = arith.select %47, %45, %48 : vector<8x256xi1>, vector<8x256xf32>
    %50 = vector.extract_strided_slice %1 {offsets = [0, 33], sizes = [8, 256], strides = [1, 1]} : vector<8x290xf32> to vector<8x256xf32>
    %51 = vector.extract_strided_slice %1 {offsets = [0, 34], sizes = [8, 256], strides = [1, 1]} : vector<8x290xf32> to vector<8x256xf32>
    %cst_10 = arith.constant 0.000000e+00 : f32
    %52 = vector.shape_cast %22 : vector<1x256xi1> to vector<1x256xi1>
    %53 = vector.broadcast %52 : vector<1x256xi1> to vector<8x256xi1>
    %54 = vector.broadcast %cst_10 : f32 to vector<8x256xf32>
    %55 = arith.select %53, %51, %54 : vector<8x256xi1>, vector<8x256xf32>
    %56 = tpu.concatenate %27, %28, %33, %38, %39, %44, %49, %50, %55 in 0 : vector<8x256xf32>, vector<8x256xf32>, vector<8x256xf32>, vector<8x256xf32>, vector<8x256xf32>, vector<8x256xf32>, vector<8x256xf32>, vector<8x256xf32>, vector<8x256xf32> -> vector<72x256xf32>
    %c0_11 = arith.constant 0 : index
    %c0_12 = arith.constant 0 : index
    %57 = vector.load %arg2[%c0_11, %c0_12] : memref<16x72xf32, #tpu.memory_space<vmem>>, vector<16x72xf32>
    %cst_13 = arith.constant dense<0.000000e+00> : vector<16x256xf32>
    %58 = tpu.matmul %57, %56, %cst_13 {dimension_numbers = #tpu.dot_dimension_numbers<[1], [0], [0], [1], [0, 0, 1, 1], [], []>} : vector<16x72xf32>, vector<72x256xf32>, vector<16x256xf32> -> vector<16x256xf32>
    %c0_14 = arith.constant 0 : index
    %c0_15 = arith.constant 0 : index
    %59 = vector.load %arg3[%c0_14, %c0_15] : memref<16x1xf32, #tpu.memory_space<vmem>>, vector<16x1xf32>
    %60 = vector.broadcast %59 : vector<16x1xf32> to vector<16x256xf32>
    %61 = arith.addf %58, %60 : vector<16x256xf32>
    %c0_16 = arith.constant 0 : index
    %c0_17 = arith.constant 0 : index
    %c0_18 = arith.constant 0 : index
    %62 = vector.load %arg4[%c0_16, %c0_17, %c0_18] : memref<1x16x256xf32, #tpu.memory_space<vmem>>, vector<1x16x256xf32>
    %63 = vector.shape_cast %62 : vector<1x16x256xf32> to vector<16x256xf32>
    %64 = vector.shape_cast %61 : vector<16x256xf32> to vector<1x16x256xf32>
    tpu.vector_store %arg4[%c0_16, %c0_17, %c0_18], %64 {strides = array<i32>} : memref<1x16x256xf32, #tpu.memory_space<vmem>>, vector<1x16x256xf32>,
    %cst_19 = arith.constant dense<0.000000e+00> : vector<16xf32>
    %65 = vector.multi_reduction <add>, %61, %cst_19 [1] : vector<16x256xf32> to vector<16xf32>
    %66 = vector.shape_cast %65 : vector<16xf32> to vector<16x1xf32>
    %c0_20 = arith.constant 0 : index
    %c0_21 = arith.constant 0 : index
    %c0_22 = arith.constant 0 : index
    %67 = vector.load %arg5[%c0_20, %c0_21, %c0_22] : memref<1x16x1xf32, #tpu.memory_space<vmem>>, vector<1x16x1xf32>
    %68 = vector.shape_cast %67 : vector<1x16x1xf32> to vector<16x1xf32>
    %69 = vector.shape_cast %66 : vector<16x1xf32> to vector<1x16x1xf32>
    tpu.vector_store %arg5[%c0_20, %c0_21, %c0_22], %69 {strides = array<i32>} : memref<1x16x1xf32, #tpu.memory_space<vmem>>, vector<1x16x1xf32>,
    %70 = arith.mulf %61, %61 : vector<16x256xf32>
    %cst_23 = arith.constant dense<0.000000e+00> : vector<16xf32>
    %71 = vector.multi_reduction <add>, %70, %cst_23 [1] : vector<16x256xf32> to vector<16xf32>
    %72 = vector.shape_cast %71 : vector<16xf32> to vector<16x1xf32>
    %c0_24 = arith.constant 0 : index
    %c0_25 = arith.constant 0 : index
    %c0_26 = arith.constant 0 : index
    %73 = vector.load %arg6[%c0_24, %c0_25, %c0_26] : memref<1x16x1xf32, #tpu.memory_space<vmem>>, vector<1x16x1xf32>
    %74 = vector.shape_cast %73 : vector<1x16x1xf32> to vector<16x1xf32>
    %75 = vector.shape_cast %72 : vector<16x1xf32> to vector<1x16x1xf32>
    tpu.vector_store %arg6[%c0_24, %c0_25, %c0_26], %75 {strides = array<i32>} : memref<1x16x1xf32, #tpu.memory_space<vmem>>, vector<1x16x1xf32>,
    return
  }
  func.func @transform_0(%arg0: i32) -> (i32, i32, i32) {
    %c0_i32 = arith.constant 0 : i32
    %c0_i32_0 = arith.constant 0 : i32
    %c0_i32_1 = arith.constant 0 : i32
    return %arg0, %c0_i32, %c0_i32_0 : i32, i32, i32
  }
  func.func @transform_1(%arg0: i32) -> (i32, i32) {
    %c0_i32 = arith.constant 0 : i32
    %c0_i32_0 = arith.constant 0 : i32
    %c0_i32_1 = arith.constant 0 : i32
    return %c0_i32, %c0_i32_0 : i32, i32
  }
  func.func @transform_2(%arg0: i32) -> (i32, i32) {
    %c0_i32 = arith.constant 0 : i32
    %c0_i32_0 = arith.constant 0 : i32
    %c0_i32_1 = arith.constant 0 : i32
    return %c0_i32, %c0_i32_0 : i32, i32
  }
  func.func @transform_3(%arg0: i32) -> (i32, i32, i32) {
    %c0_i32 = arith.constant 0 : i32
    %c0_i32_0 = arith.constant 0 : i32
    %c0_i32_1 = arith.constant 0 : i32
    return %arg0, %c0_i32, %c0_i32_0 : i32, i32, i32
  }
  func.func @transform_4(%arg0: i32) -> (i32, i32, i32) {
    %c0_i32 = arith.constant 0 : i32
    %c0_i32_0 = arith.constant 0 : i32
    %c0_i32_1 = arith.constant 0 : i32
    return %arg0, %c0_i32, %c0_i32_0 : i32, i32, i32
  }
  func.func @transform_5(%arg0: i32) -> (i32, i32, i32) {
    %c0_i32 = arith.constant 0 : i32
    %c0_i32_0 = arith.constant 0 : i32
    %c0_i32_1 = arith.constant 0 : i32
    return %arg0, %c0_i32, %c0_i32_0 : i32, i32, i32
  }
}

module attributes {stable_mosaic.version = 11 : i64} {
  func.func @_bn_act_kernel(%arg0: i32, %arg1: memref<1x16x256xf32, #tpu.memory_space<vmem>>, %arg2: memref<16x1xf32, #tpu.memory_space<vmem>>, %arg3: memref<16x1xf32, #tpu.memory_space<vmem>>, %arg4: memref<1x16x256xf32, #tpu.memory_space<vmem>>) attributes {dimension_semantics = [#tpu.dimension_semantics<parallel>], iteration_bounds = array<i64: 2>, scalar_prefetch = 0 : i64, scratch_operands = 0 : i64, tpu.core_type = #tpu.core_type<tc>, window_params = [{transform_indices = @transform_0, window_bounds = array<i64: 1, 16, 256>}, {pipeline_mode = #tpu.pipeline_mode<synchronous>, transform_indices = @transform_1, window_bounds = array<i64: 16, 1>}, {pipeline_mode = #tpu.pipeline_mode<synchronous>, transform_indices = @transform_2, window_bounds = array<i64: 16, 1>}, {transform_indices = @transform_3, window_bounds = array<i64: 1, 16, 256>}]} {
    %c0 = arith.constant 0 : index
    %c0_0 = arith.constant 0 : index
    %c0_1 = arith.constant 0 : index
    %0 = vector.load %arg1[%c0, %c0_0, %c0_1] : memref<1x16x256xf32, #tpu.memory_space<vmem>>, vector<1x16x256xf32>
    %1 = vector.shape_cast %0 : vector<1x16x256xf32> to vector<16x256xf32>
    %c0_2 = arith.constant 0 : index
    %c0_3 = arith.constant 0 : index
    %2 = vector.load %arg2[%c0_2, %c0_3] : memref<16x1xf32, #tpu.memory_space<vmem>>, vector<16x1xf32>
    %3 = vector.broadcast %2 : vector<16x1xf32> to vector<16x256xf32>
    %4 = arith.mulf %1, %3 : vector<16x256xf32>
    %c0_4 = arith.constant 0 : index
    %c0_5 = arith.constant 0 : index
    %5 = vector.load %arg3[%c0_4, %c0_5] : memref<16x1xf32, #tpu.memory_space<vmem>>, vector<16x1xf32>
    %6 = vector.broadcast %5 : vector<16x1xf32> to vector<16x256xf32>
    %7 = arith.addf %4, %6 : vector<16x256xf32>
    %cst = arith.constant 0.000000e+00 : f32
    %8 = vector.broadcast %cst : f32 to vector<16x256xf32>
    %9 = arith.maximumf %7, %8 : vector<16x256xf32>
    %c0_6 = arith.constant 0 : index
    %c0_7 = arith.constant 0 : index
    %c0_8 = arith.constant 0 : index
    %10 = vector.load %arg4[%c0_6, %c0_7, %c0_8] : memref<1x16x256xf32, #tpu.memory_space<vmem>>, vector<1x16x256xf32>
    %11 = vector.shape_cast %10 : vector<1x16x256xf32> to vector<16x256xf32>
    %12 = vector.shape_cast %9 : vector<16x256xf32> to vector<1x16x256xf32>
    tpu.vector_store %arg4[%c0_6, %c0_7, %c0_8], %12 {strides = array<i32>} : memref<1x16x256xf32, #tpu.memory_space<vmem>>, vector<1x16x256xf32>,
    return
  }
  func.func @transform_0(%arg0: i32) -> (i32, i32, i32) {
    %c0_i32 = arith.constant 0 : i32
    %c0_i32_0 = arith.constant 0 : i32
    %c0_i32_1 = arith.constant 0 : i32
    return %arg0, %c0_i32, %c0_i32_0 : i32, i32, i32
  }
  func.func @transform_1(%arg0: i32) -> (i32, i32) {
    %c0_i32 = arith.constant 0 : i32
    %c0_i32_0 = arith.constant 0 : i32
    %c0_i32_1 = arith.constant 0 : i32
    return %c0_i32, %c0_i32_0 : i32, i32
  }
  func.func @transform_2(%arg0: i32) -> (i32, i32) {
    %c0_i32 = arith.constant 0 : i32
    %c0_i32_0 = arith.constant 0 : i32
    %c0_i32_1 = arith.constant 0 : i32
    return %c0_i32, %c0_i32_0 : i32, i32
  }
  func.func @transform_3(%arg0: i32) -> (i32, i32, i32) {
    %c0_i32 = arith.constant 0 : i32
    %c0_i32_0 = arith.constant 0 : i32
    %c0_i32_1 = arith.constant 0 : i32
    return %arg0, %c0_i32, %c0_i32_0 : i32, i32, i32
  }
}

module attributes {stable_mosaic.version = 11 : i64} {
  func.func @_prelu_channel_sum_kernel(%arg0: i32, %arg1: memref<1x32x256xf32, #tpu.memory_space<vmem>>, %arg2: memref<1x1x256xf32, #tpu.memory_space<vmem>>) attributes {dimension_semantics = [#tpu.dimension_semantics<parallel>], iteration_bounds = array<i64: 2>, scalar_prefetch = 0 : i64, scratch_operands = 0 : i64, tpu.core_type = #tpu.core_type<tc>, window_params = [{transform_indices = @transform_0, window_bounds = array<i64: 1, 32, 256>}, {transform_indices = @transform_1, window_bounds = array<i64: 1, 1, 256>}]} {
    %c0 = arith.constant 0 : index
    %c0_0 = arith.constant 0 : index
    %c0_1 = arith.constant 0 : index
    %0 = vector.load %arg1[%c0, %c0_0, %c0_1] : memref<1x32x256xf32, #tpu.memory_space<vmem>>, vector<1x32x256xf32>
    %1 = vector.shape_cast %0 : vector<1x32x256xf32> to vector<32x256xf32>
    %cst = arith.constant dense<0.000000e+00> : vector<256xf32>
    %2 = vector.multi_reduction <add>, %1, %cst [0] : vector<32x256xf32> to vector<256xf32>
    %3 = vector.shape_cast %2 : vector<256xf32> to vector<1x256xf32>
    %c0_2 = arith.constant 0 : index
    %c0_3 = arith.constant 0 : index
    %c0_4 = arith.constant 0 : index
    %4 = vector.load %arg2[%c0_2, %c0_3, %c0_4] : memref<1x1x256xf32, #tpu.memory_space<vmem>>, vector<1x1x256xf32>
    %5 = vector.shape_cast %4 : vector<1x1x256xf32> to vector<1x256xf32>
    %6 = vector.shape_cast %3 : vector<1x256xf32> to vector<1x1x256xf32>
    tpu.vector_store %arg2[%c0_2, %c0_3, %c0_4], %6 {strides = array<i32>} : memref<1x1x256xf32, #tpu.memory_space<vmem>>, vector<1x1x256xf32>,
    return
  }
  func.func @transform_0(%arg0: i32) -> (i32, i32, i32) {
    %c0_i32 = arith.constant 0 : i32
    %c0_i32_0 = arith.constant 0 : i32
    %c0_i32_1 = arith.constant 0 : i32
    return %arg0, %c0_i32, %c0_i32_0 : i32, i32, i32
  }
  func.func @transform_1(%arg0: i32) -> (i32, i32, i32) {
    %c0_i32 = arith.constant 0 : i32
    %c0_i32_0 = arith.constant 0 : i32
    %c0_i32_1 = arith.constant 0 : i32
    return %arg0, %c0_i32, %c0_i32_0 : i32, i32, i32
  }
}

module attributes {stable_mosaic.version = 11 : i64} {
  func.func @_prelu_channel_sum_kernel(%arg0: i32, %arg1: memref<1x1xf32, #tpu.memory_space<vmem>>, %arg2: memref<1x16x256xf32, #tpu.memory_space<vmem>>, %arg3: memref<1x1x256xf32, #tpu.memory_space<vmem>>) attributes {dimension_semantics = [#tpu.dimension_semantics<parallel>], iteration_bounds = array<i64: 2>, scalar_prefetch = 0 : i64, scratch_operands = 0 : i64, tpu.core_type = #tpu.core_type<tc>, window_params = [{pipeline_mode = #tpu.pipeline_mode<synchronous>, transform_indices = @transform_0, window_bounds = array<i64: 1, 1>}, {transform_indices = @transform_1, window_bounds = array<i64: 1, 16, 256>}, {transform_indices = @transform_2, window_bounds = array<i64: 1, 1, 256>}]} {
    %c0 = arith.constant 0 : index
    %c0_0 = arith.constant 0 : index
    %c0_1 = arith.constant 0 : index
    %0 = vector.load %arg2[%c0, %c0_0, %c0_1] : memref<1x16x256xf32, #tpu.memory_space<vmem>>, vector<1x16x256xf32>
    %1 = vector.shape_cast %0 : vector<1x16x256xf32> to vector<16x256xf32>
    %cst = arith.constant 0.000000e+00 : f32
    %2 = vector.broadcast %cst : f32 to vector<16x256xf32>
    %3 = arith.cmpf oge, %1, %2 : vector<16x256xf32>
    %c0_2 = arith.constant 0 : index
    %c0_3 = arith.constant 0 : index
    %4 = vector.load %arg1[%c0_2, %c0_3] : memref<1x1xf32, #tpu.memory_space<vmem>>, vector<1x1xf32>
    %5 = vector.broadcast %4 : vector<1x1xf32> to vector<16x256xf32>
    %6 = arith.mulf %5, %1 : vector<16x256xf32>
    %7 = arith.select %3, %1, %6 : vector<16x256xi1>, vector<16x256xf32>
    %cst_4 = arith.constant dense<0.000000e+00> : vector<256xf32>
    %8 = vector.multi_reduction <add>, %7, %cst_4 [0] : vector<16x256xf32> to vector<256xf32>
    %9 = vector.shape_cast %8 : vector<256xf32> to vector<1x256xf32>
    %c0_5 = arith.constant 0 : index
    %c0_6 = arith.constant 0 : index
    %c0_7 = arith.constant 0 : index
    %10 = vector.load %arg3[%c0_5, %c0_6, %c0_7] : memref<1x1x256xf32, #tpu.memory_space<vmem>>, vector<1x1x256xf32>
    %11 = vector.shape_cast %10 : vector<1x1x256xf32> to vector<1x256xf32>
    %12 = vector.shape_cast %9 : vector<1x256xf32> to vector<1x1x256xf32>
    tpu.vector_store %arg3[%c0_5, %c0_6, %c0_7], %12 {strides = array<i32>} : memref<1x1x256xf32, #tpu.memory_space<vmem>>, vector<1x1x256xf32>,
    return
  }
  func.func @transform_0(%arg0: i32) -> (i32, i32) {
    %c0_i32 = arith.constant 0 : i32
    %c0_i32_0 = arith.constant 0 : i32
    %c0_i32_1 = arith.constant 0 : i32
    return %c0_i32, %c0_i32_0 : i32, i32
  }
  func.func @transform_1(%arg0: i32) -> (i32, i32, i32) {
    %c0_i32 = arith.constant 0 : i32
    %c0_i32_0 = arith.constant 0 : i32
    %c0_i32_1 = arith.constant 0 : i32
    return %arg0, %c0_i32, %c0_i32_0 : i32, i32, i32
  }
  func.func @transform_2(%arg0: i32) -> (i32, i32, i32) {
    %c0_i32 = arith.constant 0 : i32
    %c0_i32_0 = arith.constant 0 : i32
    %c0_i32_1 = arith.constant 0 : i32
    return %arg0, %c0_i32, %c0_i32_0 : i32, i32, i32
  }
}

module attributes {stable_mosaic.version = 11 : i64} {
  func.func @_fourier_mix_kernel(%arg0: memref<2x2x16xf32, #tpu.memory_space<vmem>>, %arg1: memref<2x2x16xf32, #tpu.memory_space<vmem>>, %arg2: memref<2x8x16xf32, #tpu.memory_space<vmem>>, %arg3: memref<2x8x16xf32, #tpu.memory_space<vmem>>, %arg4: memref<2x2x8x16xf32, #tpu.memory_space<vmem>>, %arg5: memref<2x2x8x16xf32, #tpu.memory_space<vmem>>) attributes {dimension_semantics = [], scalar_prefetch = 0 : i64, scratch_operands = 0 : i64, tpu.core_type = #tpu.core_type<tc>} {
    %c0 = arith.constant 0 : index
    %c0_0 = arith.constant 0 : index
    %c0_1 = arith.constant 0 : index
    %0 = vector.load %arg0[%c0, %c0_0, %c0_1] : memref<2x2x16xf32, #tpu.memory_space<vmem>>, vector<2x2x16xf32>
    %1 = vector.shape_cast %0 : vector<2x2x16xf32> to vector<2x2x1x16xf32>
    %c0_2 = arith.constant 0 : index
    %c0_3 = arith.constant 0 : index
    %c0_4 = arith.constant 0 : index
    %2 = vector.load %arg1[%c0_2, %c0_3, %c0_4] : memref<2x2x16xf32, #tpu.memory_space<vmem>>, vector<2x2x16xf32>
    %3 = vector.shape_cast %2 : vector<2x2x16xf32> to vector<2x2x1x16xf32>
    %c0_5 = arith.constant 0 : index
    %c0_6 = arith.constant 0 : index
    %c0_7 = arith.constant 0 : index
    %4 = vector.load %arg2[%c0_5, %c0_6, %c0_7] : memref<2x8x16xf32, #tpu.memory_space<vmem>>, vector<2x8x16xf32>
    %5 = vector.shape_cast %4 : vector<2x8x16xf32> to vector<2x1x8x16xf32>
    %c0_8 = arith.constant 0 : index
    %c0_9 = arith.constant 0 : index
    %c0_10 = arith.constant 0 : index
    %6 = vector.load %arg3[%c0_8, %c0_9, %c0_10] : memref<2x8x16xf32, #tpu.memory_space<vmem>>, vector<2x8x16xf32>
    %7 = vector.shape_cast %6 : vector<2x8x16xf32> to vector<2x1x8x16xf32>
    %8 = vector.broadcast %1 : vector<2x2x1x16xf32> to vector<2x2x8x16xf32>
    %9 = vector.broadcast %5 : vector<2x1x8x16xf32> to vector<2x2x8x16xf32>
    %10 = arith.mulf %8, %9 : vector<2x2x8x16xf32>
    %11 = vector.broadcast %3 : vector<2x2x1x16xf32> to vector<2x2x8x16xf32>
    %12 = vector.broadcast %7 : vector<2x1x8x16xf32> to vector<2x2x8x16xf32>
    %13 = arith.mulf %11, %12 : vector<2x2x8x16xf32>
    %14 = arith.subf %10, %13 : vector<2x2x8x16xf32>
    %c0_11 = arith.constant 0 : index
    %c0_12 = arith.constant 0 : index
    %c0_13 = arith.constant 0 : index
    %c0_14 = arith.constant 0 : index
    %15 = vector.load %arg4[%c0_11, %c0_12, %c0_13, %c0_14] : memref<2x2x8x16xf32, #tpu.memory_space<vmem>>, vector<2x2x8x16xf32>
    tpu.vector_store %arg4[%c0_11, %c0_12, %c0_13, %c0_14], %14 {strides = array<i32>} : memref<2x2x8x16xf32, #tpu.memory_space<vmem>>, vector<2x2x8x16xf32>,
    %16 = vector.broadcast %1 : vector<2x2x1x16xf32> to vector<2x2x8x16xf32>
    %17 = vector.broadcast %7 : vector<2x1x8x16xf32> to vector<2x2x8x16xf32>
    %18 = arith.mulf %16, %17 : vector<2x2x8x16xf32>
    %19 = vector.broadcast %3 : vector<2x2x1x16xf32> to vector<2x2x8x16xf32>
    %20 = vector.broadcast %5 : vector<2x1x8x16xf32> to vector<2x2x8x16xf32>
    %21 = arith.mulf %19, %20 : vector<2x2x8x16xf32>
    %22 = arith.addf %18, %21 : vector<2x2x8x16xf32>
    %c0_15 = arith.constant 0 : index
    %c0_16 = arith.constant 0 : index
    %c0_17 = arith.constant 0 : index
    %c0_18 = arith.constant 0 : index
    %23 = vector.load %arg5[%c0_15, %c0_16, %c0_17, %c0_18] : memref<2x2x8x16xf32, #tpu.memory_space<vmem>>, vector<2x2x8x16xf32>
    tpu.vector_store %arg5[%c0_15, %c0_16, %c0_17, %c0_18], %22 {strides = array<i32>} : memref<2x2x8x16xf32, #tpu.memory_space<vmem>>, vector<2x2x8x16xf32>,
    return
  }
}

module attributes {stable_mosaic.version = 11 : i64} {
  func.func @_fourier_mix_kernel(%arg0: memref<2x2x16xf32, #tpu.memory_space<vmem>>, %arg1: memref<2x2x16xf32, #tpu.memory_space<vmem>>, %arg2: memref<2x4x16xf32, #tpu.memory_space<vmem>>, %arg3: memref<2x4x16xf32, #tpu.memory_space<vmem>>, %arg4: memref<2x2x4x16xf32, #tpu.memory_space<vmem>>, %arg5: memref<2x2x4x16xf32, #tpu.memory_space<vmem>>) attributes {dimension_semantics = [], scalar_prefetch = 0 : i64, scratch_operands = 0 : i64, tpu.core_type = #tpu.core_type<tc>} {
    %c0 = arith.constant 0 : index
    %c0_0 = arith.constant 0 : index
    %c0_1 = arith.constant 0 : index
    %0 = vector.load %arg0[%c0, %c0_0, %c0_1] : memref<2x2x16xf32, #tpu.memory_space<vmem>>, vector<2x2x16xf32>
    %1 = vector.shape_cast %0 : vector<2x2x16xf32> to vector<2x2x1x16xf32>
    %c0_2 = arith.constant 0 : index
    %c0_3 = arith.constant 0 : index
    %c0_4 = arith.constant 0 : index
    %2 = vector.load %arg1[%c0_2, %c0_3, %c0_4] : memref<2x2x16xf32, #tpu.memory_space<vmem>>, vector<2x2x16xf32>
    %3 = vector.shape_cast %2 : vector<2x2x16xf32> to vector<2x2x1x16xf32>
    %c0_5 = arith.constant 0 : index
    %c0_6 = arith.constant 0 : index
    %c0_7 = arith.constant 0 : index
    %4 = vector.load %arg2[%c0_5, %c0_6, %c0_7] : memref<2x4x16xf32, #tpu.memory_space<vmem>>, vector<2x4x16xf32>
    %5 = vector.shape_cast %4 : vector<2x4x16xf32> to vector<2x1x4x16xf32>
    %c0_8 = arith.constant 0 : index
    %c0_9 = arith.constant 0 : index
    %c0_10 = arith.constant 0 : index
    %6 = vector.load %arg3[%c0_8, %c0_9, %c0_10] : memref<2x4x16xf32, #tpu.memory_space<vmem>>, vector<2x4x16xf32>
    %7 = vector.shape_cast %6 : vector<2x4x16xf32> to vector<2x1x4x16xf32>
    %8 = vector.broadcast %1 : vector<2x2x1x16xf32> to vector<2x2x4x16xf32>
    %9 = vector.broadcast %5 : vector<2x1x4x16xf32> to vector<2x2x4x16xf32>
    %10 = arith.mulf %8, %9 : vector<2x2x4x16xf32>
    %11 = vector.broadcast %3 : vector<2x2x1x16xf32> to vector<2x2x4x16xf32>
    %12 = vector.broadcast %7 : vector<2x1x4x16xf32> to vector<2x2x4x16xf32>
    %13 = arith.mulf %11, %12 : vector<2x2x4x16xf32>
    %14 = arith.subf %10, %13 : vector<2x2x4x16xf32>
    %c0_11 = arith.constant 0 : index
    %c0_12 = arith.constant 0 : index
    %c0_13 = arith.constant 0 : index
    %c0_14 = arith.constant 0 : index
    %15 = vector.load %arg4[%c0_11, %c0_12, %c0_13, %c0_14] : memref<2x2x4x16xf32, #tpu.memory_space<vmem>>, vector<2x2x4x16xf32>
    tpu.vector_store %arg4[%c0_11, %c0_12, %c0_13, %c0_14], %14 {strides = array<i32>} : memref<2x2x4x16xf32, #tpu.memory_space<vmem>>, vector<2x2x4x16xf32>,
    %16 = vector.broadcast %1 : vector<2x2x1x16xf32> to vector<2x2x4x16xf32>
    %17 = vector.broadcast %7 : vector<2x1x4x16xf32> to vector<2x2x4x16xf32>
    %18 = arith.mulf %16, %17 : vector<2x2x4x16xf32>
    %19 = vector.broadcast %3 : vector<2x2x1x16xf32> to vector<2x2x4x16xf32>
    %20 = vector.broadcast %5 : vector<2x1x4x16xf32> to vector<2x2x4x16xf32>
    %21 = arith.mulf %19, %20 : vector<2x2x4x16xf32>
    %22 = arith.addf %18, %21 : vector<2x2x4x16xf32>
    %c0_15 = arith.constant 0 : index
    %c0_16 = arith.constant 0 : index
    %c0_17 = arith.constant 0 : index
    %c0_18 = arith.constant 0 : index
    %23 = vector.load %arg5[%c0_15, %c0_16, %c0_17, %c0_18] : memref<2x2x4x16xf32, #tpu.memory_space<vmem>>, vector<2x2x4x16xf32>
    tpu.vector_store %arg5[%c0_15, %c0_16, %c0_17, %c0_18], %22 {strides = array<i32>} : memref<2x2x4x16xf32, #tpu.memory_space<vmem>>, vector<2x2x4x16xf32>,
    return
  }
}

module attributes {stable_mosaic.version = 11 : i64} {
  func.func @_prelu_channel_sum_kernel(%arg0: i32, %arg1: memref<1x1xf32, #tpu.memory_space<vmem>>, %arg2: memref<1x8x256xf32, #tpu.memory_space<vmem>>, %arg3: memref<1x1x256xf32, #tpu.memory_space<vmem>>) attributes {dimension_semantics = [#tpu.dimension_semantics<parallel>], iteration_bounds = array<i64: 2>, scalar_prefetch = 0 : i64, scratch_operands = 0 : i64, tpu.core_type = #tpu.core_type<tc>, window_params = [{pipeline_mode = #tpu.pipeline_mode<synchronous>, transform_indices = @transform_0, window_bounds = array<i64: 1, 1>}, {transform_indices = @transform_1, window_bounds = array<i64: 1, 8, 256>}, {transform_indices = @transform_2, window_bounds = array<i64: 1, 1, 256>}]} {
    %c0 = arith.constant 0 : index
    %c0_0 = arith.constant 0 : index
    %c0_1 = arith.constant 0 : index
    %0 = vector.load %arg2[%c0, %c0_0, %c0_1] : memref<1x8x256xf32, #tpu.memory_space<vmem>>, vector<1x8x256xf32>
    %1 = vector.shape_cast %0 : vector<1x8x256xf32> to vector<8x256xf32>
    %cst = arith.constant 0.000000e+00 : f32
    %2 = vector.broadcast %cst : f32 to vector<8x256xf32>
    %3 = arith.cmpf oge, %1, %2 : vector<8x256xf32>
    %c0_2 = arith.constant 0 : index
    %c0_3 = arith.constant 0 : index
    %4 = vector.load %arg1[%c0_2, %c0_3] : memref<1x1xf32, #tpu.memory_space<vmem>>, vector<1x1xf32>
    %5 = vector.broadcast %4 : vector<1x1xf32> to vector<8x256xf32>
    %6 = arith.mulf %5, %1 : vector<8x256xf32>
    %7 = arith.select %3, %1, %6 : vector<8x256xi1>, vector<8x256xf32>
    %cst_4 = arith.constant dense<0.000000e+00> : vector<256xf32>
    %8 = vector.multi_reduction <add>, %7, %cst_4 [0] : vector<8x256xf32> to vector<256xf32>
    %9 = vector.shape_cast %8 : vector<256xf32> to vector<1x256xf32>
    %c0_5 = arith.constant 0 : index
    %c0_6 = arith.constant 0 : index
    %c0_7 = arith.constant 0 : index
    %10 = vector.load %arg3[%c0_5, %c0_6, %c0_7] : memref<1x1x256xf32, #tpu.memory_space<vmem>>, vector<1x1x256xf32>
    %11 = vector.shape_cast %10 : vector<1x1x256xf32> to vector<1x256xf32>
    %12 = vector.shape_cast %9 : vector<1x256xf32> to vector<1x1x256xf32>
    tpu.vector_store %arg3[%c0_5, %c0_6, %c0_7], %12 {strides = array<i32>} : memref<1x1x256xf32, #tpu.memory_space<vmem>>, vector<1x1x256xf32>,
    return
  }
  func.func @transform_0(%arg0: i32) -> (i32, i32) {
    %c0_i32 = arith.constant 0 : i32
    %c0_i32_0 = arith.constant 0 : i32
    %c0_i32_1 = arith.constant 0 : i32
    return %c0_i32, %c0_i32_0 : i32, i32
  }
  func.func @transform_1(%arg0: i32) -> (i32, i32, i32) {
    %c0_i32 = arith.constant 0 : i32
    %c0_i32_0 = arith.constant 0 : i32
    %c0_i32_1 = arith.constant 0 : i32
    return %arg0, %c0_i32, %c0_i32_0 : i32, i32, i32
  }
  func.func @transform_2(%arg0: i32) -> (i32, i32, i32) {
    %c0_i32 = arith.constant 0 : i32
    %c0_i32_0 = arith.constant 0 : i32
    %c0_i32_1 = arith.constant 0 : i32
    return %arg0, %c0_i32, %c0_i32_0 : i32, i32, i32
  }
}

module attributes {stable_mosaic.version = 11 : i64} {
  func.func @_conv_bias_stats_kernel(%arg0: i32, %arg1: memref<1x8x290xf32, #tpu.memory_space<vmem>>, %arg2: memref<4x72xf32, #tpu.memory_space<vmem>>, %arg3: memref<4x1xf32, #tpu.memory_space<vmem>>, %arg4: memref<1x4x256xf32, #tpu.memory_space<vmem>>, %arg5: memref<1x4x1xf32, #tpu.memory_space<vmem>>, %arg6: memref<1x4x1xf32, #tpu.memory_space<vmem>>) attributes {dimension_semantics = [#tpu.dimension_semantics<parallel>], iteration_bounds = array<i64: 2>, scalar_prefetch = 0 : i64, scratch_operands = 0 : i64, tpu.core_type = #tpu.core_type<tc>, window_params = [{transform_indices = @transform_0, window_bounds = array<i64: 1, 8, 290>}, {pipeline_mode = #tpu.pipeline_mode<synchronous>, transform_indices = @transform_1, window_bounds = array<i64: 4, 72>}, {pipeline_mode = #tpu.pipeline_mode<synchronous>, transform_indices = @transform_2, window_bounds = array<i64: 4, 1>}, {transform_indices = @transform_3, window_bounds = array<i64: 1, 4, 256>}, {transform_indices = @transform_4, window_bounds = array<i64: 1, 4, 1>}, {transform_indices = @transform_5, window_bounds = array<i64: 1, 4, 1>}]} {
    %c0 = arith.constant 0 : index
    %c0_0 = arith.constant 0 : index
    %c0_1 = arith.constant 0 : index
    %0 = vector.load %arg1[%c0, %c0_0, %c0_1] : memref<1x8x290xf32, #tpu.memory_space<vmem>>, vector<1x8x290xf32>
    %1 = vector.shape_cast %0 : vector<1x8x290xf32> to vector<8x290xf32>
    %2 = tpu.iota {dimensions = array<i32: 1>} : vector<1x256xi32>
    %c16_i32 = arith.constant 16 : i32
    %c0_i32 = arith.constant 0 : i32
    %3 = arith.cmpi eq, %c16_i32, %c0_i32 : i32
    %c1_i32 = arith.constant 1 : i32
    %4 = arith.select %3, %c1_i32, %c16_i32 : i32
    %5 = vector.broadcast %4 : i32 to vector<1x256xi32>
    %6 = arith.remsi %2, %5 : vector<1x256xi32>
    %c0_i32_2 = arith.constant 0 : i32
    %7 = vector.broadcast %c0_i32_2 : i32 to vector<1x256xi32>
    %8 = arith.cmpi ne, %6, %7 : vector<1x256xi32>
    %c0_i32_3 = arith.constant 0 : i32
    %9 = vector.broadcast %c0_i32_3 : i32 to vector<1x256xi32>
    %10 = arith.cmpi slt, %6, %9 : vector<1x256xi32>
    %c0_i32_4 = arith.constant 0 : i32
    %11 = arith.cmpi slt, %4, %c0_i32_4 : i32
    %12 = vector.broadcast %11 : i1 to vector<1x256xi1>
    %13 = vector.broadcast %12 : vector<1x256xi1> to vector<1x256xi1>
    %14 = arith.xori %10, %13 : vector<1x256xi1>
    %15 = arith.andi %14, %8 : vector<1x256xi1>
    %16 = vector.broadcast %4 : i32 to vector<1x256xi32>
    %17 = arith.addi %6, %16 : vector<1x256xi32>
    %18 = arith.select %15, %17, %6 : vector<1x256xi1>, vector<1x256xi32>
    %c0_i32_5 = arith.constant 0 : i32
    %19 = vector.broadcast %c0_i32_5 : i32 to vector<1x256xi32>
    %20 = arith.cmpi ne, %18, %19 : vector<1x256xi32>
    %c15_i32 = arith.constant 15 : i32
    %21 = vector.broadcast %c15_i32 : i32 to vector<1x256xi32>
    %22 = arith.cmpi ne, %18, %21 : vector<1x256xi32>
    %23 = vector.extract_strided_slice %1 {offsets = [0, 0], sizes = [8, 256], strides = [1, 1]} : vector<8x290xf32> to vector<8x256xf32>
    %cst = arith.constant 0.000000e+00 : f32
    %24 = vector.shape_cast %20 : vector<1x256xi1> to vector<1x256xi1>
    %25 = vector.broadcast %24 : vector<1x256xi1> to vector<8x256xi1>
    %26 = vector.broadcast %cst : f32 to vector<8x256xf32>
    %27 = arith.select %25, %23, %26 : vector<8x256xi1>, vector<8x256xf32>
    %28 = vector.extract_strided_slice %1 {offsets = [0, 1], sizes = [8, 256], strides = [1, 1]} : vector<8x290xf32> to vector<8x256xf32>
    %29 = vector.extract_strided_slice %1 {offsets = [0, 2], sizes = [8, 256], strides = [1, 1]} : vector<8x290xf32> to vector<8x256xf32>
    %cst_6 = arith.constant 0.000000e+00 : f32
    %30 = vector.shape_cast %22 : vector<1x256xi1> to vector<1x256xi1>
    %31 = vector.broadcast %30 : vector<1x256xi1> to vector<8x256xi1>
    %32 = vector.broadcast %cst_6 : f32 to vector<8x256xf32>
    %33 = arith.select %31, %29, %32 : vector<8x256xi1>, vector<8x256xf32>
    %34 = vector.extract_strided_slice %1 {offsets = [0, 16], sizes = [8, 256], strides = [1, 1]} : vector<8x290xf32> to vector<8x256xf32>
    %cst_7 = arith.constant 0.000000e+00 : f32
    %35 = vector.shape_cast %20 : vector<1x256xi1> to vector<1x256xi1>
    %36 = vector.broadcast %35 : vector<1x256xi1> to vector<8x256xi1>
    %37 = vector.broadcast %cst_7 : f32 to vector<8x256xf32>
    %38 = arith.select %36, %34, %37 : vector<8x256xi1>, vector<8x256xf32>
    %39 = vector.extract_strided_slice %1 {offsets = [0, 17], sizes = [8, 256], strides = [1, 1]} : vector<8x290xf32> to vector<8x256xf32>
    %40 = vector.extract_strided_slice %1 {offsets = [0, 18], sizes = [8, 256], strides = [1, 1]} : vector<8x290xf32> to vector<8x256xf32>
    %cst_8 = arith.constant 0.000000e+00 : f32
    %41 = vector.shape_cast %22 : vector<1x256xi1> to vector<1x256xi1>
    %42 = vector.broadcast %41 : vector<1x256xi1> to vector<8x256xi1>
    %43 = vector.broadcast %cst_8 : f32 to vector<8x256xf32>
    %44 = arith.select %42, %40, %43 : vector<8x256xi1>, vector<8x256xf32>
    %45 = vector.extract_strided_slice %1 {offsets = [0, 32], sizes = [8, 256], strides = [1, 1]} : vector<8x290xf32> to vector<8x256xf32>
    %cst_9 = arith.constant 0.000000e+00 : f32
    %46 = vector.shape_cast %20 : vector<1x256xi1> to vector<1x256xi1>
    %47 = vector.broadcast %46 : vector<1x256xi1> to vector<8x256xi1>
    %48 = vector.broadcast %cst_9 : f32 to vector<8x256xf32>
    %49 = arith.select %47, %45, %48 : vector<8x256xi1>, vector<8x256xf32>
    %50 = vector.extract_strided_slice %1 {offsets = [0, 33], sizes = [8, 256], strides = [1, 1]} : vector<8x290xf32> to vector<8x256xf32>
    %51 = vector.extract_strided_slice %1 {offsets = [0, 34], sizes = [8, 256], strides = [1, 1]} : vector<8x290xf32> to vector<8x256xf32>
    %cst_10 = arith.constant 0.000000e+00 : f32
    %52 = vector.shape_cast %22 : vector<1x256xi1> to vector<1x256xi1>
    %53 = vector.broadcast %52 : vector<1x256xi1> to vector<8x256xi1>
    %54 = vector.broadcast %cst_10 : f32 to vector<8x256xf32>
    %55 = arith.select %53, %51, %54 : vector<8x256xi1>, vector<8x256xf32>
    %56 = tpu.concatenate %27, %28, %33, %38, %39, %44, %49, %50, %55 in 0 : vector<8x256xf32>, vector<8x256xf32>, vector<8x256xf32>, vector<8x256xf32>, vector<8x256xf32>, vector<8x256xf32>, vector<8x256xf32>, vector<8x256xf32>, vector<8x256xf32> -> vector<72x256xf32>
    %c0_11 = arith.constant 0 : index
    %c0_12 = arith.constant 0 : index
    %57 = vector.load %arg2[%c0_11, %c0_12] : memref<4x72xf32, #tpu.memory_space<vmem>>, vector<4x72xf32>
    %cst_13 = arith.constant dense<0.000000e+00> : vector<4x256xf32>
    %58 = tpu.matmul %57, %56, %cst_13 {dimension_numbers = #tpu.dot_dimension_numbers<[1], [0], [0], [1], [0, 0, 1, 1], [], []>} : vector<4x72xf32>, vector<72x256xf32>, vector<4x256xf32> -> vector<4x256xf32>
    %c0_14 = arith.constant 0 : index
    %c0_15 = arith.constant 0 : index
    %59 = vector.load %arg3[%c0_14, %c0_15] : memref<4x1xf32, #tpu.memory_space<vmem>>, vector<4x1xf32>
    %60 = vector.broadcast %59 : vector<4x1xf32> to vector<4x256xf32>
    %61 = arith.addf %58, %60 : vector<4x256xf32>
    %c0_16 = arith.constant 0 : index
    %c0_17 = arith.constant 0 : index
    %c0_18 = arith.constant 0 : index
    %62 = vector.load %arg4[%c0_16, %c0_17, %c0_18] : memref<1x4x256xf32, #tpu.memory_space<vmem>>, vector<1x4x256xf32>
    %63 = vector.shape_cast %62 : vector<1x4x256xf32> to vector<4x256xf32>
    %64 = vector.shape_cast %61 : vector<4x256xf32> to vector<1x4x256xf32>
    tpu.vector_store %arg4[%c0_16, %c0_17, %c0_18], %64 {strides = array<i32>} : memref<1x4x256xf32, #tpu.memory_space<vmem>>, vector<1x4x256xf32>,
    %cst_19 = arith.constant dense<0.000000e+00> : vector<4xf32>
    %65 = vector.multi_reduction <add>, %61, %cst_19 [1] : vector<4x256xf32> to vector<4xf32>
    %66 = vector.shape_cast %65 : vector<4xf32> to vector<4x1xf32>
    %c0_20 = arith.constant 0 : index
    %c0_21 = arith.constant 0 : index
    %c0_22 = arith.constant 0 : index
    %67 = vector.load %arg5[%c0_20, %c0_21, %c0_22] : memref<1x4x1xf32, #tpu.memory_space<vmem>>, vector<1x4x1xf32>
    %68 = vector.shape_cast %67 : vector<1x4x1xf32> to vector<4x1xf32>
    %69 = vector.shape_cast %66 : vector<4x1xf32> to vector<1x4x1xf32>
    tpu.vector_store %arg5[%c0_20, %c0_21, %c0_22], %69 {strides = array<i32>} : memref<1x4x1xf32, #tpu.memory_space<vmem>>, vector<1x4x1xf32>,
    %70 = arith.mulf %61, %61 : vector<4x256xf32>
    %cst_23 = arith.constant dense<0.000000e+00> : vector<4xf32>
    %71 = vector.multi_reduction <add>, %70, %cst_23 [1] : vector<4x256xf32> to vector<4xf32>
    %72 = vector.shape_cast %71 : vector<4xf32> to vector<4x1xf32>
    %c0_24 = arith.constant 0 : index
    %c0_25 = arith.constant 0 : index
    %c0_26 = arith.constant 0 : index
    %73 = vector.load %arg6[%c0_24, %c0_25, %c0_26] : memref<1x4x1xf32, #tpu.memory_space<vmem>>, vector<1x4x1xf32>
    %74 = vector.shape_cast %73 : vector<1x4x1xf32> to vector<4x1xf32>
    %75 = vector.shape_cast %72 : vector<4x1xf32> to vector<1x4x1xf32>
    tpu.vector_store %arg6[%c0_24, %c0_25, %c0_26], %75 {strides = array<i32>} : memref<1x4x1xf32, #tpu.memory_space<vmem>>, vector<1x4x1xf32>,
    return
  }
  func.func @transform_0(%arg0: i32) -> (i32, i32, i32) {
    %c0_i32 = arith.constant 0 : i32
    %c0_i32_0 = arith.constant 0 : i32
    %c0_i32_1 = arith.constant 0 : i32
    return %arg0, %c0_i32, %c0_i32_0 : i32, i32, i32
  }
  func.func @transform_1(%arg0: i32) -> (i32, i32) {
    %c0_i32 = arith.constant 0 : i32
    %c0_i32_0 = arith.constant 0 : i32
    %c0_i32_1 = arith.constant 0 : i32
    return %c0_i32, %c0_i32_0 : i32, i32
  }
  func.func @transform_2(%arg0: i32) -> (i32, i32) {
    %c0_i32 = arith.constant 0 : i32
    %c0_i32_0 = arith.constant 0 : i32
    %c0_i32_1 = arith.constant 0 : i32
    return %c0_i32, %c0_i32_0 : i32, i32
  }
  func.func @transform_3(%arg0: i32) -> (i32, i32, i32) {
    %c0_i32 = arith.constant 0 : i32
    %c0_i32_0 = arith.constant 0 : i32
    %c0_i32_1 = arith.constant 0 : i32
    return %arg0, %c0_i32, %c0_i32_0 : i32, i32, i32
  }
  func.func @transform_4(%arg0: i32) -> (i32, i32, i32) {
    %c0_i32 = arith.constant 0 : i32
    %c0_i32_0 = arith.constant 0 : i32
    %c0_i32_1 = arith.constant 0 : i32
    return %arg0, %c0_i32, %c0_i32_0 : i32, i32, i32
  }
  func.func @transform_5(%arg0: i32) -> (i32, i32, i32) {
    %c0_i32 = arith.constant 0 : i32
    %c0_i32_0 = arith.constant 0 : i32
    %c0_i32_1 = arith.constant 0 : i32
    return %arg0, %c0_i32, %c0_i32_0 : i32, i32, i32
  }
}

module attributes {stable_mosaic.version = 11 : i64} {
  func.func @_conv_bias_stats_kernel(%arg0: i32, %arg1: memref<1x1xf32, #tpu.memory_space<vmem>>, %arg2: memref<1x8x290xf32, #tpu.memory_space<vmem>>, %arg3: memref<4x72xf32, #tpu.memory_space<vmem>>, %arg4: memref<4x1xf32, #tpu.memory_space<vmem>>, %arg5: memref<1x4x256xf32, #tpu.memory_space<vmem>>, %arg6: memref<1x4x1xf32, #tpu.memory_space<vmem>>, %arg7: memref<1x4x1xf32, #tpu.memory_space<vmem>>) attributes {dimension_semantics = [#tpu.dimension_semantics<parallel>], iteration_bounds = array<i64: 2>, scalar_prefetch = 0 : i64, scratch_operands = 0 : i64, tpu.core_type = #tpu.core_type<tc>, window_params = [{pipeline_mode = #tpu.pipeline_mode<synchronous>, transform_indices = @transform_0, window_bounds = array<i64: 1, 1>}, {transform_indices = @transform_1, window_bounds = array<i64: 1, 8, 290>}, {pipeline_mode = #tpu.pipeline_mode<synchronous>, transform_indices = @transform_2, window_bounds = array<i64: 4, 72>}, {pipeline_mode = #tpu.pipeline_mode<synchronous>, transform_indices = @transform_3, window_bounds = array<i64: 4, 1>}, {transform_indices = @transform_4, window_bounds = array<i64: 1, 4, 256>}, {transform_indices = @transform_5, window_bounds = array<i64: 1, 4, 1>}, {transform_indices = @transform_6, window_bounds = array<i64: 1, 4, 1>}]} {
    %c0 = arith.constant 0 : index
    %c0_0 = arith.constant 0 : index
    %c0_1 = arith.constant 0 : index
    %0 = vector.load %arg2[%c0, %c0_0, %c0_1] : memref<1x8x290xf32, #tpu.memory_space<vmem>>, vector<1x8x290xf32>
    %1 = vector.shape_cast %0 : vector<1x8x290xf32> to vector<8x290xf32>
    %cst = arith.constant 0.000000e+00 : f32
    %2 = vector.broadcast %cst : f32 to vector<8x290xf32>
    %3 = arith.cmpf oge, %1, %2 : vector<8x290xf32>
    %c0_2 = arith.constant 0 : index
    %c0_3 = arith.constant 0 : index
    %4 = vector.load %arg1[%c0_2, %c0_3] : memref<1x1xf32, #tpu.memory_space<vmem>>, vector<1x1xf32>
    %5 = vector.broadcast %4 : vector<1x1xf32> to vector<8x290xf32>
    %6 = arith.mulf %5, %1 : vector<8x290xf32>
    %7 = arith.select %3, %1, %6 : vector<8x290xi1>, vector<8x290xf32>
    %8 = tpu.iota {dimensions = array<i32: 1>} : vector<1x256xi32>
    %c16_i32 = arith.constant 16 : i32
    %c0_i32 = arith.constant 0 : i32
    %9 = arith.cmpi eq, %c16_i32, %c0_i32 : i32
    %c1_i32 = arith.constant 1 : i32
    %10 = arith.select %9, %c1_i32, %c16_i32 : i32
    %11 = vector.broadcast %10 : i32 to vector<1x256xi32>
    %12 = arith.remsi %8, %11 : vector<1x256xi32>
    %c0_i32_4 = arith.constant 0 : i32
    %13 = vector.broadcast %c0_i32_4 : i32 to vector<1x256xi32>
    %14 = arith.cmpi ne, %12, %13 : vector<1x256xi32>
    %c0_i32_5 = arith.constant 0 : i32
    %15 = vector.broadcast %c0_i32_5 : i32 to vector<1x256xi32>
    %16 = arith.cmpi slt, %12, %15 : vector<1x256xi32>
    %c0_i32_6 = arith.constant 0 : i32
    %17 = arith.cmpi slt, %10, %c0_i32_6 : i32
    %18 = vector.broadcast %17 : i1 to vector<1x256xi1>
    %19 = vector.broadcast %18 : vector<1x256xi1> to vector<1x256xi1>
    %20 = arith.xori %16, %19 : vector<1x256xi1>
    %21 = arith.andi %20, %14 : vector<1x256xi1>
    %22 = vector.broadcast %10 : i32 to vector<1x256xi32>
    %23 = arith.addi %12, %22 : vector<1x256xi32>
    %24 = arith.select %21, %23, %12 : vector<1x256xi1>, vector<1x256xi32>
    %c0_i32_7 = arith.constant 0 : i32
    %25 = vector.broadcast %c0_i32_7 : i32 to vector<1x256xi32>
    %26 = arith.cmpi ne, %24, %25 : vector<1x256xi32>
    %c15_i32 = arith.constant 15 : i32
    %27 = vector.broadcast %c15_i32 : i32 to vector<1x256xi32>
    %28 = arith.cmpi ne, %24, %27 : vector<1x256xi32>
    %29 = vector.extract_strided_slice %7 {offsets = [0, 0], sizes = [8, 256], strides = [1, 1]} : vector<8x290xf32> to vector<8x256xf32>
    %cst_8 = arith.constant 0.000000e+00 : f32
    %30 = vector.shape_cast %26 : vector<1x256xi1> to vector<1x256xi1>
    %31 = vector.broadcast %30 : vector<1x256xi1> to vector<8x256xi1>
    %32 = vector.broadcast %cst_8 : f32 to vector<8x256xf32>
    %33 = arith.select %31, %29, %32 : vector<8x256xi1>, vector<8x256xf32>
    %34 = vector.extract_strided_slice %7 {offsets = [0, 1], sizes = [8, 256], strides = [1, 1]} : vector<8x290xf32> to vector<8x256xf32>
    %35 = vector.extract_strided_slice %7 {offsets = [0, 2], sizes = [8, 256], strides = [1, 1]} : vector<8x290xf32> to vector<8x256xf32>
    %cst_9 = arith.constant 0.000000e+00 : f32
    %36 = vector.shape_cast %28 : vector<1x256xi1> to vector<1x256xi1>
    %37 = vector.broadcast %36 : vector<1x256xi1> to vector<8x256xi1>
    %38 = vector.broadcast %cst_9 : f32 to vector<8x256xf32>
    %39 = arith.select %37, %35, %38 : vector<8x256xi1>, vector<8x256xf32>
    %40 = vector.extract_strided_slice %7 {offsets = [0, 16], sizes = [8, 256], strides = [1, 1]} : vector<8x290xf32> to vector<8x256xf32>
    %cst_10 = arith.constant 0.000000e+00 : f32
    %41 = vector.shape_cast %26 : vector<1x256xi1> to vector<1x256xi1>
    %42 = vector.broadcast %41 : vector<1x256xi1> to vector<8x256xi1>
    %43 = vector.broadcast %cst_10 : f32 to vector<8x256xf32>
    %44 = arith.select %42, %40, %43 : vector<8x256xi1>, vector<8x256xf32>
    %45 = vector.extract_strided_slice %7 {offsets = [0, 17], sizes = [8, 256], strides = [1, 1]} : vector<8x290xf32> to vector<8x256xf32>
    %46 = vector.extract_strided_slice %7 {offsets = [0, 18], sizes = [8, 256], strides = [1, 1]} : vector<8x290xf32> to vector<8x256xf32>
    %cst_11 = arith.constant 0.000000e+00 : f32
    %47 = vector.shape_cast %28 : vector<1x256xi1> to vector<1x256xi1>
    %48 = vector.broadcast %47 : vector<1x256xi1> to vector<8x256xi1>
    %49 = vector.broadcast %cst_11 : f32 to vector<8x256xf32>
    %50 = arith.select %48, %46, %49 : vector<8x256xi1>, vector<8x256xf32>
    %51 = vector.extract_strided_slice %7 {offsets = [0, 32], sizes = [8, 256], strides = [1, 1]} : vector<8x290xf32> to vector<8x256xf32>
    %cst_12 = arith.constant 0.000000e+00 : f32
    %52 = vector.shape_cast %26 : vector<1x256xi1> to vector<1x256xi1>
    %53 = vector.broadcast %52 : vector<1x256xi1> to vector<8x256xi1>
    %54 = vector.broadcast %cst_12 : f32 to vector<8x256xf32>
    %55 = arith.select %53, %51, %54 : vector<8x256xi1>, vector<8x256xf32>
    %56 = vector.extract_strided_slice %7 {offsets = [0, 33], sizes = [8, 256], strides = [1, 1]} : vector<8x290xf32> to vector<8x256xf32>
    %57 = vector.extract_strided_slice %7 {offsets = [0, 34], sizes = [8, 256], strides = [1, 1]} : vector<8x290xf32> to vector<8x256xf32>
    %cst_13 = arith.constant 0.000000e+00 : f32
    %58 = vector.shape_cast %28 : vector<1x256xi1> to vector<1x256xi1>
    %59 = vector.broadcast %58 : vector<1x256xi1> to vector<8x256xi1>
    %60 = vector.broadcast %cst_13 : f32 to vector<8x256xf32>
    %61 = arith.select %59, %57, %60 : vector<8x256xi1>, vector<8x256xf32>
    %62 = tpu.concatenate %33, %34, %39, %44, %45, %50, %55, %56, %61 in 0 : vector<8x256xf32>, vector<8x256xf32>, vector<8x256xf32>, vector<8x256xf32>, vector<8x256xf32>, vector<8x256xf32>, vector<8x256xf32>, vector<8x256xf32>, vector<8x256xf32> -> vector<72x256xf32>
    %c0_14 = arith.constant 0 : index
    %c0_15 = arith.constant 0 : index
    %63 = vector.load %arg3[%c0_14, %c0_15] : memref<4x72xf32, #tpu.memory_space<vmem>>, vector<4x72xf32>
    %cst_16 = arith.constant dense<0.000000e+00> : vector<4x256xf32>
    %64 = tpu.matmul %63, %62, %cst_16 {dimension_numbers = #tpu.dot_dimension_numbers<[1], [0], [0], [1], [0, 0, 1, 1], [], []>} : vector<4x72xf32>, vector<72x256xf32>, vector<4x256xf32> -> vector<4x256xf32>
    %c0_17 = arith.constant 0 : index
    %c0_18 = arith.constant 0 : index
    %65 = vector.load %arg4[%c0_17, %c0_18] : memref<4x1xf32, #tpu.memory_space<vmem>>, vector<4x1xf32>
    %66 = vector.broadcast %65 : vector<4x1xf32> to vector<4x256xf32>
    %67 = arith.addf %64, %66 : vector<4x256xf32>
    %c0_19 = arith.constant 0 : index
    %c0_20 = arith.constant 0 : index
    %c0_21 = arith.constant 0 : index
    %68 = vector.load %arg5[%c0_19, %c0_20, %c0_21] : memref<1x4x256xf32, #tpu.memory_space<vmem>>, vector<1x4x256xf32>
    %69 = vector.shape_cast %68 : vector<1x4x256xf32> to vector<4x256xf32>
    %70 = vector.shape_cast %67 : vector<4x256xf32> to vector<1x4x256xf32>
    tpu.vector_store %arg5[%c0_19, %c0_20, %c0_21], %70 {strides = array<i32>} : memref<1x4x256xf32, #tpu.memory_space<vmem>>, vector<1x4x256xf32>,
    %cst_22 = arith.constant dense<0.000000e+00> : vector<4xf32>
    %71 = vector.multi_reduction <add>, %67, %cst_22 [1] : vector<4x256xf32> to vector<4xf32>
    %72 = vector.shape_cast %71 : vector<4xf32> to vector<4x1xf32>
    %c0_23 = arith.constant 0 : index
    %c0_24 = arith.constant 0 : index
    %c0_25 = arith.constant 0 : index
    %73 = vector.load %arg6[%c0_23, %c0_24, %c0_25] : memref<1x4x1xf32, #tpu.memory_space<vmem>>, vector<1x4x1xf32>
    %74 = vector.shape_cast %73 : vector<1x4x1xf32> to vector<4x1xf32>
    %75 = vector.shape_cast %72 : vector<4x1xf32> to vector<1x4x1xf32>
    tpu.vector_store %arg6[%c0_23, %c0_24, %c0_25], %75 {strides = array<i32>} : memref<1x4x1xf32, #tpu.memory_space<vmem>>, vector<1x4x1xf32>,
    %76 = arith.mulf %67, %67 : vector<4x256xf32>
    %cst_26 = arith.constant dense<0.000000e+00> : vector<4xf32>
    %77 = vector.multi_reduction <add>, %76, %cst_26 [1] : vector<4x256xf32> to vector<4xf32>
    %78 = vector.shape_cast %77 : vector<4xf32> to vector<4x1xf32>
    %c0_27 = arith.constant 0 : index
    %c0_28 = arith.constant 0 : index
    %c0_29 = arith.constant 0 : index
    %79 = vector.load %arg7[%c0_27, %c0_28, %c0_29] : memref<1x4x1xf32, #tpu.memory_space<vmem>>, vector<1x4x1xf32>
    %80 = vector.shape_cast %79 : vector<1x4x1xf32> to vector<4x1xf32>
    %81 = vector.shape_cast %78 : vector<4x1xf32> to vector<1x4x1xf32>
    tpu.vector_store %arg7[%c0_27, %c0_28, %c0_29], %81 {strides = array<i32>} : memref<1x4x1xf32, #tpu.memory_space<vmem>>, vector<1x4x1xf32>,
    return
  }
  func.func @transform_0(%arg0: i32) -> (i32, i32) {
    %c0_i32 = arith.constant 0 : i32
    %c0_i32_0 = arith.constant 0 : i32
    %c0_i32_1 = arith.constant 0 : i32
    return %c0_i32, %c0_i32_0 : i32, i32
  }
  func.func @transform_1(%arg0: i32) -> (i32, i32, i32) {
    %c0_i32 = arith.constant 0 : i32
    %c0_i32_0 = arith.constant 0 : i32
    %c0_i32_1 = arith.constant 0 : i32
    return %arg0, %c0_i32, %c0_i32_0 : i32, i32, i32
  }
  func.func @transform_2(%arg0: i32) -> (i32, i32) {
    %c0_i32 = arith.constant 0 : i32
    %c0_i32_0 = arith.constant 0 : i32
    %c0_i32_1 = arith.constant 0 : i32
    return %c0_i32, %c0_i32_0 : i32, i32
  }
  func.func @transform_3(%arg0: i32) -> (i32, i32) {
    %c0_i32 = arith.constant 0 : i32
    %c0_i32_0 = arith.constant 0 : i32
    %c0_i32_1 = arith.constant 0 : i32
    return %c0_i32, %c0_i32_0 : i32, i32
  }
  func.func @transform_4(%arg0: i32) -> (i32, i32, i32) {
    %c0_i32 = arith.constant 0 : i32
    %c0_i32_0 = arith.constant 0 : i32
    %c0_i32_1 = arith.constant 0 : i32
    return %arg0, %c0_i32, %c0_i32_0 : i32, i32, i32
  }
  func.func @transform_5(%arg0: i32) -> (i32, i32, i32) {
    %c0_i32 = arith.constant 0 : i32
    %c0_i32_0 = arith.constant 0 : i32
    %c0_i32_1 = arith.constant 0 : i32
    return %arg0, %c0_i32, %c0_i32_0 : i32, i32, i32
  }
  func.func @transform_6(%arg0: i32) -> (i32, i32, i32) {
    %c0_i32 = arith.constant 0 : i32
    %c0_i32_0 = arith.constant 0 : i32
    %c0_i32_1 = arith.constant 0 : i32
    return %arg0, %c0_i32, %c0_i32_0 : i32, i32, i32
  }
}

module attributes {stable_mosaic.version = 11 : i64} {
  func.func @_conv_bias_stats_kernel(%arg0: i32, %arg1: memref<1x1xf32, #tpu.memory_space<vmem>>, %arg2: memref<1x8x290xf32, #tpu.memory_space<vmem>>, %arg3: memref<16x72xf32, #tpu.memory_space<vmem>>, %arg4: memref<16x1xf32, #tpu.memory_space<vmem>>, %arg5: memref<1x16x256xf32, #tpu.memory_space<vmem>>, %arg6: memref<1x16x1xf32, #tpu.memory_space<vmem>>, %arg7: memref<1x16x1xf32, #tpu.memory_space<vmem>>) attributes {dimension_semantics = [#tpu.dimension_semantics<parallel>], iteration_bounds = array<i64: 2>, scalar_prefetch = 0 : i64, scratch_operands = 0 : i64, tpu.core_type = #tpu.core_type<tc>, window_params = [{pipeline_mode = #tpu.pipeline_mode<synchronous>, transform_indices = @transform_0, window_bounds = array<i64: 1, 1>}, {transform_indices = @transform_1, window_bounds = array<i64: 1, 8, 290>}, {pipeline_mode = #tpu.pipeline_mode<synchronous>, transform_indices = @transform_2, window_bounds = array<i64: 16, 72>}, {pipeline_mode = #tpu.pipeline_mode<synchronous>, transform_indices = @transform_3, window_bounds = array<i64: 16, 1>}, {transform_indices = @transform_4, window_bounds = array<i64: 1, 16, 256>}, {transform_indices = @transform_5, window_bounds = array<i64: 1, 16, 1>}, {transform_indices = @transform_6, window_bounds = array<i64: 1, 16, 1>}]} {
    %c0 = arith.constant 0 : index
    %c0_0 = arith.constant 0 : index
    %c0_1 = arith.constant 0 : index
    %0 = vector.load %arg2[%c0, %c0_0, %c0_1] : memref<1x8x290xf32, #tpu.memory_space<vmem>>, vector<1x8x290xf32>
    %1 = vector.shape_cast %0 : vector<1x8x290xf32> to vector<8x290xf32>
    %cst = arith.constant 0.000000e+00 : f32
    %2 = vector.broadcast %cst : f32 to vector<8x290xf32>
    %3 = arith.cmpf oge, %1, %2 : vector<8x290xf32>
    %c0_2 = arith.constant 0 : index
    %c0_3 = arith.constant 0 : index
    %4 = vector.load %arg1[%c0_2, %c0_3] : memref<1x1xf32, #tpu.memory_space<vmem>>, vector<1x1xf32>
    %5 = vector.broadcast %4 : vector<1x1xf32> to vector<8x290xf32>
    %6 = arith.mulf %5, %1 : vector<8x290xf32>
    %7 = arith.select %3, %1, %6 : vector<8x290xi1>, vector<8x290xf32>
    %8 = tpu.iota {dimensions = array<i32: 1>} : vector<1x256xi32>
    %c16_i32 = arith.constant 16 : i32
    %c0_i32 = arith.constant 0 : i32
    %9 = arith.cmpi eq, %c16_i32, %c0_i32 : i32
    %c1_i32 = arith.constant 1 : i32
    %10 = arith.select %9, %c1_i32, %c16_i32 : i32
    %11 = vector.broadcast %10 : i32 to vector<1x256xi32>
    %12 = arith.remsi %8, %11 : vector<1x256xi32>
    %c0_i32_4 = arith.constant 0 : i32
    %13 = vector.broadcast %c0_i32_4 : i32 to vector<1x256xi32>
    %14 = arith.cmpi ne, %12, %13 : vector<1x256xi32>
    %c0_i32_5 = arith.constant 0 : i32
    %15 = vector.broadcast %c0_i32_5 : i32 to vector<1x256xi32>
    %16 = arith.cmpi slt, %12, %15 : vector<1x256xi32>
    %c0_i32_6 = arith.constant 0 : i32
    %17 = arith.cmpi slt, %10, %c0_i32_6 : i32
    %18 = vector.broadcast %17 : i1 to vector<1x256xi1>
    %19 = vector.broadcast %18 : vector<1x256xi1> to vector<1x256xi1>
    %20 = arith.xori %16, %19 : vector<1x256xi1>
    %21 = arith.andi %20, %14 : vector<1x256xi1>
    %22 = vector.broadcast %10 : i32 to vector<1x256xi32>
    %23 = arith.addi %12, %22 : vector<1x256xi32>
    %24 = arith.select %21, %23, %12 : vector<1x256xi1>, vector<1x256xi32>
    %c0_i32_7 = arith.constant 0 : i32
    %25 = vector.broadcast %c0_i32_7 : i32 to vector<1x256xi32>
    %26 = arith.cmpi ne, %24, %25 : vector<1x256xi32>
    %c15_i32 = arith.constant 15 : i32
    %27 = vector.broadcast %c15_i32 : i32 to vector<1x256xi32>
    %28 = arith.cmpi ne, %24, %27 : vector<1x256xi32>
    %29 = vector.extract_strided_slice %7 {offsets = [0, 0], sizes = [8, 256], strides = [1, 1]} : vector<8x290xf32> to vector<8x256xf32>
    %cst_8 = arith.constant 0.000000e+00 : f32
    %30 = vector.shape_cast %26 : vector<1x256xi1> to vector<1x256xi1>
    %31 = vector.broadcast %30 : vector<1x256xi1> to vector<8x256xi1>
    %32 = vector.broadcast %cst_8 : f32 to vector<8x256xf32>
    %33 = arith.select %31, %29, %32 : vector<8x256xi1>, vector<8x256xf32>
    %34 = vector.extract_strided_slice %7 {offsets = [0, 1], sizes = [8, 256], strides = [1, 1]} : vector<8x290xf32> to vector<8x256xf32>
    %35 = vector.extract_strided_slice %7 {offsets = [0, 2], sizes = [8, 256], strides = [1, 1]} : vector<8x290xf32> to vector<8x256xf32>
    %cst_9 = arith.constant 0.000000e+00 : f32
    %36 = vector.shape_cast %28 : vector<1x256xi1> to vector<1x256xi1>
    %37 = vector.broadcast %36 : vector<1x256xi1> to vector<8x256xi1>
    %38 = vector.broadcast %cst_9 : f32 to vector<8x256xf32>
    %39 = arith.select %37, %35, %38 : vector<8x256xi1>, vector<8x256xf32>
    %40 = vector.extract_strided_slice %7 {offsets = [0, 16], sizes = [8, 256], strides = [1, 1]} : vector<8x290xf32> to vector<8x256xf32>
    %cst_10 = arith.constant 0.000000e+00 : f32
    %41 = vector.shape_cast %26 : vector<1x256xi1> to vector<1x256xi1>
    %42 = vector.broadcast %41 : vector<1x256xi1> to vector<8x256xi1>
    %43 = vector.broadcast %cst_10 : f32 to vector<8x256xf32>
    %44 = arith.select %42, %40, %43 : vector<8x256xi1>, vector<8x256xf32>
    %45 = vector.extract_strided_slice %7 {offsets = [0, 17], sizes = [8, 256], strides = [1, 1]} : vector<8x290xf32> to vector<8x256xf32>
    %46 = vector.extract_strided_slice %7 {offsets = [0, 18], sizes = [8, 256], strides = [1, 1]} : vector<8x290xf32> to vector<8x256xf32>
    %cst_11 = arith.constant 0.000000e+00 : f32
    %47 = vector.shape_cast %28 : vector<1x256xi1> to vector<1x256xi1>
    %48 = vector.broadcast %47 : vector<1x256xi1> to vector<8x256xi1>
    %49 = vector.broadcast %cst_11 : f32 to vector<8x256xf32>
    %50 = arith.select %48, %46, %49 : vector<8x256xi1>, vector<8x256xf32>
    %51 = vector.extract_strided_slice %7 {offsets = [0, 32], sizes = [8, 256], strides = [1, 1]} : vector<8x290xf32> to vector<8x256xf32>
    %cst_12 = arith.constant 0.000000e+00 : f32
    %52 = vector.shape_cast %26 : vector<1x256xi1> to vector<1x256xi1>
    %53 = vector.broadcast %52 : vector<1x256xi1> to vector<8x256xi1>
    %54 = vector.broadcast %cst_12 : f32 to vector<8x256xf32>
    %55 = arith.select %53, %51, %54 : vector<8x256xi1>, vector<8x256xf32>
    %56 = vector.extract_strided_slice %7 {offsets = [0, 33], sizes = [8, 256], strides = [1, 1]} : vector<8x290xf32> to vector<8x256xf32>
    %57 = vector.extract_strided_slice %7 {offsets = [0, 34], sizes = [8, 256], strides = [1, 1]} : vector<8x290xf32> to vector<8x256xf32>
    %cst_13 = arith.constant 0.000000e+00 : f32
    %58 = vector.shape_cast %28 : vector<1x256xi1> to vector<1x256xi1>
    %59 = vector.broadcast %58 : vector<1x256xi1> to vector<8x256xi1>
    %60 = vector.broadcast %cst_13 : f32 to vector<8x256xf32>
    %61 = arith.select %59, %57, %60 : vector<8x256xi1>, vector<8x256xf32>
    %62 = tpu.concatenate %33, %34, %39, %44, %45, %50, %55, %56, %61 in 0 : vector<8x256xf32>, vector<8x256xf32>, vector<8x256xf32>, vector<8x256xf32>, vector<8x256xf32>, vector<8x256xf32>, vector<8x256xf32>, vector<8x256xf32>, vector<8x256xf32> -> vector<72x256xf32>
    %c0_14 = arith.constant 0 : index
    %c0_15 = arith.constant 0 : index
    %63 = vector.load %arg3[%c0_14, %c0_15] : memref<16x72xf32, #tpu.memory_space<vmem>>, vector<16x72xf32>
    %cst_16 = arith.constant dense<0.000000e+00> : vector<16x256xf32>
    %64 = tpu.matmul %63, %62, %cst_16 {dimension_numbers = #tpu.dot_dimension_numbers<[1], [0], [0], [1], [0, 0, 1, 1], [], []>} : vector<16x72xf32>, vector<72x256xf32>, vector<16x256xf32> -> vector<16x256xf32>
    %c0_17 = arith.constant 0 : index
    %c0_18 = arith.constant 0 : index
    %65 = vector.load %arg4[%c0_17, %c0_18] : memref<16x1xf32, #tpu.memory_space<vmem>>, vector<16x1xf32>
    %66 = vector.broadcast %65 : vector<16x1xf32> to vector<16x256xf32>
    %67 = arith.addf %64, %66 : vector<16x256xf32>
    %c0_19 = arith.constant 0 : index
    %c0_20 = arith.constant 0 : index
    %c0_21 = arith.constant 0 : index
    %68 = vector.load %arg5[%c0_19, %c0_20, %c0_21] : memref<1x16x256xf32, #tpu.memory_space<vmem>>, vector<1x16x256xf32>
    %69 = vector.shape_cast %68 : vector<1x16x256xf32> to vector<16x256xf32>
    %70 = vector.shape_cast %67 : vector<16x256xf32> to vector<1x16x256xf32>
    tpu.vector_store %arg5[%c0_19, %c0_20, %c0_21], %70 {strides = array<i32>} : memref<1x16x256xf32, #tpu.memory_space<vmem>>, vector<1x16x256xf32>,
    %cst_22 = arith.constant dense<0.000000e+00> : vector<16xf32>
    %71 = vector.multi_reduction <add>, %67, %cst_22 [1] : vector<16x256xf32> to vector<16xf32>
    %72 = vector.shape_cast %71 : vector<16xf32> to vector<16x1xf32>
    %c0_23 = arith.constant 0 : index
    %c0_24 = arith.constant 0 : index
    %c0_25 = arith.constant 0 : index
    %73 = vector.load %arg6[%c0_23, %c0_24, %c0_25] : memref<1x16x1xf32, #tpu.memory_space<vmem>>, vector<1x16x1xf32>
    %74 = vector.shape_cast %73 : vector<1x16x1xf32> to vector<16x1xf32>
    %75 = vector.shape_cast %72 : vector<16x1xf32> to vector<1x16x1xf32>
    tpu.vector_store %arg6[%c0_23, %c0_24, %c0_25], %75 {strides = array<i32>} : memref<1x16x1xf32, #tpu.memory_space<vmem>>, vector<1x16x1xf32>,
    %76 = arith.mulf %67, %67 : vector<16x256xf32>
    %cst_26 = arith.constant dense<0.000000e+00> : vector<16xf32>
    %77 = vector.multi_reduction <add>, %76, %cst_26 [1] : vector<16x256xf32> to vector<16xf32>
    %78 = vector.shape_cast %77 : vector<16xf32> to vector<16x1xf32>
    %c0_27 = arith.constant 0 : index
    %c0_28 = arith.constant 0 : index
    %c0_29 = arith.constant 0 : index
    %79 = vector.load %arg7[%c0_27, %c0_28, %c0_29] : memref<1x16x1xf32, #tpu.memory_space<vmem>>, vector<1x16x1xf32>
    %80 = vector.shape_cast %79 : vector<1x16x1xf32> to vector<16x1xf32>
    %81 = vector.shape_cast %78 : vector<16x1xf32> to vector<1x16x1xf32>
    tpu.vector_store %arg7[%c0_27, %c0_28, %c0_29], %81 {strides = array<i32>} : memref<1x16x1xf32, #tpu.memory_space<vmem>>, vector<1x16x1xf32>,
    return
  }
  func.func @transform_0(%arg0: i32) -> (i32, i32) {
    %c0_i32 = arith.constant 0 : i32
    %c0_i32_0 = arith.constant 0 : i32
    %c0_i32_1 = arith.constant 0 : i32
    return %c0_i32, %c0_i32_0 : i32, i32
  }
  func.func @transform_1(%arg0: i32) -> (i32, i32, i32) {
    %c0_i32 = arith.constant 0 : i32
    %c0_i32_0 = arith.constant 0 : i32
    %c0_i32_1 = arith.constant 0 : i32
    return %arg0, %c0_i32, %c0_i32_0 : i32, i32, i32
  }
  func.func @transform_2(%arg0: i32) -> (i32, i32) {
    %c0_i32 = arith.constant 0 : i32
    %c0_i32_0 = arith.constant 0 : i32
    %c0_i32_1 = arith.constant 0 : i32
    return %c0_i32, %c0_i32_0 : i32, i32
  }
  func.func @transform_3(%arg0: i32) -> (i32, i32) {
    %c0_i32 = arith.constant 0 : i32
    %c0_i32_0 = arith.constant 0 : i32
    %c0_i32_1 = arith.constant 0 : i32
    return %c0_i32, %c0_i32_0 : i32, i32
  }
  func.func @transform_4(%arg0: i32) -> (i32, i32, i32) {
    %c0_i32 = arith.constant 0 : i32
    %c0_i32_0 = arith.constant 0 : i32
    %c0_i32_1 = arith.constant 0 : i32
    return %arg0, %c0_i32, %c0_i32_0 : i32, i32, i32
  }
  func.func @transform_5(%arg0: i32) -> (i32, i32, i32) {
    %c0_i32 = arith.constant 0 : i32
    %c0_i32_0 = arith.constant 0 : i32
    %c0_i32_1 = arith.constant 0 : i32
    return %arg0, %c0_i32, %c0_i32_0 : i32, i32, i32
  }
  func.func @transform_6(%arg0: i32) -> (i32, i32, i32) {
    %c0_i32 = arith.constant 0 : i32
    %c0_i32_0 = arith.constant 0 : i32
    %c0_i32_1 = arith.constant 0 : i32
    return %arg0, %c0_i32, %c0_i32_0 : i32, i32, i32
  }
}

module attributes {stable_mosaic.version = 11 : i64} {
  func.func @_conv_bias_stats_kernel(%arg0: i32, %arg1: memref<1x4x256xf32, #tpu.memory_space<vmem>>, %arg2: memref<1x4xf32, #tpu.memory_space<vmem>>, %arg3: memref<1x1xf32, #tpu.memory_space<vmem>>, %arg4: memref<1x1x256xf32, #tpu.memory_space<vmem>>, %arg5: memref<1x1x1xf32, #tpu.memory_space<vmem>>, %arg6: memref<1x1x1xf32, #tpu.memory_space<vmem>>) attributes {dimension_semantics = [#tpu.dimension_semantics<parallel>], iteration_bounds = array<i64: 2>, scalar_prefetch = 0 : i64, scratch_operands = 0 : i64, tpu.core_type = #tpu.core_type<tc>, window_params = [{transform_indices = @transform_0, window_bounds = array<i64: 1, 4, 256>}, {pipeline_mode = #tpu.pipeline_mode<synchronous>, transform_indices = @transform_1, window_bounds = array<i64: 1, 4>}, {pipeline_mode = #tpu.pipeline_mode<synchronous>, transform_indices = @transform_2, window_bounds = array<i64: 1, 1>}, {transform_indices = @transform_3, window_bounds = array<i64: 1, 1, 256>}, {transform_indices = @transform_4, window_bounds = array<i64: 1, 1, 1>}, {transform_indices = @transform_5, window_bounds = array<i64: 1, 1, 1>}]} {
    %c0 = arith.constant 0 : index
    %c0_0 = arith.constant 0 : index
    %c0_1 = arith.constant 0 : index
    %0 = vector.load %arg1[%c0, %c0_0, %c0_1] : memref<1x4x256xf32, #tpu.memory_space<vmem>>, vector<1x4x256xf32>
    %1 = vector.shape_cast %0 : vector<1x4x256xf32> to vector<4x256xf32>
    %c0_2 = arith.constant 0 : index
    %c0_3 = arith.constant 0 : index
    %2 = vector.load %arg2[%c0_2, %c0_3] : memref<1x4xf32, #tpu.memory_space<vmem>>, vector<1x4xf32>
    %cst = arith.constant dense<0.000000e+00> : vector<1x256xf32>
    %3 = tpu.matmul %2, %1, %cst {dimension_numbers = #tpu.dot_dimension_numbers<[1], [0], [0], [1], [0, 0, 1, 1], [], []>} : vector<1x4xf32>, vector<4x256xf32>, vector<1x256xf32> -> vector<1x256xf32>
    %c0_4 = arith.constant 0 : index
    %c0_5 = arith.constant 0 : index
    %4 = vector.load %arg3[%c0_4, %c0_5] : memref<1x1xf32, #tpu.memory_space<vmem>>, vector<1x1xf32>
    %5 = vector.broadcast %4 : vector<1x1xf32> to vector<1x256xf32>
    %6 = arith.addf %3, %5 : vector<1x256xf32>
    %c0_6 = arith.constant 0 : index
    %c0_7 = arith.constant 0 : index
    %c0_8 = arith.constant 0 : index
    %7 = vector.load %arg4[%c0_6, %c0_7, %c0_8] : memref<1x1x256xf32, #tpu.memory_space<vmem>>, vector<1x1x256xf32>
    %8 = vector.shape_cast %7 : vector<1x1x256xf32> to vector<1x256xf32>
    %9 = vector.shape_cast %6 : vector<1x256xf32> to vector<1x1x256xf32>
    tpu.vector_store %arg4[%c0_6, %c0_7, %c0_8], %9 {strides = array<i32>} : memref<1x1x256xf32, #tpu.memory_space<vmem>>, vector<1x1x256xf32>,
    %cst_9 = arith.constant dense<0.000000e+00> : vector<1xf32>
    %10 = vector.multi_reduction <add>, %6, %cst_9 [1] : vector<1x256xf32> to vector<1xf32>
    %11 = vector.shape_cast %10 : vector<1xf32> to vector<1x1xf32>
    %c0_10 = arith.constant 0 : index
    %c0_11 = arith.constant 0 : index
    %c0_12 = arith.constant 0 : index
    %12 = vector.load %arg5[%c0_10, %c0_11, %c0_12] : memref<1x1x1xf32, #tpu.memory_space<vmem>>, vector<1x1x1xf32>
    %13 = vector.shape_cast %12 : vector<1x1x1xf32> to vector<1x1xf32>
    %14 = vector.shape_cast %11 : vector<1x1xf32> to vector<1x1x1xf32>
    tpu.vector_store %arg5[%c0_10, %c0_11, %c0_12], %14 {strides = array<i32>} : memref<1x1x1xf32, #tpu.memory_space<vmem>>, vector<1x1x1xf32>,
    %15 = arith.mulf %6, %6 : vector<1x256xf32>
    %cst_13 = arith.constant dense<0.000000e+00> : vector<1xf32>
    %16 = vector.multi_reduction <add>, %15, %cst_13 [1] : vector<1x256xf32> to vector<1xf32>
    %17 = vector.shape_cast %16 : vector<1xf32> to vector<1x1xf32>
    %c0_14 = arith.constant 0 : index
    %c0_15 = arith.constant 0 : index
    %c0_16 = arith.constant 0 : index
    %18 = vector.load %arg6[%c0_14, %c0_15, %c0_16] : memref<1x1x1xf32, #tpu.memory_space<vmem>>, vector<1x1x1xf32>
    %19 = vector.shape_cast %18 : vector<1x1x1xf32> to vector<1x1xf32>
    %20 = vector.shape_cast %17 : vector<1x1xf32> to vector<1x1x1xf32>
    tpu.vector_store %arg6[%c0_14, %c0_15, %c0_16], %20 {strides = array<i32>} : memref<1x1x1xf32, #tpu.memory_space<vmem>>, vector<1x1x1xf32>,
    return
  }
  func.func @transform_0(%arg0: i32) -> (i32, i32, i32) {
    %c0_i32 = arith.constant 0 : i32
    %c0_i32_0 = arith.constant 0 : i32
    %c0_i32_1 = arith.constant 0 : i32
    return %arg0, %c0_i32, %c0_i32_0 : i32, i32, i32
  }
  func.func @transform_1(%arg0: i32) -> (i32, i32) {
    %c0_i32 = arith.constant 0 : i32
    %c0_i32_0 = arith.constant 0 : i32
    %c0_i32_1 = arith.constant 0 : i32
    return %c0_i32, %c0_i32_0 : i32, i32
  }
  func.func @transform_2(%arg0: i32) -> (i32, i32) {
    %c0_i32 = arith.constant 0 : i32
    %c0_i32_0 = arith.constant 0 : i32
    %c0_i32_1 = arith.constant 0 : i32
    return %c0_i32, %c0_i32_0 : i32, i32
  }
  func.func @transform_3(%arg0: i32) -> (i32, i32, i32) {
    %c0_i32 = arith.constant 0 : i32
    %c0_i32_0 = arith.constant 0 : i32
    %c0_i32_1 = arith.constant 0 : i32
    return %arg0, %c0_i32, %c0_i32_0 : i32, i32, i32
  }
  func.func @transform_4(%arg0: i32) -> (i32, i32, i32) {
    %c0_i32 = arith.constant 0 : i32
    %c0_i32_0 = arith.constant 0 : i32
    %c0_i32_1 = arith.constant 0 : i32
    return %arg0, %c0_i32, %c0_i32_0 : i32, i32, i32
  }
  func.func @transform_5(%arg0: i32) -> (i32, i32, i32) {
    %c0_i32 = arith.constant 0 : i32
    %c0_i32_0 = arith.constant 0 : i32
    %c0_i32_1 = arith.constant 0 : i32
    return %arg0, %c0_i32, %c0_i32_0 : i32, i32, i32
  }
}

module attributes {stable_mosaic.version = 11 : i64} {
  func.func @_bn_act_kernel(%arg0: i32, %arg1: memref<1x1x256xf32, #tpu.memory_space<vmem>>, %arg2: memref<1x1xf32, #tpu.memory_space<vmem>>, %arg3: memref<1x1xf32, #tpu.memory_space<vmem>>, %arg4: memref<1x1x256xf32, #tpu.memory_space<vmem>>) attributes {dimension_semantics = [#tpu.dimension_semantics<parallel>], iteration_bounds = array<i64: 2>, scalar_prefetch = 0 : i64, scratch_operands = 0 : i64, tpu.core_type = #tpu.core_type<tc>, window_params = [{transform_indices = @transform_0, window_bounds = array<i64: 1, 1, 256>}, {pipeline_mode = #tpu.pipeline_mode<synchronous>, transform_indices = @transform_1, window_bounds = array<i64: 1, 1>}, {pipeline_mode = #tpu.pipeline_mode<synchronous>, transform_indices = @transform_2, window_bounds = array<i64: 1, 1>}, {transform_indices = @transform_3, window_bounds = array<i64: 1, 1, 256>}]} {
    %c0 = arith.constant 0 : index
    %c0_0 = arith.constant 0 : index
    %c0_1 = arith.constant 0 : index
    %0 = vector.load %arg1[%c0, %c0_0, %c0_1] : memref<1x1x256xf32, #tpu.memory_space<vmem>>, vector<1x1x256xf32>
    %1 = vector.shape_cast %0 : vector<1x1x256xf32> to vector<1x256xf32>
    %c0_2 = arith.constant 0 : index
    %c0_3 = arith.constant 0 : index
    %2 = vector.load %arg2[%c0_2, %c0_3] : memref<1x1xf32, #tpu.memory_space<vmem>>, vector<1x1xf32>
    %3 = vector.broadcast %2 : vector<1x1xf32> to vector<1x256xf32>
    %4 = arith.mulf %1, %3 : vector<1x256xf32>
    %c0_4 = arith.constant 0 : index
    %c0_5 = arith.constant 0 : index
    %5 = vector.load %arg3[%c0_4, %c0_5] : memref<1x1xf32, #tpu.memory_space<vmem>>, vector<1x1xf32>
    %6 = vector.broadcast %5 : vector<1x1xf32> to vector<1x256xf32>
    %7 = arith.addf %4, %6 : vector<1x256xf32>
    %c0_6 = arith.constant 0 : index
    %c0_7 = arith.constant 0 : index
    %c0_8 = arith.constant 0 : index
    %8 = vector.load %arg4[%c0_6, %c0_7, %c0_8] : memref<1x1x256xf32, #tpu.memory_space<vmem>>, vector<1x1x256xf32>
    %9 = vector.shape_cast %8 : vector<1x1x256xf32> to vector<1x256xf32>
    %10 = vector.shape_cast %7 : vector<1x256xf32> to vector<1x1x256xf32>
    tpu.vector_store %arg4[%c0_6, %c0_7, %c0_8], %10 {strides = array<i32>} : memref<1x1x256xf32, #tpu.memory_space<vmem>>, vector<1x1x256xf32>,
    return
  }
  func.func @transform_0(%arg0: i32) -> (i32, i32, i32) {
    %c0_i32 = arith.constant 0 : i32
    %c0_i32_0 = arith.constant 0 : i32
    %c0_i32_1 = arith.constant 0 : i32
    return %arg0, %c0_i32, %c0_i32_0 : i32, i32, i32
  }
  func.func @transform_1(%arg0: i32) -> (i32, i32) {
    %c0_i32 = arith.constant 0 : i32
    %c0_i32_0 = arith.constant 0 : i32
    %c0_i32_1 = arith.constant 0 : i32
    return %c0_i32, %c0_i32_0 : i32, i32
  }
  func.func @transform_2(%arg0: i32) -> (i32, i32) {
    %c0_i32 = arith.constant 0 : i32
    %c0_i32_0 = arith.constant 0 : i32
    %c0_i32_1 = arith.constant 0 : i32
    return %c0_i32, %c0_i32_0 : i32, i32
  }
  func.func @transform_3(%arg0: i32) -> (i32, i32, i32) {
    %c0_i32 = arith.constant 0 : i32
    %c0_i32_0 = arith.constant 0 : i32
    %c0_i32_1 = arith.constant 0 : i32
    return %arg0, %c0_i32, %c0_i32_0 : i32, i32, i32
  }
}

</mosaic_0001>

<bundles_post_ra>
// kernel: generator_forward.27
= control target key start
LH: loop header
LB: loop body
LE: loop exit
PB: predicated region body
PF: predicated region fallthrough
CT: control target
= control target key end

     0   :  { %s305_s12 = smov 0   ;;  %s328_s0 = inlined_call_operand.vmem [shape: f32[2,4,256], index: 0, kind: input, shape index: {}]   ;;  %s329_s1 = inlined_call_operand.vmem [shape: f32[4,1], index: 1, kind: input, shape index: {}]   ;;  %s330_s2 = inlined_call_operand.vmem [shape: f32[4,1], index: 2, kind: input, shape index: {}]   ;;  %s331_s3 = inlined_call_operand.vmem [shape: f32[2,4,256], index: 3, kind: output, shape index: {}]  }
   0x1 LB: > { %s251_s13 = sadd.s32 4294967295, %s281_s12   ;;  %p255_p0 = scmp.ge.s32.totalorder %s281_s12, 1  ;;  %s281_s12 = sphi %s305_s12, %s13_s12  }
   0x2   : > { %p137_p1 = scmp.lt.s32.totalorder %s281_s12, 3 }
   0x4   : > { %p138_p2 = pnand %p255_p0, %p137_p1 }
   0x5   : > { %p161_p3 = scmp.lt.s32.totalorder (!%p138_p2), %s251_s13, 1 }
   0x6   : > { %141 = sbr.rel (%p138_p2) target bundleno = 143 (0x8f), region = 32 }
   0xb   : > { %v172_v0 = vld [vmem:[%s329_s1] sm:$0xf]  ;;  %v283_v1 = vmov 0   ;;  %s333_s13 = smov (!%p161_p3, %s251_s13), 1  ;;  %v284_v3 = vmov 839922192  }
   0xc   : > { %274 = vset.pattern.permute.xlu0 %v283_v1  ;;  %v183_v2 = vld [vmem:[%s330_s2] sm:$0xf]  ;;  %v178_v4 = vunpack.c.l.s4 %v284_v3  ;;  %s262_s18 = sshll.u32 %s333_s13, 3 }
   0xd   : > { %175 = vperm.xlu0 %274, %v172_v0   ;;  %s165_s21 = scalar_lea.vmem %s328_s0, %s262_s18  ;;  %s170_s24 = scalar_lea.vmem %s331_s3, %s262_s18 }
   0xe   : > { %v179_v6 = vunpack.c.0.s8 %v178_v4  ;;  %v171_v8 = vld [vmem:[%s165_s21] sm:$0xff] }
  0x15   : > { %186 = vperm.xlu0 %274, %v183_v2  }
  0x7f   : > { %v176_v5 = vpop.permute.xlu0 %175 }
  0x80   : > { %v180_v7 = vperm.slane %v176_v5, %v179_v6 }
  0x82   : > { %v182_v10 = vmul.f32 %v180_v7, %v171_v8 }
  0x87   : > { %v187_v9 = vpop.permute.xlu0 %186 }
  0x88   : > { %v191_v11 = vperm.slane %v187_v9, %v179_v6 }
  0x8a   : > { %v193_v12 = vadd.f32 %v191_v11, %v182_v10 }
  0x8c   : > { %v194_v13 = vmax.f32 %v193_v12, 0.0 }
  0x8e   : > { %195 = vst [vmem:[%s170_s24] sm:$0xff] %v194_v13 }
  0x8f PF: > { %s13_s12 = sadd.s32 1, %s281_s12  }
  0x90   : > { %p10_p4 = scmp.ge.s32.totalorder %s13_s12, 4  }
  0x92   :  { %12 = sbr.rel (!%p10_p4) target bundleno = 1 (0x1), region = 62 }

// kernel: generator_forward.26
= control target key start
LH: loop header
LB: loop body
LE: loop exit
PB: predicated region body
PF: predicated region fallthrough
CT: control target
= control target key end

     0   :  { %s739_s18 = smov 0   ;;  %s846_s0 = inlined_call_operand.vmem [shape: f32[2,1,290], index: 0, kind: input, shape index: {}]   ;;  %s847_s1 = inlined_call_operand.vmem [shape: f32[4,9], index: 1, kind: input, shape index: {}]   ;;  %s848_s2 = inlined_call_operand.vmem [shape: f32[4,1], index: 2, kind: input, shape index: {}]   ;;  %s849_s3 = inlined_call_operand.vmem [shape: f32[2,4,256], index: 3, kind: output, shape index: {0}]   ;;  %s850_s4 = inlined_call_operand.vmem [shape: f32[2,4,1], index: 4, kind: output, shape index: {1}]   ;;  %s851_s5 = inlined_call_operand.vmem [shape: f32[2,4,1], index: 5, kind: output, shape index: {2}]  }
   0x1 LB: > { %s621_s19 = sadd.s32 4294967295, %s698_s18   ;;  %p625_p0 = scmp.ge.s32.totalorder %s698_s18, 1  ;;  %s698_s18 = sphi %s739_s18, %s16_s18  }
   0x2   : > { %p191_p1 = scmp.lt.s32.totalorder %s698_s18, 3 }
   0x4   : > { %p192_p2 = pnand %p625_p0, %p191_p1 }
   0x5   : > { %p226_p3 = scmp.lt.s32.totalorder (!%p192_p2), %s621_s19, 1  ;;  %s700_s24 = smov (!%p192_p2), 112  }
   0x6   : > { %195 = sbr.rel (%p192_p2) target bundleno = 431 (0x1af), region = 32  ;;  %s701_s25 = smov (!%p192_p2), 126  }
   0x7   : > { %s702_s26 = smov (!%p192_p2), 127   ;;  %s703_s27 = smov (!%p192_p2), 110  }
   0x8   : > { %s704_s28 = smov (!%p192_p2), 96   ;;  %s705_s29 = smov (!%p192_p2), 111  }
   0x9   : > { %s706_s30 = smov (!%p192_p2), 94   ;;  %s707_s6 = smov (!%p192_p2), 95  }
   0xb   : > { %s861_s19 = smov (!%p226_p3, %s621_s19), 1  ;;  %v244_v9 = vlaneseq  ;;  %v427_v15 = vld [vmem:[%s848_s2] sm:$0xf]  ;;  %v708_v16 = vmov 0   ;;  %vm289_vm0 = vcmask 1031168   ;;  %vm302_vm1 = vcmask 916480  }
   0xc   : > { %s637_s20 = smul.u32 3, %s861_s19  ;;  %690 = vset.pattern.permute.xlu2 %v708_v16  ;;  %691 = vset.pattern.permute.xlu0 %v708_v16  ;;  %vm354_vm6 = vcmask 1039360   ;;  %vm405_vm7 = vcmask 1040384   ;;  %vm408_vm8 = vcmask 1041408   ;;  %vm411_vm9 = vcmask 1042432   ;;  %s636_s11 = sshll.u32 %s861_s19, 3 }
   0xd   : > { %v245_v13 = vand.u32 127, %v244_v9  ;;  %vm328_vm10 = vcmask 785408   ;;  %vm315_vm11 = vcmask 900096   ;;  %vm341_vm12 = vcmask 769024   ;;  %s234_s14 = scalar_lea.vmem %s849_s3, %s636_s11  ;;  %s628_s15 = sshll.u32 %s861_s19, 2 }
   0xe   : > { %s229_s23 = scalar_lea.vmem %s846_s0, %s637_s20  ;;  %vm377_vm13 = vcmask 908288   ;;  %vm414_vm14 = vcmask 1043456   ;;  %vm417_vm15 = vcmask 1044480   ;;  %s238_s20 = scalar_lea.vmem %s850_s4, %s628_s15 }
   0xf   : > { %v243_v0 = vld [vmem:[%s229_s23] sm:$0x7]  ;;  %v246_v14 = vadd.s32 128, %v245_v13  ;;  %v251_v19 = vand.u32 15, %v245_v13  ;;  %s242_s23 = scalar_lea.vmem %s851_s5, %s628_s15 }
  0x10   : > { %v753_v1 = vperm.slane %v243_v0, 0  ;;  %v755_v2 = vperm.slane %v243_v0, 1  ;;  %v282_v4 = vperm.slane %v243_v0, 2 }
  0x11   : > { %v258_v22 = vand.u32 15, %v246_v14  ;;  %vm766_vm2 = vcmp.ne.s32.totalorder %v251_v19, 0  ;;  %vm770_vm3 = vcmp.ne.s32.totalorder %v251_v19, 15 }
  0x12   : > { %v660_v3 = vpack.i.bf16 %v755_v2, %v753_v1  ;;  %v280_v36 = vsel %vm766_vm2, %v753_v1, 0.0 }
  0x13   : > { %vm774_vm4 = vcmp.ne.s32.totalorder %v258_v22, 0  ;;  %vm778_vm5 = vcmp.ne.s32.totalorder %v258_v22, 15 }
  0x14   : > { %661 = vrot.lane.b32.xlu1 %v660_v3, %s700_s24  ;;  %656 = vrot.lane.b32.xlu0 %v660_v3, %s701_s25  ;;  %v281_v37 = vsel %vm774_vm4, %v755_v2, 0.0 }
  0x15   : > { %666 = vrot.lane.b32.xlu2 %v660_v3, %s702_s26 }
  0x1c   : > { %300 = vrot.lane.b32.xlu1 %v282_v4, %s700_s24  ;;  %287 = vrot.lane.b32.xlu0 %v282_v4, %s701_s25 }
  0x1d   : > { %352 = vrot.lane.b32.xlu2 %v282_v4, %s702_s26 }
  0x24   : > { %313 = vrot.lane.b32.xlu1 %v282_v4, %s703_s27  ;;  %671 = vrot.lane.b32.xlu0 %v660_v3, %s703_s27 }
  0x25   : > { %676 = vrot.lane.b32.xlu2 %v660_v3, %s704_s28 }
  0x2c   : > { %681 = vrot.lane.b32.xlu1 %v660_v3, %s705_s29  ;;  %326 = vrot.lane.b32.xlu0 %v282_v4, %s704_s28 }
  0x2d   : > { %375 = vrot.lane.b32.xlu2 %v282_v4, %s705_s29 }
  0x34   : > { %337 = vrot.lane.b32.xlu1 %v755_v2, %s706_s30  ;;  %335 = vrot.lane.b32.xlu0 %v753_v1, %s706_s30 }
  0x35   : > { %339 = vrot.lane.b32.xlu2 %v282_v4, %s706_s30 }
  0x3c   : > { %686 = vrot.lane.b32.xlu0 %v660_v3, %s707_s6  ;;  %398 = vrot.lane.b32.xlu1 %v282_v4, %s707_s6 }
  0x3d   : > { %430 = vperm.xlu2 %690, %v427_v15  }
  0x6f   : > { %v667_v5 = vpop.permute.xlu2 %666 }
  0x70   : > { %v669_v28 = vunpack.i.h.bf16 %v667_v5  ;;  %v668_v29 = vunpack.i.l.bf16 %v667_v5 }
  0x72   : > { %v355_v42 = vsel %vm354_vm6, %v668_v29, %v669_v28 }
  0x73   : > { %v406_v52 = vsel %vm405_vm7, %v280_v36, %v355_v42 }
  0x77   : > { %v353_v6 = vpop.permute.xlu2 %352 }
  0x78   : > { %v356_v43 = vsel %vm354_vm6, %v669_v28, %v353_v6 }
  0x79   : > { %v407_v56 = vsel %vm405_vm7, %v281_v37, %v356_v43 }
  0x7f   : > { %v761_v12 = vpop.permute.xlu2 %676 }
  0x80   : > { %v679_v44 = vunpack.i.h.bf16 %v761_v12  ;;  %v678_v45 = vunpack.i.l.bf16 %v761_v12 }
  0x82   : > { %v329_v57 = vsel %vm328_vm10, %v678_v45, %v679_v44 }
  0x83   : > { %v333_v12 = vsel %vm766_vm2, %v329_v57, 0.0 }
  0x86   : > { %v662_v7 = vpop.permute.xlu1 %661  ;;  %v657_v8 = vpop.permute.xlu0 %656 }
  0x87   : > { %v659_v20 = vunpack.i.h.bf16 %v657_v8  ;;  %v658_v21 = vunpack.i.l.bf16 %v657_v8  ;;  %v376_v23 = vpop.permute.xlu2 %375  ;;  %v664_v24 = vunpack.i.h.bf16 %v662_v7  ;;  %v663_v25 = vunpack.i.l.bf16 %v662_v7 }
  0x89   : > { %v290_v31 = vsel %vm289_vm0, %v658_v21, %v659_v20  ;;  %v303_v38 = vsel %vm302_vm1, %v663_v25, %v664_v24 }
  0x8a   : > { %v294_v39 = vsel %vm770_vm3, %v290_v31, 0.0  ;;  %v307_v48 = vsel %vm766_vm2, %v303_v38, 0.0  ;;  %vm423_vm2 = vcmask 1046528   ;;  %v426_v31 = vld [vmem:[%s847_s1] sm:$0xf] }
  0x8b   : > { %v361_v49 = vrot.slane %v294_v39, 6  ;;  %v367_v58 = vrot.slane %v307_v48, 5 }
  0x8d   : > { %v409_v0 = vsel %vm408_vm8, %v406_v52, %v361_v49 }
  0x8e   : > { %v301_v10 = vpop.permute.xlu1 %300  ;;  %v288_v11 = vpop.permute.xlu0 %287  ;;  %v412_v13 = vsel %vm411_vm9, %v409_v0, %v367_v58 }
  0x8f   : > { %v291_v33 = vsel %vm289_vm0, %v659_v20, %v288_v11  ;;  %v304_v40 = vsel %vm302_vm1, %v664_v24, %v301_v10  ;;  %v340_v55 = vpop.permute.xlu2 %339  ;;  %v390_v20 = vrot.slane %v333_v12, 2  ;;  %vm400_vm0 = vcmask 777216  }
  0x90   : > { %v295_v41 = vsel %vm778_vm5, %v291_v33, 0.0  ;;  %v308_v50 = vsel %vm774_vm4, %v304_v40, 0.0  ;;  %vm420_vm1 = vcmask 1045504  }
  0x91   : > { %v362_v51 = vrot.slane %v295_v41, 6  ;;  %v368_v59 = vrot.slane %v308_v50, 5 }
  0x93   : > { %v410_v3 = vsel %vm408_vm8, %v407_v56, %v362_v51 }
  0x94   : > { %v413_v14 = vsel %vm411_vm9, %v410_v3, %v368_v59 }
  0x96   : > { %v314_v17 = vpop.permute.xlu1 %313  ;;  %v672_v18 = vpop.permute.xlu0 %671 }
  0x97   : > { %v674_v46 = vunpack.i.h.bf16 %v672_v18  ;;  %v673_v47 = vunpack.i.l.bf16 %v672_v18 }
  0x99   : > { %v317_v60 = vsel %vm315_vm11, %v674_v46, %v314_v17  ;;  %v316_v63 = vsel %vm315_vm11, %v673_v47, %v674_v46 }
  0x9a   : > { %v321_v9 = vsel %vm778_vm5, %v317_v60, 0.0  ;;  %v320_v10 = vsel %vm770_vm3, %v316_v63, 0.0 }
  0x9b   : > { %v385_v17 = vrot.slane %v321_v9, 3  ;;  %v384_v18 = vrot.slane %v320_v10, 3 }
  0x9e   : > { %v682_v34 = vpop.permute.xlu1 %681  ;;  %v327_v35 = vpop.permute.xlu0 %326 }
  0x9f   : > { %v684_v53 = vunpack.i.h.bf16 %v682_v34  ;;  %v683_v54 = vunpack.i.l.bf16 %v682_v34  ;;  %v330_v1 = vsel %vm328_vm10, %v679_v44, %v327_v35  ;;  %v431_v34 = vpop.permute.xlu2 %430 }
  0xa0   : > { %v334_v11 = vsel %vm774_vm4, %v330_v1, 0.0  ;;  %vm494_vm4 = vcmask 3072  }
  0xa1   : > { %v378_v5 = vsel %vm377_vm13, %v683_v54, %v684_v53  ;;  %v379_v6 = vsel %vm377_vm13, %v684_v53, %v376_v23  ;;  %v391_v19 = vrot.slane %v334_v11, 2 }
  0xa2   : > { %v415_v15 = vsel %vm414_vm14, %v412_v13, %v378_v5  ;;  %v416_v16 = vsel %vm414_vm14, %v413_v14, %v379_v6 }
  0xa3   : > { %v418_v23 = vsel %vm417_vm15, %v415_v15, %v384_v18  ;;  %v419_v24 = vsel %vm417_vm15, %v416_v16, %v385_v17 }
  0xa4   : > { %v421_v29 = vsel %vm420_vm1, %v418_v23, %v390_v20  ;;  %v422_v30 = vsel %vm420_vm1, %v419_v24, %v391_v19 }
  0xa6   : > { %v338_v61 = vpop.permute.xlu1 %337  ;;  %v336_v62 = vpop.permute.xlu0 %335 }
  0xa7   : > { %v342_v2 = vsel %vm341_vm12, %v336_v62, %v338_v61  ;;  %v343_v4 = vsel %vm341_vm12, %v338_v61, %v340_v55 }
  0xa8   : > { %v346_v7 = vsel %vm770_vm3, %v342_v2, 0.0  ;;  %v347_v8 = vsel %vm778_vm5, %v343_v4, 0.0  ;;  %vm433_vm3 = vcmask 72704  }
  0xa9   : > { %630 = vmatpush.msk.msra.mxu0 %vm405_vm7, %v346_v7  ;;  %632 = vmatpush.msk.msra.mxu1 %vm405_vm7, %v347_v8 }
  0xae   : > { %v687_v21 = vpop.permute.xlu0 %686  ;;  %v399_v22 = vpop.permute.xlu1 %398 }
  0xaf   : > { %v689_v25 = vunpack.i.h.bf16 %v687_v21  ;;  %v688_v26 = vunpack.i.l.bf16 %v687_v21 }
  0xb1   : > { %v402_v27 = vsel %vm400_vm0, %v689_v25, %v399_v22  ;;  %v401_v28 = vsel %vm400_vm0, %v688_v26, %v689_v25 }
  0xb2   : > { %v424_v32 = vsel %vm423_vm2, %v421_v29, %v401_v28  ;;  %v425_v33 = vsel %vm423_vm2, %v422_v30, %v402_v27 }
  0xb3   : > { %458 = vmatpush.msra.mxu0 %v424_v32  ;;  %478 = vmatpush.msra.mxu1 %v425_v33 }
  0xb4   : > { %631 = vmatmul.msk.f32.vlgmr.msra.gmra.mxu0 %vm433_vm3, %v426_v31  ;;  %633 = vmatmul.msk.f32.vlgmr.msra.gmra.mxu1 %vm433_vm3, %v426_v31 }
 0x131   : > { %v460_v35 = vpop.f32.mrf.mxu0  ;;  %v480_v36 = vpop.f32.mrf.mxu1 }
 0x132   : > { %v461_v37 = vadd.f32 %v460_v35, %v431_v34  ;;  %v481_v38 = vadd.f32 %v480_v36, %v431_v34 }
 0x134   : > { %v485_v39 = vrot.slane %v481_v38, 4  ;;  %v489_v40 = vsel %vm414_vm14, %v461_v37, 0.0  ;;  %v490_v41 = vsel %vm414_vm14, %v481_v38, 0.0  ;;  %v496_v42 = vmul.f32 %v461_v37, %v461_v37 }
 0x135   : > { %v491_v43 = vadd.f32 %v490_v41, %v489_v40  ;;  %v497_v44 = vmul.f32 %v481_v38, %v481_v38 }
 0x136   : > { %v486_v45 = vsel %vm414_vm14, %v461_v37, %v485_v39  ;;  %v498_v46 = vsel %vm414_vm14, %v496_v42, 0.0 }
 0x137   : > { %488 = vst [vmem:[%s234_s14] sm:$0xff] %v486_v45  ;;  %492 = vadd.xlane.f32.xlu0 %v491_v43  ;;  %v499_v47 = vsel %vm414_vm14, %v497_v44, 0.0 }
 0x138   : > { %v500_v48 = vadd.f32 %v499_v47, %v498_v46 }
 0x13a   : > { %501 = vadd.xlane.f32.xlu1 %v500_v48 }
 0x1aa   : > { %v493_v49 = vpop.xlane.xlu0 %492 }
 0x1ab   : > { %495 = vst.msk [vmem:[%s238_s20] sm:$0xf] %vm494_vm4, %v493_v49 }
 0x1ad   : > { %v502_v50 = vpop.xlane.xlu1 %501 }
 0x1ae   : > { %503 = vst.msk [vmem:[%s242_s23] sm:$0xf] %vm494_vm4, %v502_v50 }
 0x1af PF: > { %s16_s18 = sadd.s32 1, %s698_s18  }
 0x1b0   : > { %p13_p4 = scmp.ge.s32.totalorder %s16_s18, 4  }
 0x1b2   :  { %15 = sbr.rel (!%p13_p4) target bundleno = 1 (0x1), region = 86 }

// kernel: generator_forward.29
= control target key start
LH: loop header
LB: loop body
LE: loop exit
PB: predicated region body
PF: predicated region fallthrough
CT: control target
= control target key end

     0   :  { %s300_s12 = smov 0   ;;  %s323_s0 = inlined_call_operand.vmem [shape: f32[2,8,256], index: 0, kind: input, shape index: {}]   ;;  %s324_s1 = inlined_call_operand.vmem [shape: f32[8,1], index: 1, kind: input, shape index: {}]   ;;  %s325_s2 = inlined_call_operand.vmem [shape: f32[8,1], index: 2, kind: input, shape index: {}]   ;;  %s326_s3 = inlined_call_operand.vmem [shape: f32[2,8,256], index: 3, kind: output, shape index: {}]  }
   0x1 LB: > { %s248_s13 = sadd.s32 4294967295, %s277_s12   ;;  %p252_p0 = scmp.ge.s32.totalorder %s277_s12, 1  ;;  %s277_s12 = sphi %s300_s12, %s13_s12  }
   0x2   : > { %p137_p1 = scmp.lt.s32.totalorder %s277_s12, 3 }
   0x4   : > { %p138_p2 = pnand %p252_p0, %p137_p1 }
   0x5   : > { %p161_p3 = scmp.lt.s32.totalorder (!%p138_p2), %s248_s13, 1 }
   0x6   : > { %141 = sbr.rel (%p138_p2) target bundleno = 142 (0x8e), region = 32 }
   0xb   : > { %v173_v0 = vld [vmem:[%s324_s1] sm:$0xff]  ;;  %v279_v1 = vmov 0   ;;  %s328_s13 = smov (!%p161_p3, %s248_s13), 1 }
   0xc   : > { %270 = vset.pattern.permute.xlu0 %v279_v1  ;;  %v181_v2 = vld [vmem:[%s325_s2] sm:$0xff]  ;;  %s259_s18 = sshll.u32 %s328_s13, 4 }
   0xd   : > { %176 = vperm.xlu0 %270, %v173_v0   ;;  %s165_s21 = scalar_lea.vmem %s323_s0, %s259_s18  ;;  %s170_s24 = scalar_lea.vmem %s326_s3, %s259_s18 }
   0xe   : > { %v171_v4 = vld [vmem:[%s165_s21] sm:$0xff]  ;;  %v172_v5 = vld [vmem:[%s165_s21 + $0x8] sm:$0xff] }
  0x15   : > { %184 = vperm.xlu0 %270, %v181_v2  }
  0x7f   : > { %v177_v3 = vpop.permute.xlu0 %176 }
  0x80   : > { %v179_v6 = vmul.f32 %v177_v3, %v171_v4  ;;  %v180_v7 = vmul.f32 %v177_v3, %v172_v5 }
  0x87   : > { %v185_v8 = vpop.permute.xlu0 %184 }
  0x88   : > { %v187_v9 = vadd.f32 %v185_v8, %v179_v6  ;;  %v188_v10 = vadd.f32 %v185_v8, %v180_v7 }
  0x8a   : > { %v189_v11 = vmax.f32 %v187_v9, 0.0  ;;  %v190_v12 = vmax.f32 %v188_v10, 0.0 }
  0x8c   : > { %191 = vst [vmem:[%s170_s24] sm:$0xff] %v189_v11 }
  0x8d   : > { %192 = vst [vmem:[%s170_s24 + $0x8] sm:$0xff] %v190_v12 }
  0x8e PF: > { %s13_s12 = sadd.s32 1, %s277_s12  }
  0x8f   : > { %p10_p4 = scmp.ge.s32.totalorder %s13_s12, 4  }
  0x91   :  { %12 = sbr.rel (!%p10_p4) target bundleno = 1 (0x1), region = 62 }

// kernel: generator_forward.28
= control target key start
LH: loop header
LB: loop body
LE: loop exit
PB: predicated region body
PF: predicated region fallthrough
CT: control target
= control target key end

     0   :  { %s771_s18 = smov 0   ;;  %s892_s0 = inlined_call_operand.vmem [shape: f32[2,4,290], index: 0, kind: input, shape index: {}]   ;;  %s893_s1 = inlined_call_operand.vmem [shape: f32[8,36], index: 1, kind: input, shape index: {}]   ;;  %s894_s2 = inlined_call_operand.vmem [shape: f32[8,1], index: 2, kind: input, shape index: {}]   ;;  %s895_s3 = inlined_call_operand.vmem [shape: f32[2,8,256], index: 3, kind: output, shape index: {0}]   ;;  %s896_s4 = inlined_call_operand.vmem [shape: f32[2,8,1], index: 4, kind: output, shape index: {1}]   ;;  %s897_s5 = inlined_call_operand.vmem [shape: f32[2,8,1], index: 5, kind: output, shape index: {2}]  }
   0x1 LB: > { %s652_s19 = sadd.s32 4294967295, %s730_s18   ;;  %p656_p0 = scmp.ge.s32.totalorder %s730_s18, 1  ;;  %s730_s18 = sphi %s771_s18, %s16_s18  }
   0x2   : > { %p192_p1 = scmp.lt.s32.totalorder %s730_s18, 3 }
   0x4   : > { %p193_p2 = pnand %p656_p0, %p192_p1 }
   0x5   : > { %p228_p3 = scmp.lt.s32.totalorder (!%p193_p2), %s652_s19, 1  ;;  %s732_s24 = smov (!%p193_p2), 112  }
   0x6   : > { %196 = sbr.rel (%p193_p2) target bundleno = 467 (0x1d3), region = 32  ;;  %s733_s25 = smov (!%p193_p2), 126  }
   0x7   : > { %s734_s26 = smov (!%p193_p2), 110   ;;  %s735_s27 = smov (!%p193_p2), 96  }
   0x8   : > { %s736_s28 = smov (!%p193_p2), 94   ;;  %s737_s29 = smov (!%p193_p2), 95  }
   0x9   : > { %s738_s30 = smov (!%p193_p2), 111   ;;  %s739_s6 = smov (!%p193_p2), 127  }
   0xb   : > { %s907_s19 = smov (!%p228_p3, %s652_s19), 1  ;;  %v248_v41 = vlaneseq  ;;  %vm384_vm0 = vcmask 769024   ;;  %v466_v48 = vld [vmem:[%s894_s2] sm:$0xff]  ;;  %v740_v51 = vmov 0   ;;  %vm456_vm3 = vcmask 1043456  }
   0xc   : > { %s669_s20 = smul.u32 12, %s907_s19  ;;  %722 = vset.pattern.permute.xlu2 %v740_v51  ;;  %723 = vset.pattern.permute.xlu0 %v740_v51  ;;  %vm365_vm4 = vcmask 785408   ;;  %vm346_vm5 = vcmask 900096   ;;  %vm327_vm6 = vcmask 916480   ;;  %vm308_vm7 = vcmask 1031168   ;;  %v465_v53 = vld [vmem:[%s893_s1] sm:$0xff] }
   0xd   : > { %v249_v43 = vand.u32 127, %v248_v41  ;;  %vm427_vm10 = vcmask 908288   ;;  %vm451_vm11 = vcmask 777216   ;;  %vm404_vm12 = vcmask 1039360   ;;  %s668_s11 = sshll.u32 %s907_s19, 4  ;;  %s660_s15 = sshll.u32 %s907_s19, 3 }
   0xe   : > { %s232_s23 = scalar_lea.vmem %s892_s0, %s669_s20  ;;  %vm472_vm13 = vcmask 293888   ;;  %s237_s14 = scalar_lea.vmem %s895_s3, %s668_s11  ;;  %vm527_vm14 = vcmask 7168  }
   0xf   : > { %v247_v0 = vld [vmem:[%s232_s23 + $0x8] sm:$0xf]  ;;  %v785_v1 = vld [vmem:[%s232_s23] sm:$0xff]  ;;  %v250_v45 = vadd.s32 128, %v249_v43  ;;  %v255_v49 = vand.u32 15, %v249_v43  ;;  %s241_s20 = scalar_lea.vmem %s896_s4, %s660_s15  ;;  %s245_s23 = scalar_lea.vmem %s897_s5, %s660_s15 }
  0x10   : > { %298 = vst [vmem:[#allocation1 + $0x10] ss:$2 sm:$0xff] %v247_v0 }
  0x11   : > { %284 = vst [vmem:[#allocation1] ss:$2 sm:$0xff] %v785_v1  ;;  %v262_v50 = vand.u32 15, %v250_v45  ;;  %vm812_vm1 = vcmp.ne.s32.totalorder %v255_v49, 15  ;;  %vm829_vm8 = vcmp.ne.s32.totalorder %v255_v49, 0 }
  0x13   : > { %vm816_vm2 = vcmp.ne.s32.totalorder %v262_v50, 15  ;;  %vm833_vm9 = vcmp.ne.s32.totalorder %v262_v50, 0 }
  0x17   : > { %v788_v2 = vld.sshfl [vmem:[#allocation1 + $0x10] sm:$0xff pattern:$0x75316420] }
  0x18   : > { %317 = vst [vmem:[#allocation1 + $0x10] ss:$2 sm:$0xff] %v247_v0  ;;  %v790_v3 = vld.sshfl [vmem:[#allocation1] sm:$0xff pattern:$0x75316420] }
  0x19   : > { %v792_v4 = vld.sshfl [vmem:[#allocation1 + $0x8] sm:$0xff pattern:$0x75316420]  ;;  %v289_v43 = vsel %vm829_vm8, %v790_v3, 0.0 }
  0x1a   : > { %296 = vst [vmem:[#allocation1] ss:$2 sm:$0xff] %v785_v1 }
  0x1f   : > { %v320_v5 = vld.sshfl [vmem:[#allocation1 + $0x10] sm:$0xff pattern:$0x75316420] }
  0x20   : > { %325 = vrot.lane.b32.xlu1 %v320_v5, %s732_s24  ;;  %336 = vst [vmem:[#allocation1 + $0x10] ss:$2 sm:$0xff] %v247_v0 }
  0x21   : > { %v299_v6 = vld.sshfl [vmem:[#allocation1] sm:$0xff pattern:$0x75316420]  ;;  %v300_v7 = vld.sshfl [vmem:[#allocation1 + $0x8] sm:$0xff pattern:$0x75316420] }
  0x22   : > { %315 = vst [vmem:[#allocation1] ss:$2 sm:$0xff] %v785_v1  ;;  %v687_v8 = vpack.i.bf16 %v300_v7, %v299_v6 }
  0x27   : > { %v339_v9 = vld.sshfl [vmem:[#allocation1 + $0x10] sm:$0xff pattern:$0x75316420] }
  0x28   : > { %688 = vrot.lane.b32.xlu1 %v687_v8, %s733_s25  ;;  %355 = vst [vmem:[#allocation1 + $0x10] ss:$2 sm:$0xff] %v247_v0  ;;  %344 = vrot.lane.b32.xlu2 %v339_v9, %s734_s26 }
  0x29   : > { %v318_v10 = vld.sshfl [vmem:[#allocation1] sm:$0xff pattern:$0x75316420]  ;;  %v319_v11 = vld.sshfl [vmem:[#allocation1 + $0x8] sm:$0xff pattern:$0x75316420] }
  0x2a   : > { %v692_v12 = vpack.i.bf16 %v319_v11, %v318_v10  ;;  %334 = vst [vmem:[#allocation1] ss:$2 sm:$0xff] %v785_v1 }
  0x2c   : > { %693 = vrot.lane.b32.xlu0 %v692_v12, %s732_s24 }
  0x2f   : > { %v358_v13 = vld.sshfl [vmem:[#allocation1 + $0x10] sm:$0xff pattern:$0x75316420] }
  0x30   : > { %374 = vst [vmem:[#allocation1 + $0x10] ss:$2 sm:$0xff] %v247_v0 }
  0x31   : > { %v337_v14 = vld.sshfl [vmem:[#allocation1] sm:$0xff pattern:$0x75316420]  ;;  %v338_v15 = vld.sshfl [vmem:[#allocation1 + $0x8] sm:$0xff pattern:$0x75316420] }
  0x32   : > { %v697_v16 = vpack.i.bf16 %v338_v15, %v337_v14  ;;  %353 = vst [vmem:[#allocation1] ss:$2 sm:$0xff] %v785_v1 }
  0x34   : > { %363 = vrot.lane.b32.xlu0 %v358_v13, %s735_s27  ;;  %698 = vrot.lane.b32.xlu1 %v697_v16, %s734_s26 }
  0x37   : > { %v377_v17 = vld.sshfl [vmem:[#allocation1 + $0x10] sm:$0xff pattern:$0x75316420] }
  0x38   : > { %394 = vst [vmem:[#allocation1 + $0x11] ss:$2 sm:$0xff] %v247_v0 }
  0x39   : > { %v356_v18 = vld.sshfl [vmem:[#allocation1] sm:$0xff pattern:$0x75316420]  ;;  %v357_v19 = vld.sshfl [vmem:[#allocation1 + $0x8] sm:$0xff pattern:$0x75316420] }
  0x3a   : > { %372 = vst [vmem:[#allocation1] ss:$2 sm:$0xff] %v785_v1  ;;  %v702_v20 = vpack.i.bf16 %v357_v19, %v356_v18 }
  0x3c   : > { %703 = vrot.lane.b32.xlu2 %v702_v20, %s735_s27  ;;  %382 = vrot.lane.b32.xlu1 %v377_v17, %s736_s28 }
  0x3f   : > { %v397_v21 = vld.sshfl [vmem:[#allocation1 + $0x10] sm:$0xff pattern:$0x75316420] }
  0x40   : > { %417 = vst [vmem:[#allocation1 + $0x10] ss:$2 sm:$0xff] %v247_v0 }
  0x41   : > { %v375_v22 = vld.sshfl [vmem:[#allocation1] sm:$0xff pattern:$0x75316420]  ;;  %v376_v23 = vld.sshfl [vmem:[#allocation1 + $0x8] sm:$0xff pattern:$0x75316420] }
  0x42   : > { %378 = vrot.lane.b32.xlu0 %v375_v22, %s736_s28  ;;  %392 = vst [vmem:[#allocation1 + $0x1] ss:$2 sm:$0xff] %v785_v1 }
  0x47   : > { %v420_v24 = vld.sshfl [vmem:[#allocation1 + $0x10] sm:$0xff pattern:$0x75316420] }
  0x48   : > { %441 = vst [vmem:[#allocation1 + $0x11] ss:$2 sm:$0xff] %v247_v0 }
  0x49   : > { %v395_v25 = vld.sshfl [vmem:[#allocation1] sm:$0xff pattern:$0x75316420]  ;;  %v396_v26 = vld.sshfl [vmem:[#allocation1 + $0x8] sm:$0xff pattern:$0x75316420] }
  0x4a   : > { %380 = vrot.lane.b32.xlu0 %v376_v23, %s736_s28  ;;  %415 = vst [vmem:[#allocation1] ss:$2 sm:$0xff] %v785_v1  ;;  %v712_v31 = vpack.i.bf16 %v396_v26, %v395_v25 }
  0x4f   : > { %v444_v27 = vld.sshfl [vmem:[#allocation1 + $0x10] sm:$0xff pattern:$0x75316420] }
  0x50   : > { %449 = vrot.lane.b32.xlu2 %v444_v27, %s737_s29 }
  0x51   : > { %v418_v28 = vld.sshfl [vmem:[#allocation1] sm:$0xff pattern:$0x75316420]  ;;  %v419_v29 = vld.sshfl [vmem:[#allocation1 + $0x8] sm:$0xff pattern:$0x75316420] }
  0x52   : > { %425 = vrot.lane.b32.xlu0 %v420_v24, %s738_s30  ;;  %439 = vst [vmem:[#allocation1 + $0x1] ss:$2 sm:$0xff] %v785_v1  ;;  %v707_v30 = vpack.i.bf16 %v419_v29, %v418_v28 }
  0x58   : > { %708 = vrot.lane.b32.xlu2 %v707_v30, %s738_s30 }
  0x59   : > { %v442_v32 = vld.sshfl [vmem:[#allocation1] sm:$0xff pattern:$0x75316420]  ;;  %v443_v33 = vld.sshfl [vmem:[#allocation1 + $0x8] sm:$0xff pattern:$0x75316420] }
  0x5a   : > { %v717_v34 = vpack.i.bf16 %v443_v33, %v442_v32  ;;  %713 = vrot.lane.b32.xlu0 %v712_v31, %s739_s6 }
  0x5c   : > { %718 = vrot.lane.b32.xlu1 %v717_v34, %s737_s29 }
  0x60   : > { %306 = vrot.lane.b32.xlu2 %v788_v2, %s733_s25 }
  0x64   : > { %402 = vrot.lane.b32.xlu1 %v397_v21, %s739_s6 }
  0x68   : > { %469 = vperm.xlu2 %722, %v466_v48   ;;  %v290_v48 = vsel %vm833_vm9, %v792_v4, 0.0 }
  0x82   : > { %v345_v37 = vpop.permute.xlu2 %344 }
  0x92   : > { %v326_v35 = vpop.permute.xlu1 %325 }
  0x96   : > { %v704_v40 = vpop.permute.xlu2 %703 }
  0x97   : > { %v705_v61 = vunpack.i.l.bf16 %v704_v40  ;;  %v706_v1 = vunpack.i.h.bf16 %v704_v40 }
  0x99   : > { %v366_v7 = vsel %vm365_vm4, %v705_v61, %v706_v1 }
  0x9a   : > { %v805_v38 = vpop.permute.xlu1 %688  ;;  %v370_v14 = vsel %vm829_vm8, %v366_v7, 0.0 }
  0x9b   : > { %v691_v5 = vunpack.i.h.bf16 %v805_v38  ;;  %v690_v6 = vunpack.i.l.bf16 %v805_v38 }
  0x9d   : > { %v309_v16 = vsel %vm308_vm7, %v690_v6, %v691_v5 }
  0x9e   : > { %v694_v36 = vpop.permute.xlu0 %693  ;;  %v313_v41 = vsel %vm812_vm1, %v309_v16, 0.0 }
  0x9f   : > { %v696_v63 = vunpack.i.h.bf16 %v694_v36  ;;  %v695_v0 = vunpack.i.l.bf16 %v694_v36 }
  0xa1   : > { %v328_v12 = vsel %vm327_vm6, %v695_v0, %v696_v63  ;;  %v329_v13 = vsel %vm327_vm6, %v696_v63, %v326_v35 }
  0xa2   : > { %v332_v24 = vsel %vm829_vm8, %v328_v12, 0.0  ;;  %v333_v25 = vsel %vm833_vm9, %v329_v13, 0.0 }
  0xa3   : > { %v411_v40 = vrot.slane %v332_v24, 4 }
  0xa5   : > { %v459_v50 = vsel %vm456_vm3, %v313_v41, %v411_v40 }
  0xa6   : > { %v364_v39 = vpop.permute.xlu0 %363  ;;  %v699_v42 = vpop.permute.xlu1 %698 }
  0xa7   : > { %v700_v62 = vunpack.i.l.bf16 %v699_v42  ;;  %v701_v2 = vunpack.i.h.bf16 %v699_v42  ;;  %v367_v17 = vsel %vm365_vm4, %v706_v1, %v364_v39 }
  0xa8   : > { %v371_v31 = vsel %vm833_vm9, %v367_v17, 0.0 }
  0xa9   : > { %v347_v8 = vsel %vm346_vm5, %v700_v62, %v701_v2  ;;  %v348_v10 = vsel %vm346_vm5, %v701_v2, %v345_v37 }
  0xaa   : > { %v807_v46 = vpop.permute.xlu2 %449  ;;  %v351_v21 = vsel %vm812_vm1, %v347_v8, 0.0  ;;  %v352_v22 = vsel %vm816_vm2, %v348_v10, 0.0 }
  0xab   : > { %v434_v32 = vrot.slane %v351_v21, 4  ;;  %v435_v39 = vrot.slane %v352_v22, 4 }
  0xae   : > { %v383_v47 = vpop.permute.xlu1 %382 }
  0xb2   : > { %v709_v59 = vpop.permute.xlu2 %708 }
  0xb3   : > { %v711_v18 = vunpack.i.h.bf16 %v709_v59  ;;  %v710_v19 = vunpack.i.l.bf16 %v709_v59 }
  0xb4   : > { %v379_v44 = vpop.permute.xlu0 %378 }
  0xb5   : > { %v428_v36 = vsel %vm427_vm10, %v710_v19, %v711_v18 }
  0xb6   : > { %v461_v45 = vsel %vm456_vm3, %v428_v36, %v434_v32 }
  0xba   : > { %v307_v20 = vpop.permute.xlu2 %306 }
  0xbb   : > { %v310_v30 = vsel %vm308_vm7, %v691_v5, %v307_v20 }
  0xbc   : > { %v381_v52 = vpop.permute.xlu0 %380  ;;  %v314_v42 = vsel %vm816_vm2, %v310_v30, 0.0 }
  0xbd   : > { %v385_v54 = vsel %vm384_vm0, %v379_v44, %v381_v52  ;;  %v386_v56 = vsel %vm384_vm0, %v381_v52, %v383_v47  ;;  %v412_v47 = vrot.slane %v333_v25, 4 }
  0xbe   : > { %v389_v57 = vsel %vm812_vm1, %v385_v54, 0.0  ;;  %v390_v58 = vsel %vm816_vm2, %v386_v56, 0.0 }
  0xbf   : > { %662 = vmatpush.msk.msra.mxu0 %vm456_vm3, %v389_v57  ;;  %664 = vmatpush.msk.msra.mxu1 %vm456_vm3, %v390_v58  ;;  %v460_v51 = vsel %vm456_vm3, %v314_v42, %v412_v47 }
  0xc2   : > { %v470_v4 = vpop.permute.xlu2 %469 }
  0xc4   : > { %v426_v60 = vpop.permute.xlu0 %425 }
  0xc5   : > { %v429_v33 = vsel %vm427_vm10, %v711_v18, %v426_v60 }
  0xcc   : > { %v714_v15 = vpop.permute.xlu0 %713 }
  0xcd   : > { %v716_v28 = vunpack.i.h.bf16 %v714_v15  ;;  %v715_v29 = vunpack.i.l.bf16 %v714_v15 }
  0xce   : > { %v719_v23 = vpop.permute.xlu1 %718 }
  0xcf   : > { %v721_v26 = vunpack.i.h.bf16 %v719_v23  ;;  %v720_v27 = vunpack.i.l.bf16 %v719_v23  ;;  %v405_v44 = vsel %vm404_vm12, %v715_v29, %v716_v28 }
  0xd0   : > { %v457_v3 = vsel %vm456_vm3, %v289_v43, %v405_v44 }
  0xd1   : > { %v452_v34 = vsel %vm451_vm11, %v720_v27, %v721_v26  ;;  %v453_v35 = vsel %vm451_vm11, %v721_v26, %v807_v46  ;;  %v462_v46 = vsel %vm456_vm3, %v429_v33, %v435_v39 }
  0xd2   : > { %v463_v37 = vsel %vm456_vm3, %v370_v14, %v452_v34  ;;  %v464_v38 = vsel %vm456_vm3, %v371_v31, %v453_v35 }
  0xd3   : > { %494 = vmatpush.msra.mxu0 %v463_v37  ;;  %514 = vmatpush.msra.mxu1 %v464_v38 }
  0xd5   : > { %495 = vmatpush.msra.mxu0 %v461_v45  ;;  %515 = vmatpush.msra.mxu1 %v462_v46 }
  0xd6   : > { %v403_v49 = vpop.permute.xlu1 %402 }
  0xd7   : > { %v406_v52 = vsel %vm404_vm12, %v716_v28, %v403_v49  ;;  %496 = vmatpush.msra.mxu0 %v459_v50  ;;  %516 = vmatpush.msra.mxu1 %v460_v51 }
  0xd8   : > { %v458_v54 = vsel %vm456_vm3, %v290_v48, %v406_v52 }
  0xd9   : > { %497 = vmatpush.msra.mxu0 %v457_v3  ;;  %517 = vmatpush.msra.mxu1 %v458_v54 }
  0xda   : > { %663 = vmatmul.msk.f32.vlgmr.msra.gmra.mxu0 %vm472_vm13, %v465_v53  ;;  %665 = vmatmul.msk.f32.vlgmr.msra.gmra.mxu1 %vm472_vm13, %v465_v53 }
 0x157   : > { %v499_v55 = vpop.f32.mrf.mxu0  ;;  %v519_v56 = vpop.f32.mrf.mxu1 }
 0x158   : > { %v500_v57 = vadd.f32 %v499_v55, %v470_v4  ;;  %v520_v58 = vadd.f32 %v519_v56, %v470_v4 }
 0x15a   : > { %522 = vst [vmem:[%s237_s14] sm:$0xff] %v500_v57  ;;  %v524_v59 = vadd.f32 %v520_v58, %v500_v57  ;;  %v529_v60 = vmul.f32 %v500_v57, %v500_v57  ;;  %v530_v61 = vmul.f32 %v520_v58, %v520_v58 }
 0x15b   : > { %523 = vst [vmem:[%s237_s14 + $0x8] sm:$0xff] %v520_v58 }
 0x15c   : > { %525 = vadd.xlane.f32.xlu0 %v524_v59  ;;  %v531_v62 = vadd.f32 %v530_v61, %v529_v60 }
 0x15e   : > { %532 = vadd.xlane.f32.xlu1 %v531_v62 }
 0x1cf   : > { %v526_v63 = vpop.xlane.xlu0 %525 }
 0x1d0   : > { %528 = vst.msk [vmem:[%s241_s20] sm:$0xff] %vm527_vm14, %v526_v63 }
 0x1d1   : > { %v533_v0 = vpop.xlane.xlu1 %532 }
 0x1d2   : > { %534 = vst.msk [vmem:[%s245_s23] sm:$0xff] %vm527_vm14, %v533_v0 }
 0x1d3 PF: > { %s16_s18 = sadd.s32 1, %s730_s18  }
 0x1d4   : > { %p13_p4 = scmp.ge.s32.totalorder %s16_s18, 4  }
 0x1d6   :  { %15 = sbr.rel (!%p13_p4) target bundleno = 1 (0x1), region = 96 }

// kernel: generator_forward.32
= control target key start
LH: loop header
LB: loop body
LE: loop exit
PB: predicated region body
PF: predicated region fallthrough
CT: control target
= control target key end

     0   :  { %s230_s6 = smov 0   ;;  %s247_s0 = inlined_call_operand.vmem [shape: f32[2,8,256], index: 0, kind: input, shape index: {}]   ;;  %s248_s1 = inlined_call_operand.vmem [shape: f32[2,1,256], index: 1, kind: output, shape index: {}]  }
   0x1 LB: > { %s193_s7 = sadd.s32 4294967295, %s218_s6   ;;  %p197_p0 = scmp.ge.s32.totalorder %s218_s6, 1  ;;  %s218_s6 = sphi %s230_s6, %s11_s6  }
   0x2   : > { %p87_p1 = scmp.lt.s32.totalorder %s218_s6, 3 }
   0x4   : > { %p88_p2 = pnand %p197_p0, %p87_p1 }
   0x5   : > { %p106_p3 = scmp.lt.s32.totalorder (!%p88_p2), %s193_s7, 1 }
   0x6   : > { %91 = sbr.rel (%p88_p2) target bundleno = 31 (0x1f), region = 24 }
   0xb   : > { %s250_s7 = smov (!%p106_p3, %s193_s7), 1  ;;  %v135_v12 = vlaneseq  ;;  %vm132_vm0 = vcmask 1040384  }
   0xc   : > { %s203_s8 = sshll.u32 %s250_s7, 4  ;;  %s200_s12 = sshll.u32 %s250_s7, 1 }
   0xd   : > { %s110_s11 = scalar_lea.vmem %s247_s0, %s203_s8  ;;  %s114_s15 = scalar_lea.vmem %s248_s1, %s200_s12  ;;  %vm137_vm1 = vcmp.lt.s32.totalorder %v135_v12, 256 }
   0xe   : > { %v115_v0 = vld [vmem:[%s110_s11] sm:$0xff]  ;;  %v116_v1 = vld [vmem:[%s110_s11 + $0x8] sm:$0xff] }
   0xf   : > { %v117_v2 = vrot.slane %v115_v0, 4  ;;  %v123_v3 = vrot.slane %v116_v1, 4 }
  0x11   : > { %v118_v4 = vadd.f32 %v117_v2, %v115_v0  ;;  %v124_v5 = vadd.f32 %v123_v3, %v116_v1 }
  0x13   : > { %v119_v6 = vrot.slane %v118_v4, 2  ;;  %v125_v7 = vrot.slane %v124_v5, 2 }
  0x15   : > { %v120_v8 = vadd.f32 %v119_v6, %v118_v4  ;;  %v126_v9 = vadd.f32 %v125_v7, %v124_v5 }
  0x17   : > { %v121_v10 = vrot.slane %v120_v8, 1  ;;  %v127_v11 = vrot.slane %v126_v9, 1 }
  0x19   : > { %v122_v13 = vadd.f32 %v121_v10, %v120_v8  ;;  %v128_v14 = vadd.f32 %v127_v11, %v126_v9 }
  0x1b   : > { %v131_v15 = vrot.slane %v128_v14, 7 }
  0x1d   : > { %v133_v16 = vsel %vm132_vm0, %v122_v13, %v131_v15 }
  0x1e   : > { %139 = vst.msk [vmem:[%s114_s15] sm:$0x3] %vm137_vm1, %v133_v16 }
  0x1f PF: > { %s11_s6 = sadd.s32 1, %s218_s6  }
  0x20   : > { %p8_p4 = scmp.ge.s32.totalorder %s11_s6, 4  }
  0x22   :  { %10 = sbr.rel (!%p8_p4) target bundleno = 1 (0x1), region = 54 }

// kernel: generator_forward.33
= control target key start
LH: loop header
LB: loop body
LE: loop exit
PB: predicated region body
PF: predicated region fallthrough
CT: control target
= control target key end

     0   :  { %vm79_vm0 = vcmask 130048   ;;  %s258_s0 = inlined_call_operand.vmem [shape: f32[2,2,16], index: 0, kind: input, shape index: {}]   ;;  %s259_s1 = inlined_call_operand.vmem [shape: f32[2,2,16], index: 1, kind: input, shape index: {}]   ;;  %s260_s2 = inlined_call_operand.vmem [shape: f32[2,16,16], index: 2, kind: input, shape index: {}]   ;;  %s261_s3 = inlined_call_operand.vmem [shape: f32[2,16,16], index: 3, kind: input, shape index: {}]   ;;  %s262_s4 = inlined_call_operand.vmem [shape: f32[2,2,16,16], index: 4, kind: output, shape index: {0}]   ;;  %s263_s5 = inlined_call_operand.vmem [shape: f32[2,2,16,16], index: 5, kind: output, shape index: {1}]  }
   0x1   :  { %v19_v0 = vld [vmem:[%s258_s0] sm:$0x3]  ;;  %v32_v6 = vld [vmem:[%s260_s2 + $0x8] sm:$0xff]  ;;  %v20_v10 = vld [vmem:[%s258_s0 + $0x2] sm:$0x3] }
   0x2   :  { %v25_v1 = vld [vmem:[%s259_s1] sm:$0x3]  ;;  %v39_v4 = vperm.slane %v19_v0, 0  ;;  %v36_v7 = vld [vmem:[%s261_s3 + $0x8] sm:$0xff]  ;;  %v23_v8 = vrot.slane %v19_v0, 1  ;;  %v33_v16 = vld [vmem:[%s260_s2 + $0x10] sm:$0xff] }
   0x3   :  { %v31_v2 = vld [vmem:[%s260_s2] sm:$0xff]  ;;  %v55_v5 = vperm.slane %v25_v1, 0  ;;  %v29_v9 = vrot.slane %v25_v1, 1  ;;  %v37_v17 = vld [vmem:[%s261_s3 + $0x10] sm:$0xff]  ;;  %v41_v20 = vperm.slane %v20_v10, 0  ;;  %v34_v22 = vld [vmem:[%s260_s2 + $0x18] sm:$0xff] }
   0x4   :  { %v35_v3 = vld [vmem:[%s261_s3] sm:$0xff]  ;;  %v47_v12 = vmul.f32 %v39_v4, %v31_v2  ;;  %v48_v14 = vmul.f32 %v39_v4, %v32_v6  ;;  %v40_v18 = vperm.slane %v23_v8, 0  ;;  %v38_v23 = vld [vmem:[%s261_s3 + $0x18] sm:$0xff]  ;;  %v24_v26 = vrot.slane %v20_v10, 1 }
   0x5   :  { %v26_v11 = vld [vmem:[%s259_s1 + $0x2] sm:$0x3]  ;;  %v63_v13 = vmul.f32 %v55_v5, %v35_v3  ;;  %v64_v15 = vmul.f32 %v55_v5, %v36_v7  ;;  %v56_v19 = vperm.slane %v29_v9, 0  ;;  %v51_v32 = vmul.f32 %v41_v20, %v33_v16 }
   0x6   :  { %v57_v21 = vperm.slane %v26_v11, 0  ;;  %v30_v27 = vrot.slane %v26_v11, 1  ;;  %v49_v28 = vmul.f32 %v40_v18, %v31_v2  ;;  %v50_v30 = vmul.f32 %v40_v18, %v32_v6 }
   0x7   :  { %v71_v24 = vsub.f32 %v47_v12, %v63_v13  ;;  %v72_v25 = vsub.f32 %v48_v14, %v64_v15  ;;  %v65_v29 = vmul.f32 %v56_v19, %v35_v3  ;;  %v66_v31 = vmul.f32 %v56_v19, %v36_v7 }
   0x8   :  { %v67_v33 = vmul.f32 %v57_v21, %v37_v17  ;;  %v52_v34 = vmul.f32 %v41_v20, %v34_v22  ;;  %v68_v35 = vmul.f32 %v57_v21, %v38_v23  ;;  %v42_v38 = vperm.slane %v24_v26, 0 }
   0x9   :  { %80 = vst.msk [vmem:[%s262_s4] sm:$0xff] %vm79_vm0, %v71_v24  ;;  %v73_v36 = vsub.f32 %v49_v28, %v65_v29  ;;  %v74_v37 = vsub.f32 %v50_v30, %v66_v31  ;;  %v58_v39 = vperm.slane %v30_v27, 0  ;;  %v88_v42 = vmul.f32 %v39_v4, %v35_v3 }
   0xa   :  { %81 = vst.msk [vmem:[%s262_s4 + $0x8] sm:$0xff] %vm79_vm0, %v72_v25  ;;  %v75_v40 = vsub.f32 %v51_v32, %v67_v33  ;;  %v76_v41 = vsub.f32 %v52_v34, %v68_v35  ;;  %v96_v43 = vmul.f32 %v55_v5, %v31_v2  ;;  %v53_v44 = vmul.f32 %v42_v38, %v33_v16 }
   0xb   :  { %82 = vst.msk [vmem:[%s262_s4 + $0x10] sm:$0xff] %vm79_vm0, %v73_v36  ;;  %v69_v45 = vmul.f32 %v58_v39, %v37_v17  ;;  %v54_v46 = vmul.f32 %v42_v38, %v34_v22  ;;  %v70_v47 = vmul.f32 %v58_v39, %v38_v23  ;;  %v89_v49 = vmul.f32 %v39_v4, %v36_v7 }
   0xc   :  { %83 = vst.msk [vmem:[%s262_s4 + $0x18] sm:$0xff] %vm79_vm0, %v74_v37  ;;  %v104_v48 = vadd.f32 %v96_v43, %v88_v42  ;;  %v97_v50 = vmul.f32 %v55_v5, %v32_v6  ;;  %v90_v51 = vmul.f32 %v40_v18, %v35_v3  ;;  %v98_v54 = vmul.f32 %v56_v19, %v31_v2 }
   0xd   :  { %84 = vst.msk [vmem:[%s262_s4 + $0x20] sm:$0xff] %vm79_vm0, %v75_v40  ;;  %v77_v52 = vsub.f32 %v53_v44, %v69_v45  ;;  %v78_v53 = vsub.f32 %v54_v46, %v70_v47  ;;  %v91_v55 = vmul.f32 %v40_v18, %v36_v7  ;;  %v99_v57 = vmul.f32 %v56_v19, %v32_v6 }
   0xe   :  { %85 = vst.msk [vmem:[%s262_s4 + $0x28] sm:$0xff] %vm79_vm0, %v76_v41  ;;  %v105_v56 = vadd.f32 %v97_v50, %v89_v49  ;;  %v92_v58 = vmul.f32 %v41_v20, %v37_v17  ;;  %v100_v59 = vmul.f32 %v57_v21, %v33_v16  ;;  %v106_v60 = vadd.f32 %v98_v54, %v90_v51 }
   0xf   :  { %86 = vst.msk [vmem:[%s262_s4 + $0x30] sm:$0xff] %vm79_vm0, %v77_v52  ;;  %v93_v61 = vmul.f32 %v41_v20, %v38_v23  ;;  %v101_v62 = vmul.f32 %v57_v21, %v34_v22  ;;  %v94_v63 = vmul.f32 %v42_v38, %v37_v17  ;;  %v107_v0 = vadd.f32 %v99_v57, %v91_v55 }
  0x10   :  { %87 = vst.msk [vmem:[%s262_s4 + $0x38] sm:$0xff] %vm79_vm0, %v78_v53  ;;  %v102_v1 = vmul.f32 %v58_v39, %v33_v16  ;;  %v95_v2 = vmul.f32 %v42_v38, %v38_v23  ;;  %v108_v3 = vadd.f32 %v100_v59, %v92_v58  ;;  %v103_v4 = vmul.f32 %v58_v39, %v34_v22 }
  0x11   :  { %112 = vst.msk [vmem:[%s263_s5] sm:$0xff] %vm79_vm0, %v104_v48  ;;  %v109_v5 = vadd.f32 %v101_v62, %v93_v61 }
  0x12   :  { %113 = vst.msk [vmem:[%s263_s5 + $0x8] sm:$0xff] %vm79_vm0, %v105_v56  ;;  %v110_v6 = vadd.f32 %v102_v1, %v94_v63  ;;  %v111_v7 = vadd.f32 %v103_v4, %v95_v2 }
  0x13   :  { %114 = vst.msk [vmem:[%s263_s5 + $0x10] sm:$0xff] %vm79_vm0, %v106_v60 }
  0x14   :  { %115 = vst.msk [vmem:[%s263_s5 + $0x18] sm:$0xff] %vm79_vm0, %v107_v0 }
  0x15   :  { %116 = vst.msk [vmem:[%s263_s5 + $0x20] sm:$0xff] %vm79_vm0, %v108_v3 }
  0x16   :  { %117 = vst.msk [vmem:[%s263_s5 + $0x28] sm:$0xff] %vm79_vm0, %v109_v5 }
  0x17   :  { %118 = vst.msk [vmem:[%s263_s5 + $0x30] sm:$0xff] %vm79_vm0, %v110_v6 }
  0x18   :  { %119 = vst.msk [vmem:[%s263_s5 + $0x38] sm:$0xff] %vm79_vm0, %v111_v7 }

// kernel: reverse.12
= control target key start
LH: loop header
LB: loop body
LE: loop exit
PB: predicated region body
PF: predicated region fallthrough
CT: control target
= control target key end

     0   :  { %s344_s0 = inlined_call_operand.vmem [shape: f32[2,16,16,7], index: 0, kind: input, shape index: {}]   ;;  %s345_s1 = inlined_call_operand.vmem [shape: f32[2,16,16,7], index: 1, kind: output, shape index: {}]  }
   0x1   :  { %v112_v0 = vld [vmem:[%s344_s0 + $0x60] sm:$0xff]  ;;  %v113_v1 = vld [vmem:[%s344_s0 + $0xd0] sm:$0xff]  ;;  %v138_v14 = vld [vmem:[%s344_s0 + $0x68] sm:$0xff] }
   0x2   :  { %v115_v2 = vld [vmem:[%s344_s0 + $0x50] sm:$0xff]  ;;  %4 = vst [vmem:[%s345_s1] sm:$0xff] %v112_v0  ;;  %v117_v3 = vld [vmem:[%s344_s0 + $0xc0] sm:$0xff]  ;;  %v140_v15 = vld [vmem:[%s344_s0 + $0xd8] sm:$0xff] }
   0x3   :  { %114 = vst [vmem:[%s345_s1 + $0x70] sm:$0xff] %v113_v1  ;;  %v119_v4 = vld [vmem:[%s344_s0 + $0x40] sm:$0xff]  ;;  %v121_v5 = vld [vmem:[%s344_s0 + $0xb0] sm:$0xff]  ;;  %v142_v16 = vld [vmem:[%s344_s0 + $0x58] sm:$0xff] }
   0x4   :  { %116 = vst [vmem:[%s345_s1 + $0x10] sm:$0xff] %v115_v2  ;;  %v123_v6 = vld [vmem:[%s344_s0 + $0x30] sm:$0xff]  ;;  %v125_v7 = vld [vmem:[%s344_s0 + $0xa0] sm:$0xff]  ;;  %v144_v17 = vld [vmem:[%s344_s0 + $0xc8] sm:$0xff] }
   0x5   :  { %118 = vst [vmem:[%s345_s1 + $0x80] sm:$0xff] %v117_v3  ;;  %v127_v8 = vld [vmem:[%s344_s0 + $0x20] sm:$0xff]  ;;  %v129_v9 = vld [vmem:[%s344_s0 + $0x90] sm:$0xff]  ;;  %v146_v18 = vld [vmem:[%s344_s0 + $0x48] sm:$0xff] }
   0x6   :  { %120 = vst [vmem:[%s345_s1 + $0x20] sm:$0xff] %v119_v4  ;;  %v131_v10 = vld [vmem:[%s344_s0 + $0x10] sm:$0xff]  ;;  %v133_v11 = vld [vmem:[%s344_s0 + $0x80] sm:$0xff]  ;;  %v148_v19 = vld [vmem:[%s344_s0 + $0xb8] sm:$0xff] }
   0x7   :  { %122 = vst [vmem:[%s345_s1 + $0x90] sm:$0xff] %v121_v5  ;;  %v49_v12 = vld [vmem:[%s344_s0] sm:$0xff]  ;;  %v136_v13 = vld [vmem:[%s344_s0 + $0x70] sm:$0xff]  ;;  %v150_v20 = vld [vmem:[%s344_s0 + $0x38] sm:$0xff] }
   0x8   :  { %124 = vst [vmem:[%s345_s1 + $0x30] sm:$0xff] %v123_v6  ;;  %v152_v21 = vld [vmem:[%s344_s0 + $0xa8] sm:$0xff]  ;;  %v156_v23 = vld [vmem:[%s344_s0 + $0x98] sm:$0xff] }
   0x9   :  { %126 = vst [vmem:[%s345_s1 + $0xa0] sm:$0xff] %v125_v7  ;;  %v154_v22 = vld [vmem:[%s344_s0 + $0x28] sm:$0xff]  ;;  %v158_v24 = vld [vmem:[%s344_s0 + $0x18] sm:$0xff] }
   0xa   :  { %128 = vst [vmem:[%s345_s1 + $0x40] sm:$0xff] %v127_v8  ;;  %v160_v25 = vld [vmem:[%s344_s0 + $0x88] sm:$0xff]  ;;  %v164_v27 = vld [vmem:[%s344_s0 + $0x78] sm:$0xff] }
   0xb   :  { %130 = vst [vmem:[%s345_s1 + $0xb0] sm:$0xff] %v129_v9  ;;  %v162_v26 = vld [vmem:[%s344_s0 + $0x8] sm:$0xff] }
   0xc   :  { %132 = vst [vmem:[%s345_s1 + $0x50] sm:$0xff] %v131_v10 }
   0xd   :  { %134 = vst [vmem:[%s345_s1 + $0xc0] sm:$0xff] %v133_v11 }
   0xe   :  { %135 = vst [vmem:[%s345_s1 + $0x60] sm:$0xff] %v49_v12 }
   0xf   :  { %137 = vst [vmem:[%s345_s1 + $0xd0] sm:$0xff] %v136_v13 }
  0x10   :  { %139 = vst [vmem:[%s345_s1 + $0x8] sm:$0xff] %v138_v14 }
  0x11   :  { %141 = vst [vmem:[%s345_s1 + $0x78] sm:$0xff] %v140_v15 }
  0x12   :  { %143 = vst [vmem:[%s345_s1 + $0x18] sm:$0xff] %v142_v16 }
  0x13   :  { %145 = vst [vmem:[%s345_s1 + $0x88] sm:$0xff] %v144_v17 }
  0x14   :  { %147 = vst [vmem:[%s345_s1 + $0x28] sm:$0xff] %v146_v18 }
  0x15   :  { %149 = vst [vmem:[%s345_s1 + $0x98] sm:$0xff] %v148_v19 }
  0x16   :  { %151 = vst [vmem:[%s345_s1 + $0x38] sm:$0xff] %v150_v20 }
  0x17   :  { %153 = vst [vmem:[%s345_s1 + $0xa8] sm:$0xff] %v152_v21 }
  0x18   :  { %155 = vst [vmem:[%s345_s1 + $0x48] sm:$0xff] %v154_v22 }
  0x19   :  { %157 = vst [vmem:[%s345_s1 + $0xb8] sm:$0xff] %v156_v23 }
  0x1a   :  { %159 = vst [vmem:[%s345_s1 + $0x58] sm:$0xff] %v158_v24 }
  0x1b   :  { %161 = vst [vmem:[%s345_s1 + $0xc8] sm:$0xff] %v160_v25 }
  0x1c   :  { %163 = vst [vmem:[%s345_s1 + $0x68] sm:$0xff] %v162_v26 }
  0x1d   :  { %165 = vst [vmem:[%s345_s1 + $0xd8] sm:$0xff] %v164_v27 }

// kernel: generator_forward.30
= control target key start
LH: loop header
LB: loop body
LE: loop exit
PB: predicated region body
PF: predicated region fallthrough
CT: control target
= control target key end

     0   :  { %s741_s18 = smov 0   ;;  %s869_s0 = inlined_call_operand.vmem [shape: f32[2,8,290], index: 0, kind: input, shape index: {}]   ;;  %s870_s1 = inlined_call_operand.vmem [shape: f32[16,72], index: 1, kind: input, shape index: {}]   ;;  %s871_s2 = inlined_call_operand.vmem [shape: f32[16,1], index: 2, kind: input, shape index: {}]   ;;  %s872_s3 = inlined_call_operand.vmem [shape: f32[2,16,256], index: 3, kind: output, shape index: {0}]   ;;  %s873_s4 = inlined_call_operand.vmem [shape: f32[2,16,1], index: 4, kind: output, shape index: {1}]   ;;  %s874_s5 = inlined_call_operand.vmem [shape: f32[2,16,1], index: 5, kind: output, shape index: {2}]  }
   0x1 LB: > { %s608_s19 = sadd.s32 4294967295, %s700_s18   ;;  %p612_p0 = scmp.ge.s32.totalorder %s700_s18, 1  ;;  %s700_s18 = sphi %s741_s18, %s16_s18  }
   0x2   : > { %p192_p1 = scmp.lt.s32.totalorder %s700_s18, 3 }
   0x4   : > { %p193_p2 = pnand %p612_p0, %p192_p1 }
   0x5   : > { %p230_p3 = scmp.lt.s32.totalorder (!%p193_p2), %s608_s19, 1  ;;  %s702_s24 = smov (!%p193_p2), 94  }
   0x6   : > { %196 = sbr.rel (%p193_p2) target bundleno = 442 (0x1ba), region = 32  ;;  %s703_s25 = smov (!%p193_p2), 95  }
   0x7   : > { %s704_s26 = smov (!%p193_p2), 96   ;;  %s705_s27 = smov (!%p193_p2), 110  }
   0x8   : > { %s706_s28 = smov (!%p193_p2), 111   ;;  %s707_s29 = smov (!%p193_p2), 112  }
   0x9   : > { %s708_s30 = smov (!%p193_p2), 126   ;;  %s709_s6 = smov (!%p193_p2), 127  }
   0xb   : > { %s884_s19 = smov (!%p230_p3, %s608_s19), 1  ;;  %v253_v5 = vlaneseq  ;;  %vm355_vm0 = vcmask 769024   ;;  %vm390_vm3 = vcmask 777216   ;;  %vm342_vm4 = vcmask 785408   ;;  %v397_v38 = vld [vmem:[%s871_s2] sm:$0xff]  ;;  %v398_v39 = vld [vmem:[%s871_s2 + $0x8] sm:$0xff] }
   0xc   : > { %s659_s20 = smul.u32 24, %s884_s19  ;;  %vm329_vm7 = vcmask 900096   ;;  %vm379_vm8 = vcmask 908288   ;;  %v710_v41 = vmov 0   ;;  %vm316_vm9 = vcmask 916480   ;;  %v395_v59 = vld [vmem:[%s870_s1] sm:$0xff] }
   0xd   : > { %v254_v6 = vand.u32 127, %v253_v5  ;;  %692 = vset.pattern.permute.xlu0 %v710_v41  ;;  %693 = vset.pattern.permute.xlu1 %v710_v41  ;;  %vm303_vm10 = vcmask 1031168   ;;  %vm368_vm11 = vcmask 1039360   ;;  %vm409_vm12 = vcmask 588800   ;;  %v396_v60 = vld [vmem:[%s870_s1 + $0x8] sm:$0xff]  ;;  %s638_s15 = sshll.u32 %s884_s19, 5 }
   0xe   : > { %s234_s23 = scalar_lea.vmem %s869_s0, %s659_s20  ;;  %s239_s20 = scalar_lea.vmem %s872_s3, %s638_s15  ;;  %vm472_vm13 = vcmask 7168  }
   0xf   : > { %v252_v0 = vld [vmem:[%s234_s23 + $0x10] sm:$0xff]  ;;  %v755_v1 = vld [vmem:[%s234_s23] sm:$0xff]  ;;  %v758_v2 = vld [vmem:[%s234_s23 + $0x8] sm:$0xff]  ;;  %v255_v10 = vadd.s32 128, %v254_v6  ;;  %v260_v11 = vand.u32 15, %v254_v6  ;;  %s639_s21 = sshll.u32 %s884_s19, 4 }
  0x10   : > { %353 = vrot.lane.b32.xlu1 %v252_v0, %s702_s24  ;;  %349 = vrot.lane.b32.xlu0 %v755_v1, %s702_s24  ;;  %v677_v3 = vpack.i.bf16 %v758_v2, %v755_v1 }
  0x11   : > { %388 = vrot.lane.b32.xlu2 %v252_v0, %s703_s25  ;;  %v267_v12 = vand.u32 15, %v255_v10  ;;  %vm771_vm1 = vcmp.ne.s32.totalorder %v260_v11, 15  ;;  %vm787_vm5 = vcmp.ne.s32.totalorder %v260_v11, 0 }
  0x13   : > { %vm775_vm2 = vcmp.ne.s32.totalorder %v267_v12, 15  ;;  %vm791_vm6 = vcmp.ne.s32.totalorder %v267_v12, 0 }
  0x18   : > { %678 = vrot.lane.b32.xlu1 %v677_v3, %s703_s25  ;;  %351 = vrot.lane.b32.xlu0 %v758_v2, %s702_s24  ;;  %s244_s24 = scalar_lea.vmem %s873_s4, %s639_s21 }
  0x19   : > { %336 = vrot.lane.b32.xlu2 %v755_v1, %s704_s26 }
  0x20   : > { %340 = vrot.lane.b32.xlu1 %v252_v0, %s704_s26  ;;  %338 = vrot.lane.b32.xlu0 %v758_v2, %s704_s26 }
  0x21   : > { %323 = vrot.lane.b32.xlu2 %v755_v1, %s705_s27 }
  0x28   : > { %327 = vrot.lane.b32.xlu1 %v252_v0, %s705_s27  ;;  %325 = vrot.lane.b32.xlu0 %v758_v2, %s705_s27  ;;  %s249_s27 = scalar_lea.vmem %s874_s5, %s639_s21 }
  0x29   : > { %683 = vrot.lane.b32.xlu2 %v677_v3, %s706_s28 }
  0x30   : > { %310 = vrot.lane.b32.xlu1 %v755_v1, %s707_s29  ;;  %377 = vrot.lane.b32.xlu0 %v252_v0, %s706_s28 }
  0x31   : > { %312 = vrot.lane.b32.xlu2 %v758_v2, %s707_s29 }
  0x38   : > { %297 = vrot.lane.b32.xlu1 %v755_v1, %s708_s30  ;;  %314 = vrot.lane.b32.xlu0 %v252_v0, %s707_s29 }
  0x39   : > { %299 = vrot.lane.b32.xlu2 %v758_v2, %s708_s30 }
  0x40   : > { %688 = vrot.lane.b32.xlu1 %v677_v3, %s709_s6  ;;  %301 = vrot.lane.b32.xlu0 %v252_v0, %s708_s30 }
  0x41   : > { %366 = vrot.lane.b32.xlu2 %v252_v0, %s709_s6 }
  0x48   : > { %401 = vperm.xlu0 %692, %v397_v38   ;;  %406 = vperm.xlu1 %693, %v398_v39  }
  0x6b   : > { %v389_v4 = vpop.permute.xlu2 %388 }
  0x73   : > { %v337_v7 = vpop.permute.xlu2 %336 }
  0x7b   : > { %v324_v14 = vpop.permute.xlu2 %323 }
  0x82   : > { %v354_v8 = vpop.permute.xlu1 %353  ;;  %v350_v9 = vpop.permute.xlu0 %349 }
  0x83   : > { %v684_v30 = vpop.permute.xlu2 %683 }
  0x84   : > { %v686_v31 = vunpack.i.h.bf16 %v684_v30  ;;  %v685_v32 = vunpack.i.l.bf16 %v684_v30 }
  0x86   : > { %v380_v37 = vsel %vm379_vm8, %v685_v32, %v686_v31 }
  0x8a   : > { %v679_v15 = vpop.permute.xlu1 %678  ;;  %v352_v16 = vpop.permute.xlu0 %351 }
  0x8b   : > { %v681_v18 = vunpack.i.h.bf16 %v679_v15  ;;  %v680_v19 = vunpack.i.l.bf16 %v679_v15  ;;  %v356_v20 = vsel %vm355_vm0, %v350_v9, %v352_v16  ;;  %v357_v21 = vsel %vm355_vm0, %v352_v16, %v354_v8  ;;  %v313_v40 = vpop.permute.xlu2 %312 }
  0x8c   : > { %620 = vmatpush.msk.msra.mxu0 %vm771_vm1, %v356_v20  ;;  %641 = vmatpush.msk.msra.mxu2 %vm771_vm1, %v356_v20 }
  0x8d   : > { %628 = vmatpush.msk.msra.mxu1 %vm775_vm2, %v357_v21  ;;  %650 = vmatpush.msk.msra.mxu3 %vm775_vm2, %v357_v21  ;;  %v391_v22 = vsel %vm390_vm3, %v680_v19, %v681_v18  ;;  %v392_v23 = vsel %vm390_vm3, %v681_v18, %v389_v4 }
  0x8e   : > { %424 = vmatpush.msra.mxu0 %v391_v22  ;;  %642 = vmatpush.msra.mxu2 %v391_v22 }
  0x8f   : > { %447 = vmatpush.msra.mxu1 %v392_v23  ;;  %651 = vmatpush.msra.mxu3 %v392_v23 }
  0x92   : > { %v341_v25 = vpop.permute.xlu1 %340  ;;  %v339_v26 = vpop.permute.xlu0 %338 }
  0x93   : > { %v343_v28 = vsel %vm342_vm4, %v337_v7, %v339_v26  ;;  %v344_v29 = vsel %vm342_vm4, %v339_v26, %v341_v25  ;;  %v300_v46 = vpop.permute.xlu2 %299 }
  0x94   : > { %621 = vmatpush.msk.msra.mxu0 %vm787_vm5, %v343_v28  ;;  %643 = vmatpush.msk.msra.mxu2 %vm787_vm5, %v343_v28 }
  0x95   : > { %629 = vmatpush.msk.msra.mxu1 %vm791_vm6, %v344_v29  ;;  %652 = vmatpush.msk.msra.mxu3 %vm791_vm6, %v344_v29 }
  0x9a   : > { %v328_v33 = vpop.permute.xlu1 %327  ;;  %v326_v34 = vpop.permute.xlu0 %325 }
  0x9b   : > { %v330_v35 = vsel %vm329_vm7, %v324_v14, %v326_v34  ;;  %v331_v36 = vsel %vm329_vm7, %v326_v34, %v328_v33  ;;  %v367_v51 = vpop.permute.xlu2 %366 }
  0x9c   : > { %622 = vmatpush.msk.msra.mxu0 %vm771_vm1, %v330_v35  ;;  %644 = vmatpush.msk.msra.mxu2 %vm771_vm1, %v330_v35 }
  0x9d   : > { %630 = vmatpush.msk.msra.mxu1 %vm775_vm2, %v331_v36  ;;  %653 = vmatpush.msk.msra.mxu3 %vm775_vm2, %v331_v36 }
  0x9e   : > { %427 = vmatpush.msra.mxu0 %v380_v37  ;;  %645 = vmatpush.msra.mxu2 %v380_v37 }
  0xa2   : > { %v311_v42 = vpop.permute.xlu1 %310  ;;  %v378_v43 = vpop.permute.xlu0 %377 }
  0xa3   : > { %v317_v44 = vsel %vm316_vm9, %v311_v42, %v313_v40  ;;  %v381_v45 = vsel %vm379_vm8, %v686_v31, %v378_v43 }
  0xa4   : > { %623 = vmatpush.msk.msra.mxu0 %vm787_vm5, %v317_v44  ;;  %646 = vmatpush.msk.msra.mxu2 %vm787_vm5, %v317_v44 }
  0xa5   : > { %450 = vmatpush.msra.mxu1 %v381_v45  ;;  %654 = vmatpush.msra.mxu3 %v381_v45 }
  0xaa   : > { %v298_v47 = vpop.permute.xlu1 %297  ;;  %v315_v48 = vpop.permute.xlu0 %314 }
  0xab   : > { %v304_v49 = vsel %vm303_vm10, %v298_v47, %v300_v46  ;;  %v318_v50 = vsel %vm316_vm9, %v313_v40, %v315_v48 }
  0xac   : > { %624 = vmatpush.msk.msra.mxu0 %vm771_vm1, %v304_v49  ;;  %647 = vmatpush.msk.msra.mxu2 %vm771_vm1, %v304_v49 }
  0xad   : > { %631 = vmatpush.msk.msra.mxu1 %vm791_vm6, %v318_v50  ;;  %655 = vmatpush.msk.msra.mxu3 %vm791_vm6, %v318_v50 }
  0xb2   : > { %v689_v52 = vpop.permute.xlu1 %688  ;;  %v302_v53 = vpop.permute.xlu0 %301 }
  0xb3   : > { %v691_v54 = vunpack.i.h.bf16 %v689_v52  ;;  %v690_v55 = vunpack.i.l.bf16 %v689_v52  ;;  %v305_v56 = vsel %vm303_vm10, %v300_v46, %v302_v53 }
  0xb4   : > { %632 = vmatpush.msk.msra.mxu1 %vm775_vm2, %v305_v56  ;;  %656 = vmatpush.msk.msra.mxu3 %vm775_vm2, %v305_v56 }
  0xb5   : > { %v369_v57 = vsel %vm368_vm11, %v690_v55, %v691_v54  ;;  %v370_v58 = vsel %vm368_vm11, %v691_v54, %v367_v51 }
  0xb6   : > { %430 = vmatpush.msra.mxu0 %v369_v57  ;;  %648 = vmatpush.msra.mxu2 %v369_v57 }
  0xb7   : > { %453 = vmatpush.msra.mxu1 %v370_v58  ;;  %657 = vmatpush.msra.mxu3 %v370_v58 }
  0xb8   : > { %625 = vmatpush.msk.msra.mxu0 %vm787_vm5, %v755_v1  ;;  %649 = vmatpush.msk.msra.mxu2 %vm787_vm5, %v755_v1 }
  0xb9   : > { %633 = vmatpush.msk.msra.mxu1 %vm791_vm6, %v758_v2  ;;  %658 = vmatpush.msk.msra.mxu3 %vm791_vm6, %v758_v2 }
  0xba   : > { %626 = vmatmul.msk.f32.vlgmr.msra.gmra.mxu0 %vm409_vm12, %v395_v59  ;;  %627 = vmatmul.msk.f32.vlgmr.msra.gmra.mxu2 %vm409_vm12, %v396_v60  ;;  %v402_v61 = vpop.permute.xlu0 %401  ;;  %v407_v5 = vpop.permute.xlu1 %406 }
  0xbb   : > { %634 = vmatmul.msk.f32.vlgmr.msra.gmra.mxu1 %vm409_vm12, %v395_v59  ;;  %635 = vmatmul.msk.f32.vlgmr.msra.gmra.mxu3 %vm409_vm12, %v396_v60 }
 0x137   : > { %v433_v62 = vpop.f32.mrf.mxu0 }
 0x138   : > { %v456_v63 = vpop.f32.mrf.mxu1  ;;  %v434_v0 = vadd.f32 %v433_v62, %v402_v61 }
 0x139   : > { %v457_v1 = vadd.f32 %v456_v63, %v402_v61 }
 0x13a   : > { %462 = vst [vmem:[%s239_s20] sm:$0xff] %v434_v0  ;;  %v475_v3 = vmul.f32 %v434_v0, %v434_v0 }
 0x13b   : > { %463 = vst [vmem:[%s239_s20 + $0x8] sm:$0xff] %v457_v1  ;;  %v466_v4 = vadd.f32 %v457_v1, %v434_v0  ;;  %v476_v2 = vmul.f32 %v457_v1, %v457_v1 }
 0x13d   : > { %467 = vadd.xlane.f32.xlu2 %v466_v4  ;;  %v436_v6 = vpop.f32.mrf.mxu2  ;;  %v479_v7 = vadd.f32 %v476_v2, %v475_v3 }
 0x13e   : > { %v437_v8 = vadd.f32 %v436_v6, %v407_v5  ;;  %v459_v9 = vpop.f32.mrf.mxu3 }
 0x13f   : > { %v460_v10 = vadd.f32 %v459_v9, %v407_v5  ;;  %480 = vadd.xlane.f32.xlu0 %v479_v7 }
 0x140   : > { %464 = vst [vmem:[%s239_s20 + $0x10] sm:$0xff] %v437_v8  ;;  %v477_v11 = vmul.f32 %v437_v8, %v437_v8 }
 0x141   : > { %465 = vst [vmem:[%s239_s20 + $0x18] sm:$0xff] %v460_v10  ;;  %v469_v12 = vadd.f32 %v460_v10, %v437_v8  ;;  %v478_v13 = vmul.f32 %v460_v10, %v460_v10 }
 0x143   : > { %470 = vadd.xlane.f32.xlu1 %v469_v12  ;;  %v482_v14 = vadd.f32 %v478_v13, %v477_v11 }
 0x145   : > { %483 = vadd.xlane.f32.xlu2 %v482_v14 }
 0x1b0   : > { %v468_v15 = vpop.xlane.xlu2 %467 }
 0x1b1   : > { %473 = vst.msk [vmem:[%s244_s24] sm:$0xff] %vm472_vm13, %v468_v15 }
 0x1b2   : > { %v481_v16 = vpop.xlane.xlu0 %480 }
 0x1b3   : > { %485 = vst.msk [vmem:[%s249_s27] sm:$0xff] %vm472_vm13, %v481_v16 }
 0x1b6   : > { %v471_v17 = vpop.xlane.xlu1 %470 }
 0x1b7   : > { %474 = vst.msk [vmem:[%s244_s24 + $0x8] sm:$0xff] %vm472_vm13, %v471_v17 }
 0x1b8   : > { %v484_v18 = vpop.xlane.xlu2 %483 }
 0x1b9   : > { %486 = vst.msk [vmem:[%s249_s27 + $0x8] sm:$0xff] %vm472_vm13, %v484_v18 }
 0x1ba PF: > { %s16_s18 = sadd.s32 1, %s700_s18  }
 0x1bb   : > { %p13_p4 = scmp.ge.s32.totalorder %s16_s18, 4  }
 0x1bd   :  { %15 = sbr.rel (!%p13_p4) target bundleno = 1 (0x1), region = 86 }

// kernel: generator_forward.31
= control target key start
LH: loop header
LB: loop body
LE: loop exit
PB: predicated region body
PF: predicated region fallthrough
CT: control target
= control target key end

     0   :  { %s323_s12 = smov 0   ;;  %s352_s0 = inlined_call_operand.vmem [shape: f32[2,16,256], index: 0, kind: input, shape index: {}]   ;;  %s353_s1 = inlined_call_operand.vmem [shape: f32[16,1], index: 1, kind: input, shape index: {}]   ;;  %s354_s2 = inlined_call_operand.vmem [shape: f32[16,1], index: 2, kind: input, shape index: {}]   ;;  %s355_s3 = inlined_call_operand.vmem [shape: f32[2,16,256], index: 3, kind: output, shape index: {}]  }
   0x1 LB: > { %s270_s13 = sadd.s32 4294967295, %s300_s12   ;;  %p274_p0 = scmp.ge.s32.totalorder %s300_s12, 1  ;;  %s300_s12 = sphi %s323_s12, %s13_s12  }
   0x2   : > { %p137_p1 = scmp.lt.s32.totalorder %s300_s12, 3 }
   0x4   : > { %p138_p2 = pnand %p274_p0, %p137_p1 }
   0x5   : > { %p161_p3 = scmp.lt.s32.totalorder (!%p138_p2), %s270_s13, 1 }
   0x6   : > { %141 = sbr.rel (%p138_p2) target bundleno = 144 (0x90), region = 32 }
   0xb   : > { %v191_v0 = vld [vmem:[%s354_s2] sm:$0xff]  ;;  %v302_v2 = vmov 0   ;;  %v192_v3 = vld [vmem:[%s354_s2 + $0x8] sm:$0xff]  ;;  %s357_s13 = smov (!%p161_p3, %s270_s13), 1 }
   0xc   : > { %v175_v1 = vld [vmem:[%s353_s1] sm:$0xff]  ;;  %293 = vset.pattern.permute.xlu1 %v302_v2  ;;  %292 = vset.pattern.permute.xlu0 %v302_v2  ;;  %v176_v4 = vld [vmem:[%s353_s1 + $0x8] sm:$0xff]  ;;  %s281_s22 = sshll.u32 %s357_s13, 5 }
   0xd   : > { %195 = vperm.xlu1 %293, %v191_v0   ;;  %179 = vperm.xlu0 %292, %v175_v1   ;;  %s165_s25 = scalar_lea.vmem %s352_s0, %s281_s22  ;;  %s170_s28 = scalar_lea.vmem %s355_s3, %s281_s22 }
   0xe   : > { %v171_v5 = vld [vmem:[%s165_s25] sm:$0xff]  ;;  %v172_v6 = vld [vmem:[%s165_s25 + $0x8] sm:$0xff]  ;;  %v173_v15 = vld [vmem:[%s165_s25 + $0x10] sm:$0xff] }
   0xf   : > { %v174_v16 = vld [vmem:[%s165_s25 + $0x18] sm:$0xff] }
  0x15   : > { %200 = vperm.xlu1 %293, %v192_v3   ;;  %184 = vperm.xlu0 %292, %v176_v4  }
  0x7f   : > { %v196_v7 = vpop.permute.xlu1 %195  ;;  %v180_v8 = vpop.permute.xlu0 %179 }
  0x80   : > { %v187_v9 = vmul.f32 %v180_v8, %v171_v5  ;;  %v188_v10 = vmul.f32 %v180_v8, %v172_v6 }
  0x82   : > { %v203_v11 = vadd.f32 %v196_v7, %v187_v9  ;;  %v204_v12 = vadd.f32 %v196_v7, %v188_v10 }
  0x84   : > { %v207_v13 = vmax.f32 %v203_v11, 0.0  ;;  %v208_v14 = vmax.f32 %v204_v12, 0.0 }
  0x86   : > { %211 = vst [vmem:[%s170_s28] sm:$0xff] %v207_v13 }
  0x87   : > { %212 = vst [vmem:[%s170_s28 + $0x8] sm:$0xff] %v208_v14  ;;  %v185_v17 = vpop.permute.xlu0 %184  ;;  %v201_v20 = vpop.permute.xlu1 %200 }
  0x88   : > { %v189_v18 = vmul.f32 %v185_v17, %v173_v15  ;;  %v190_v19 = vmul.f32 %v185_v17, %v174_v16 }
  0x8a   : > { %v205_v21 = vadd.f32 %v201_v20, %v189_v18  ;;  %v206_v22 = vadd.f32 %v201_v20, %v190_v19 }
  0x8c   : > { %v209_v23 = vmax.f32 %v205_v21, 0.0  ;;  %v210_v24 = vmax.f32 %v206_v22, 0.0 }
  0x8e   : > { %213 = vst [vmem:[%s170_s28 + $0x10] sm:$0xff] %v209_v23 }
  0x8f   : > { %214 = vst [vmem:[%s170_s28 + $0x18] sm:$0xff] %v210_v24 }
  0x90 PF: > { %s13_s12 = sadd.s32 1, %s300_s12  }
  0x91   : > { %p10_p4 = scmp.ge.s32.totalorder %s13_s12, 4  }
  0x93   :  { %12 = sbr.rel (!%p10_p4) target bundleno = 1 (0x1), region = 62 }

// kernel: generator_forward.34
= control target key start
LH: loop header
LB: loop body
LE: loop exit
PB: predicated region body
PF: predicated region fallthrough
CT: control target
= control target key end

     0   :  { %s242_s6 = smov 0   ;;  %s263_s0 = inlined_call_operand.vmem [shape: f32[2,32,256], index: 0, kind: input, shape index: {}]   ;;  %s264_s1 = inlined_call_operand.vmem [shape: f32[2,1,256], index: 1, kind: output, shape index: {}]  }
   0x1 LB: > { %s205_s7 = sadd.s32 4294967295, %s230_s6   ;;  %p209_p0 = scmp.ge.s32.totalorder %s230_s6, 1  ;;  %s230_s6 = sphi %s242_s6, %s11_s6  }
   0x2   : > { %p87_p1 = scmp.lt.s32.totalorder %s230_s6, 3 }
   0x4   : > { %p88_p2 = pnand %p209_p0, %p87_p1 }
   0x5   : > { %p106_p3 = scmp.lt.s32.totalorder (!%p88_p2), %s205_s7, 1 }
   0x6   : > { %91 = sbr.rel (%p88_p2) target bundleno = 38 (0x26), region = 24 }
   0xb   : > { %s266_s7 = smov (!%p106_p3, %s205_s7), 1  ;;  %v147_v24 = vlaneseq  ;;  %vm144_vm0 = vcmask 1040384  }
   0xc   : > { %s215_s8 = sshll.u32 %s266_s7, 6  ;;  %s212_s12 = sshll.u32 %s266_s7, 1 }
   0xd   : > { %s110_s11 = scalar_lea.vmem %s263_s0, %s215_s8  ;;  %s114_s15 = scalar_lea.vmem %s264_s1, %s212_s12  ;;  %vm149_vm1 = vcmp.lt.s32.totalorder %v147_v24, 256 }
   0xe   : > { %v115_v0 = vld [vmem:[%s110_s11] sm:$0xff]  ;;  %v116_v1 = vld [vmem:[%s110_s11 + $0x8] sm:$0xff]  ;;  %v117_v2 = vld [vmem:[%s110_s11 + $0x10] sm:$0xff] }
   0xf   : > { %v118_v3 = vld [vmem:[%s110_s11 + $0x18] sm:$0xff]  ;;  %v119_v4 = vld [vmem:[%s110_s11 + $0x20] sm:$0xff]  ;;  %v120_v5 = vld [vmem:[%s110_s11 + $0x28] sm:$0xff]  ;;  %v123_v6 = vadd.f32 %v117_v2, %v115_v0 }
  0x10   : > { %v121_v7 = vld [vmem:[%s110_s11 + $0x30] sm:$0xff]  ;;  %v132_v8 = vadd.f32 %v118_v3, %v116_v1  ;;  %v122_v9 = vld [vmem:[%s110_s11 + $0x38] sm:$0xff] }
  0x11   : > { %v124_v10 = vadd.f32 %v123_v6, %v119_v4 }
  0x12   : > { %v133_v11 = vadd.f32 %v132_v8, %v120_v5 }
  0x13   : > { %v125_v12 = vadd.f32 %v124_v10, %v121_v7 }
  0x14   : > { %v134_v13 = vadd.f32 %v133_v11, %v122_v9 }
  0x15   : > { %v126_v14 = vrot.slane %v125_v12, 4 }
  0x16   : > { %v135_v15 = vrot.slane %v134_v13, 4 }
  0x17   : > { %v127_v16 = vadd.f32 %v126_v14, %v125_v12 }
  0x18   : > { %v136_v17 = vadd.f32 %v135_v15, %v134_v13 }
  0x19   : > { %v128_v18 = vrot.slane %v127_v16, 2 }
  0x1a   : > { %v137_v19 = vrot.slane %v136_v17, 2 }
  0x1b   : > { %v129_v20 = vadd.f32 %v128_v18, %v127_v16 }
  0x1c   : > { %v138_v21 = vadd.f32 %v137_v19, %v136_v17 }
  0x1d   : > { %v130_v22 = vrot.slane %v129_v20, 1 }
  0x1e   : > { %v139_v23 = vrot.slane %v138_v21, 1 }
  0x1f   : > { %v131_v25 = vadd.f32 %v130_v22, %v129_v20 }
  0x20   : > { %v140_v26 = vadd.f32 %v139_v23, %v138_v21 }
  0x22   : > { %v143_v27 = vrot.slane %v140_v26, 7 }
  0x24   : > { %v145_v28 = vsel %vm144_vm0, %v131_v25, %v143_v27 }
  0x25   : > { %151 = vst.msk [vmem:[%s114_s15] sm:$0x3] %vm149_vm1, %v145_v28 }
  0x26 PF: > { %s11_s6 = sadd.s32 1, %s230_s6  }
  0x27   : > { %p8_p4 = scmp.ge.s32.totalorder %s11_s6, 4  }
  0x29   :  { %10 = sbr.rel (!%p8_p4) target bundleno = 1 (0x1), region = 54 }

// kernel: generator_forward.36
= control target key start
LH: loop header
LB: loop body
LE: loop exit
PB: predicated region body
PF: predicated region fallthrough
CT: control target
= control target key end

     0   :  { %s294_s11 = smov 0   ;;  %s315_s0 = inlined_call_operand.<no memory space> [shape: f32[1,1], index: 0, kind: input, shape index: {}]   ;;  %s316_s1 = inlined_call_operand.vmem [shape: f32[2,16,256], index: 1, kind: input, shape index: {}]   ;;  %s317_s2 = inlined_call_operand.vmem [shape: f32[2,1,256], index: 2, kind: output, shape index: {}]  }
   0x1   :  { %v7_v0 = vstv %s315_s0 }
   0x2   :  { %8 = vst [vmem:[#allocation2] sm:$0x1] %v7_v0 }
   0x3 LB: > { %s245_s12 = sadd.s32 4294967295, %s273_s11   ;;  %p249_p0 = scmp.ge.s32.totalorder %s273_s11, 1  ;;  %s273_s11 = sphi %s294_s11, %s14_s11  }
   0x4   : > { %p114_p1 = scmp.lt.s32.totalorder %s273_s11, 3 }
   0x6   : > { %p115_p2 = pnand %p249_p0, %p114_p1 }
   0x7   : > { %p135_p3 = scmp.lt.s32.totalorder (!%p115_p2), %s245_s12, 1 }
   0x8   : > { %118 = sbr.rel (%p115_p2) target bundleno = 151 (0x97), region = 28 }
   0xd   : > { %v266_v1 = vld [vmem:[#allocation2] ss:$0 sm:$0xff]  ;;  %v275_v2 = vmov 0   ;;  %s319_s12 = smov (!%p135_p3, %s245_s12), 1  ;;  %v187_v26 = vlaneseq  ;;  %vm184_vm4 = vcmask 1040384  }
   0xe   : > { %265 = vset.pattern.permute.xlu0 %v275_v2  ;;  %s255_s0 = sshll.u32 %s319_s12, 5  ;;  %s252_s16 = sshll.u32 %s319_s12, 1 }
   0xf   : > { %156 = vperm.xlu0 %265, %v266_v1   ;;  %s139_s15 = scalar_lea.vmem %s316_s1, %s255_s0  ;;  %vm189_vm5 = vcmp.lt.s32.totalorder %v187_v26, 256  ;;  %s143_s19 = scalar_lea.vmem %s317_s2, %s252_s16 }
  0x10   : > { %v144_v3 = vld [vmem:[%s139_s15] sm:$0xff]  ;;  %v145_v4 = vld [vmem:[%s139_s15 + $0x8] sm:$0xff]  ;;  %v146_v5 = vld [vmem:[%s139_s15 + $0x10] sm:$0xff] }
  0x11   : > { %v147_v6 = vld [vmem:[%s139_s15 + $0x18] sm:$0xff]  ;;  %vm148_vm0 = vcmp.ge.f32.partialorder %v144_v3, 0.0  ;;  %vm149_vm1 = vcmp.ge.f32.partialorder %v145_v4, 0.0  ;;  %vm150_vm2 = vcmp.ge.f32.partialorder %v146_v5, 0.0 }
  0x12   : > { %vm151_vm3 = vcmp.ge.f32.partialorder %v147_v6, 0.0 }
  0x81   : > { %v157_v7 = vpop.permute.xlu0 %156 }
  0x82   : > { %v159_v8 = vmul.f32 %v157_v7, %v144_v3  ;;  %v160_v9 = vmul.f32 %v157_v7, %v145_v4  ;;  %v161_v10 = vmul.f32 %v157_v7, %v146_v5  ;;  %v162_v11 = vmul.f32 %v157_v7, %v147_v6 }
  0x84   : > { %v163_v12 = vsel %vm148_vm0, %v144_v3, %v159_v8  ;;  %v164_v13 = vsel %vm149_vm1, %v145_v4, %v160_v9  ;;  %v165_v14 = vsel %vm150_vm2, %v146_v5, %v161_v10  ;;  %v166_v15 = vsel %vm151_vm3, %v147_v6, %v162_v11 }
  0x85   : > { %v167_v16 = vadd.f32 %v165_v14, %v163_v12  ;;  %v174_v17 = vadd.f32 %v166_v15, %v164_v13 }
  0x87   : > { %v168_v18 = vrot.slane %v167_v16, 4  ;;  %v175_v19 = vrot.slane %v174_v17, 4 }
  0x89   : > { %v169_v20 = vadd.f32 %v168_v18, %v167_v16  ;;  %v176_v21 = vadd.f32 %v175_v19, %v174_v17 }
  0x8b   : > { %v170_v22 = vrot.slane %v169_v20, 2  ;;  %v177_v23 = vrot.slane %v176_v21, 2 }
  0x8d   : > { %v171_v24 = vadd.f32 %v170_v22, %v169_v20  ;;  %v178_v25 = vadd.f32 %v177_v23, %v176_v21 }
  0x8f   : > { %v172_v27 = vrot.slane %v171_v24, 1  ;;  %v179_v28 = vrot.slane %v178_v25, 1 }
  0x91   : > { %v180_v29 = vadd.f32 %v179_v28, %v178_v25  ;;  %v173_v30 = vadd.f32 %v172_v27, %v171_v24 }
  0x93   : > { %v183_v31 = vrot.slane %v180_v29, 7 }
  0x95   : > { %v185_v32 = vsel %vm184_vm4, %v173_v30, %v183_v31 }
  0x96   : > { %191 = vst.msk [vmem:[%s143_s19] sm:$0x3] %vm189_vm5, %v185_v32 }
  0x97 PF: > { %s14_s11 = sadd.s32 1, %s273_s11  }
  0x98   : > { %p11_p4 = scmp.ge.s32.totalorder %s14_s11, 4  }
  0x9a   :  { %13 = sbr.rel (!%p11_p4) target bundleno = 3 (0x3), region = 58 }

// kernel: generator_forward.37
= control target key start
LH: loop header
LB: loop body
LE: loop exit
PB: predicated region body
PF: predicated region fallthrough
CT: control target
= control target key end

     0   :  { %vm63_vm0 = vcmask 130048   ;;  %s178_s0 = inlined_call_operand.vmem [shape: f32[2,2,16], index: 0, kind: input, shape index: {}]   ;;  %s179_s1 = inlined_call_operand.vmem [shape: f32[2,2,16], index: 1, kind: input, shape index: {}]   ;;  %s180_s2 = inlined_call_operand.vmem [shape: f32[2,8,16], index: 2, kind: input, shape index: {}]   ;;  %s181_s3 = inlined_call_operand.vmem [shape: f32[2,8,16], index: 3, kind: input, shape index: {}]   ;;  %s182_s4 = inlined_call_operand.vmem [shape: f32[2,2,8,16], index: 4, kind: output, shape index: {0}]   ;;  %s183_s5 = inlined_call_operand.vmem [shape: f32[2,2,8,16], index: 5, kind: output, shape index: {1}]  }
   0x1   :  { %v19_v0 = vld [vmem:[%s178_s0] sm:$0x3]  ;;  %v20_v8 = vld [vmem:[%s178_s0 + $0x2] sm:$0x3]  ;;  %v32_v14 = vld [vmem:[%s180_s2 + $0x8] sm:$0xff] }
   0x2   :  { %v25_v1 = vld [vmem:[%s179_s1] sm:$0x3]  ;;  %v35_v4 = vperm.slane %v19_v0, 0  ;;  %v23_v6 = vrot.slane %v19_v0, 1  ;;  %v26_v9 = vld [vmem:[%s179_s1 + $0x2] sm:$0x3] }
   0x3   :  { %v31_v2 = vld [vmem:[%s180_s2] sm:$0xff]  ;;  %v47_v5 = vperm.slane %v25_v1, 0  ;;  %v29_v7 = vrot.slane %v25_v1, 1  ;;  %v34_v15 = vld [vmem:[%s181_s3 + $0x8] sm:$0xff]  ;;  %v37_v16 = vperm.slane %v20_v8, 0  ;;  %v49_v17 = vperm.slane %v26_v9, 0 }
   0x4   :  { %v33_v3 = vld [vmem:[%s181_s3] sm:$0xff]  ;;  %v43_v10 = vmul.f32 %v35_v4, %v31_v2  ;;  %v36_v12 = vperm.slane %v23_v6, 0  ;;  %v24_v18 = vrot.slane %v20_v8, 1  ;;  %v30_v19 = vrot.slane %v26_v9, 1 }
   0x5   :  { %v55_v11 = vmul.f32 %v47_v5, %v33_v3  ;;  %v48_v13 = vperm.slane %v29_v7, 0  ;;  %v68_v23 = vmul.f32 %v35_v4, %v33_v3  ;;  %v45_v24 = vmul.f32 %v37_v16, %v32_v14 }
   0x6   :  { %v44_v21 = vmul.f32 %v36_v12, %v31_v2  ;;  %v57_v25 = vmul.f32 %v49_v17, %v34_v15  ;;  %v38_v26 = vperm.slane %v24_v18, 0  ;;  %v50_v27 = vperm.slane %v30_v19, 0 }
   0x7   :  { %v59_v20 = vsub.f32 %v43_v10, %v55_v11  ;;  %v56_v22 = vmul.f32 %v48_v13, %v33_v3  ;;  %v72_v29 = vmul.f32 %v47_v5, %v31_v2  ;;  %v69_v30 = vmul.f32 %v36_v12, %v33_v3 }
   0x8   :  { %v73_v31 = vmul.f32 %v48_v13, %v31_v2  ;;  %v61_v32 = vsub.f32 %v45_v24, %v57_v25  ;;  %v46_v33 = vmul.f32 %v38_v26, %v32_v14  ;;  %v58_v34 = vmul.f32 %v50_v27, %v34_v15 }
   0x9   :  { %64 = vst.msk [vmem:[%s182_s4] sm:$0xff] %vm63_vm0, %v59_v20  ;;  %v60_v28 = vsub.f32 %v44_v21, %v56_v22  ;;  %v70_v35 = vmul.f32 %v37_v16, %v34_v15  ;;  %v76_v36 = vadd.f32 %v72_v29, %v68_v23  ;;  %v74_v38 = vmul.f32 %v49_v17, %v32_v14 }
   0xa   :  { %v77_v37 = vadd.f32 %v73_v31, %v69_v30  ;;  %v71_v39 = vmul.f32 %v38_v26, %v34_v15  ;;  %66 = vst.msk [vmem:[%s182_s4 + $0x10] sm:$0xff] %vm63_vm0, %v61_v32  ;;  %v62_v40 = vsub.f32 %v46_v33, %v58_v34  ;;  %v75_v41 = vmul.f32 %v50_v27, %v32_v14 }
   0xb   :  { %65 = vst.msk [vmem:[%s182_s4 + $0x8] sm:$0xff] %vm63_vm0, %v60_v28  ;;  %v78_v42 = vadd.f32 %v74_v38, %v70_v35 }
   0xc   :  { %80 = vst.msk [vmem:[%s183_s5] sm:$0xff] %vm63_vm0, %v76_v36  ;;  %v79_v43 = vadd.f32 %v75_v41, %v71_v39 }
   0xd   :  { %67 = vst.msk [vmem:[%s182_s4 + $0x18] sm:$0xff] %vm63_vm0, %v62_v40 }
   0xe   :  { %81 = vst.msk [vmem:[%s183_s5 + $0x8] sm:$0xff] %vm63_vm0, %v77_v37 }
   0xf   :  { %82 = vst.msk [vmem:[%s183_s5 + $0x10] sm:$0xff] %vm63_vm0, %v78_v42 }
  0x10   :  { %83 = vst.msk [vmem:[%s183_s5 + $0x18] sm:$0xff] %vm63_vm0, %v79_v43 }

// kernel: reverse.17
= control target key start
LH: loop header
LB: loop body
LE: loop exit
PB: predicated region body
PF: predicated region fallthrough
CT: control target
= control target key end

     0   :  { %v104_v10 = vlaneseq  ;;  %v97_v14 = vld [vmem:[#allocation0 + $0x7] ss:$-1 sm:$0xff]  ;;  %v111_v19 = vld [vmem:[#allocation0 + $0x17] ss:$-1 sm:$0xff]  ;;  %s606_s0 = inlined_call_operand.vmem [shape: f32[2,8,16,7], index: 0, kind: input, shape index: {}]   ;;  %s607_s1 = inlined_call_operand.vmem [shape: f32[2,8,16,7], index: 1, kind: output, shape index: {}]  }
   0x1   :  { %v61_v0 = vld [vmem:[%s606_s0] sm:$0xff]  ;;  %v63_v1 = vld [vmem:[%s606_s0 + $0x8] sm:$0xff]  ;;  %v65_v2 = vld [vmem:[%s606_s0 + $0x10] sm:$0xff]  ;;  %v98_v21 = vrot.slane %v97_v14, 1  ;;  %v112_v25 = vrot.slane %v111_v19, 1 }
   0x2   :  { %62 = vst [vmem:[#allocation0 + $0x8] sm:$0xff] %v61_v0  ;;  %v67_v3 = vld [vmem:[%s606_s0 + $0x18] sm:$0xff]  ;;  %v69_v4 = vld [vmem:[%s606_s0 + $0x20] sm:$0xff]  ;;  %v71_v5 = vld [vmem:[%s606_s0 + $0x28] sm:$0xff]  ;;  %v517_v17 = vshrl.u32 %v104_v10, 7 }
   0x3   :  { %64 = vst [vmem:[#allocation0 + $0x18] sm:$0xff] %v63_v1  ;;  %v73_v6 = vld [vmem:[%s606_s0 + $0x30] sm:$0xff]  ;;  %v75_v7 = vld [vmem:[%s606_s0 + $0x38] sm:$0xff]  ;;  %v77_v8 = vld [vmem:[%s606_s0 + $0x40] sm:$0xff] }
   0x4   :  { %66 = vst [vmem:[#allocation0 + $0x28] sm:$0xff] %v65_v2  ;;  %v79_v9 = vld [vmem:[%s606_s0 + $0x48] sm:$0xff]  ;;  %v81_v11 = vld [vmem:[%s606_s0 + $0x50] sm:$0xff]  ;;  %v83_v12 = vld [vmem:[%s606_s0 + $0x58] sm:$0xff]  ;;  %vm106_vm0 = vcmp.lt.s32.totalorder %v517_v17, 7 }
   0x5   :  { %68 = vst [vmem:[#allocation0 + $0x38] sm:$0xff] %v67_v3  ;;  %v85_v13 = vld [vmem:[%s606_s0 + $0x60] sm:$0xff]  ;;  %v87_v15 = vld [vmem:[%s606_s0 + $0x68] sm:$0xff]  ;;  %v89_v18 = vld [vmem:[%s606_s0 + $0x70] sm:$0xff] }
   0x6   :  { %70 = vst [vmem:[#allocation0 + $0x48] sm:$0xff] %v69_v4  ;;  %v91_v20 = vld [vmem:[%s606_s0 + $0x78] sm:$0xff]  ;;  %v125_v24 = vld [vmem:[#allocation0 + $0x27] ss:$-1 sm:$0xff]  ;;  %v139_v28 = vld [vmem:[#allocation0 + $0x37] ss:$-1 sm:$0xff] }
   0x7   :  { %72 = vst [vmem:[#allocation0 + $0x58] sm:$0xff] %v71_v5  ;;  %v126_v29 = vrot.slane %v125_v24, 1  ;;  %v153_v32 = vld [vmem:[#allocation0 + $0x47] ss:$-1 sm:$0xff]  ;;  %v140_v33 = vrot.slane %v139_v28, 1 }
   0x8   :  { %74 = vst [vmem:[#allocation0 + $0x68] sm:$0xff] %v73_v6  ;;  %v167_v36 = vld [vmem:[#allocation0 + $0x57] ss:$-1 sm:$0xff]  ;;  %v154_v37 = vrot.slane %v153_v32, 1  ;;  %v181_v40 = vld [vmem:[#allocation0 + $0x67] ss:$-1 sm:$0xff] }
   0x9   :  { %76 = vst [vmem:[#allocation0 + $0x78] sm:$0xff] %v75_v7  ;;  %v102_v16 = vld [vmem:[#allocation0 + $0xf] ss:$-1 sm:$0xff]  ;;  %v168_v41 = vrot.slane %v167_v36, 1  ;;  %v195_v44 = vld [vmem:[#allocation0 + $0x77] ss:$-1 sm:$0xff] }
   0xa   :  { %78 = vst [vmem:[#allocation0 + $0x88] sm:$0xff] %v77_v8  ;;  %v116_v22 = vld [vmem:[#allocation0 + $0x1f] ss:$-1 sm:$0xff]  ;;  %v103_v23 = vrot.slane %v102_v16, 1  ;;  %v182_v45 = vrot.slane %v181_v40, 1  ;;  %v196_v49 = vrot.slane %v195_v44, 1 }
   0xb   :  { %80 = vst [vmem:[#allocation0 + $0x98] sm:$0xff] %v79_v9  ;;  %v130_v26 = vld [vmem:[#allocation0 + $0x2f] ss:$-1 sm:$0xff]  ;;  %v117_v27 = vrot.slane %v116_v22, 1  ;;  %v209_v48 = vld [vmem:[#allocation0 + $0x87] ss:$-1 sm:$0xff] }
   0xc   :  { %82 = vst [vmem:[#allocation0 + $0xa8] sm:$0xff] %v81_v11  ;;  %v144_v30 = vld [vmem:[#allocation0 + $0x3f] ss:$-1 sm:$0xff]  ;;  %v131_v31 = vrot.slane %v130_v26, 1  ;;  %v223_v52 = vld [vmem:[#allocation0 + $0x97] ss:$-1 sm:$0xff] }
   0xd   :  { %84 = vst [vmem:[#allocation0 + $0xb8] sm:$0xff] %v83_v12  ;;  %v158_v34 = vld [vmem:[#allocation0 + $0x4f] ss:$-1 sm:$0xff]  ;;  %v145_v35 = vrot.slane %v144_v30, 1  ;;  %v210_v53 = vrot.slane %v209_v48, 1  ;;  %v224_v57 = vrot.slane %v223_v52, 1 }
   0xe   :  { %86 = vst [vmem:[#allocation0 + $0xc8] sm:$0xff] %v85_v13  ;;  %v172_v38 = vld [vmem:[#allocation0 + $0x5f] ss:$-1 sm:$0xff]  ;;  %v159_v39 = vrot.slane %v158_v34, 1  ;;  %v237_v56 = vld [vmem:[#allocation0 + $0xa7] ss:$-1 sm:$0xff] }
   0xf   :  { %88 = vst [vmem:[#allocation0 + $0xd8] sm:$0xff] %v87_v15  ;;  %v186_v42 = vld [vmem:[#allocation0 + $0x6f] ss:$-1 sm:$0xff]  ;;  %v173_v43 = vrot.slane %v172_v38, 1  ;;  %v251_v60 = vld [vmem:[#allocation0 + $0xb7] ss:$-1 sm:$0xff] }
  0x10   :  { %90 = vst [vmem:[#allocation0 + $0xe8] sm:$0xff] %v89_v18  ;;  %v200_v46 = vld [vmem:[#allocation0 + $0x7f] ss:$-1 sm:$0xff]  ;;  %v187_v47 = vrot.slane %v186_v42, 1  ;;  %v238_v61 = vrot.slane %v237_v56, 1  ;;  %v252_v1 = vrot.slane %v251_v60, 1 }
  0x11   :  { %92 = vst [vmem:[#allocation0 + $0xf8] sm:$0xff] %v91_v20  ;;  %v214_v50 = vld [vmem:[#allocation0 + $0x8f] ss:$-1 sm:$0xff]  ;;  %v201_v51 = vrot.slane %v200_v46, 1  ;;  %v265_v0 = vld [vmem:[#allocation0 + $0xc7] ss:$-1 sm:$0xff] }
  0x12   :  { %99 = vst [vmem:[#allocation1] sm:$0xff] %v98_v21  ;;  %v228_v54 = vld [vmem:[#allocation0 + $0x9f] ss:$-1 sm:$0xff]  ;;  %v215_v55 = vrot.slane %v214_v50, 1  ;;  %v279_v4 = vld [vmem:[#allocation0 + $0xd7] ss:$-1 sm:$0xff] }
  0x13   :  { %107 = vst.msk [vmem:[#allocation1] sm:$0xff] %vm106_vm0, %v103_v23  ;;  %v242_v58 = vld [vmem:[#allocation0 + $0xaf] ss:$-1 sm:$0xff]  ;;  %v229_v59 = vrot.slane %v228_v54, 1  ;;  %v266_v5 = vrot.slane %v265_v0, 1  ;;  %v280_v9 = vrot.slane %v279_v4, 1 }
  0x14   :  { %113 = vst [vmem:[#allocation1 + $0x8] sm:$0xff] %v112_v25  ;;  %v256_v62 = vld [vmem:[#allocation0 + $0xbf] ss:$-1 sm:$0xff]  ;;  %v243_v63 = vrot.slane %v242_v58, 1  ;;  %v293_v8 = vld [vmem:[#allocation0 + $0xe7] ss:$-1 sm:$0xff] }
  0x15   :  { %121 = vst.msk [vmem:[#allocation1 + $0x8] sm:$0xff] %vm106_vm0, %v117_v27  ;;  %v270_v2 = vld [vmem:[#allocation0 + $0xcf] ss:$-1 sm:$0xff]  ;;  %v257_v3 = vrot.slane %v256_v62, 1  ;;  %v307_v12 = vld [vmem:[#allocation0 + $0xf7] ss:$-1 sm:$0xff] }
  0x16   :  { %127 = vst [vmem:[#allocation1 + $0x10] sm:$0xff] %v126_v29  ;;  %v284_v6 = vld [vmem:[#allocation0 + $0xdf] ss:$-1 sm:$0xff]  ;;  %v271_v7 = vrot.slane %v270_v2, 1  ;;  %v294_v13 = vrot.slane %v293_v8, 1  ;;  %v308_v16 = vrot.slane %v307_v12, 1 }
  0x17   :  { %135 = vst.msk [vmem:[#allocation1 + $0x10] sm:$0xff] %vm106_vm0, %v131_v31  ;;  %v298_v10 = vld [vmem:[#allocation0 + $0xef] ss:$-1 sm:$0xff]  ;;  %v285_v11 = vrot.slane %v284_v6, 1 }
  0x18   :  { %141 = vst [vmem:[#allocation1 + $0x18] sm:$0xff] %v140_v33  ;;  %v312_v14 = vld [vmem:[#allocation0 + $0xff] ss:$-1 sm:$0xff]  ;;  %v299_v15 = vrot.slane %v298_v10, 1 }
  0x19   :  { %149 = vst.msk [vmem:[#allocation1 + $0x18] sm:$0xff] %vm106_vm0, %v145_v35  ;;  %v313_v18 = vrot.slane %v312_v14, 1 }
  0x1a   :  { %155 = vst [vmem:[#allocation1 + $0x20] sm:$0xff] %v154_v37  ;;  %v376_v19 = vld [vmem:[#allocation1] sm:$0xff] }
  0x1b   :  { %163 = vst.msk [vmem:[#allocation1 + $0x20] sm:$0xff] %vm106_vm0, %v159_v39 }
  0x1c   :  { %169 = vst [vmem:[#allocation1 + $0x28] sm:$0xff] %v168_v41  ;;  %v378_v20 = vld [vmem:[#allocation1 + $0x8] sm:$0xff] }
  0x1d   :  { %177 = vst.msk [vmem:[#allocation1 + $0x28] sm:$0xff] %vm106_vm0, %v173_v43 }
  0x1e   :  { %183 = vst [vmem:[#allocation1 + $0x30] sm:$0xff] %v182_v45  ;;  %v380_v17 = vld [vmem:[#allocation1 + $0x10] sm:$0xff] }
  0x1f   :  { %191 = vst.msk [vmem:[#allocation1 + $0x30] sm:$0xff] %vm106_vm0, %v187_v47 }
  0x20   :  { %197 = vst [vmem:[#allocation1 + $0x38] sm:$0xff] %v196_v49  ;;  %v382_v21 = vld [vmem:[#allocation1 + $0x18] sm:$0xff] }
  0x21   :  { %205 = vst.msk [vmem:[#allocation1 + $0x38] sm:$0xff] %vm106_vm0, %v201_v51 }
  0x22   :  { %211 = vst [vmem:[#allocation1 + $0x40] sm:$0xff] %v210_v53  ;;  %v384_v22 = vld [vmem:[#allocation1 + $0x20] sm:$0xff] }
  0x23   :  { %219 = vst.msk [vmem:[#allocation1 + $0x40] sm:$0xff] %vm106_vm0, %v215_v55 }
  0x24   :  { %225 = vst [vmem:[#allocation1 + $0x48] sm:$0xff] %v224_v57  ;;  %v386_v23 = vld [vmem:[#allocation1 + $0x28] sm:$0xff] }
  0x25   :  { %233 = vst.msk [vmem:[#allocation1 + $0x48] sm:$0xff] %vm106_vm0, %v229_v59 }
  0x26   :  { %239 = vst [vmem:[#allocation1 + $0x50] sm:$0xff] %v238_v61  ;;  %v388_v24 = vld [vmem:[#allocation1 + $0x30] sm:$0xff] }
  0x27   :  { %247 = vst.msk [vmem:[#allocation1 + $0x50] sm:$0xff] %vm106_vm0, %v243_v63 }
  0x28   :  { %253 = vst [vmem:[#allocation1 + $0x58] sm:$0xff] %v252_v1  ;;  %v390_v25 = vld [vmem:[#allocation1 + $0x38] sm:$0xff] }
  0x29   :  { %261 = vst.msk [vmem:[#allocation1 + $0x58] sm:$0xff] %vm106_vm0, %v257_v3 }
  0x2a   :  { %267 = vst [vmem:[#allocation1 + $0x60] sm:$0xff] %v266_v5  ;;  %v392_v26 = vld [vmem:[#allocation1 + $0x40] sm:$0xff] }
  0x2b   :  { %275 = vst.msk [vmem:[#allocation1 + $0x60] sm:$0xff] %vm106_vm0, %v271_v7 }
  0x2c   :  { %281 = vst [vmem:[#allocation1 + $0x68] sm:$0xff] %v280_v9  ;;  %v394_v27 = vld [vmem:[#allocation1 + $0x48] sm:$0xff] }
  0x2d   :  { %289 = vst.msk [vmem:[#allocation1 + $0x68] sm:$0xff] %vm106_vm0, %v285_v11 }
  0x2e   :  { %295 = vst [vmem:[#allocation1 + $0x70] sm:$0xff] %v294_v13  ;;  %v396_v28 = vld [vmem:[#allocation1 + $0x50] sm:$0xff] }
  0x2f   :  { %303 = vst.msk [vmem:[#allocation1 + $0x70] sm:$0xff] %vm106_vm0, %v299_v15 }
  0x30   :  { %309 = vst [vmem:[#allocation1 + $0x78] sm:$0xff] %v308_v16  ;;  %v398_v29 = vld [vmem:[#allocation1 + $0x58] sm:$0xff] }
  0x31   :  { %317 = vst.msk [vmem:[#allocation1 + $0x78] sm:$0xff] %vm106_vm0, %v313_v18 }
  0x32   :  { %377 = vst [vmem:[%s607_s1] sm:$0xff] %v376_v19  ;;  %v400_v30 = vld [vmem:[#allocation1 + $0x60] sm:$0xff] }
  0x33   :  { %379 = vst [vmem:[%s607_s1 + $0x8] sm:$0xff] %v378_v20 }
  0x34   :  { %381 = vst [vmem:[%s607_s1 + $0x10] sm:$0xff] %v380_v17  ;;  %v402_v31 = vld [vmem:[#allocation1 + $0x68] sm:$0xff] }
  0x35   :  { %383 = vst [vmem:[%s607_s1 + $0x18] sm:$0xff] %v382_v21 }
  0x36   :  { %385 = vst [vmem:[%s607_s1 + $0x20] sm:$0xff] %v384_v22  ;;  %v404_v32 = vld [vmem:[#allocation1 + $0x70] sm:$0xff] }
  0x37   :  { %387 = vst [vmem:[%s607_s1 + $0x28] sm:$0xff] %v386_v23 }
  0x38   :  { %389 = vst [vmem:[%s607_s1 + $0x30] sm:$0xff] %v388_v24  ;;  %v406_v33 = vld [vmem:[#allocation1 + $0x78] sm:$0xff] }
  0x39   :  { %391 = vst [vmem:[%s607_s1 + $0x38] sm:$0xff] %v390_v25 }
  0x3a   :  { %393 = vst [vmem:[%s607_s1 + $0x40] sm:$0xff] %v392_v26 }
  0x3b   :  { %395 = vst [vmem:[%s607_s1 + $0x48] sm:$0xff] %v394_v27 }
  0x3c   :  { %397 = vst [vmem:[%s607_s1 + $0x50] sm:$0xff] %v396_v28 }
  0x3d   :  { %399 = vst [vmem:[%s607_s1 + $0x58] sm:$0xff] %v398_v29 }
  0x3e   :  { %401 = vst [vmem:[%s607_s1 + $0x60] sm:$0xff] %v400_v30 }
  0x3f   :  { %403 = vst [vmem:[%s607_s1 + $0x68] sm:$0xff] %v402_v31 }
  0x40   :  { %405 = vst [vmem:[%s607_s1 + $0x70] sm:$0xff] %v404_v32 }
  0x41   :  { %407 = vst [vmem:[%s607_s1 + $0x78] sm:$0xff] %v406_v33 }

// kernel: generator_forward.41
= control target key start
LH: loop header
LB: loop body
LE: loop exit
PB: predicated region body
PF: predicated region fallthrough
CT: control target
= control target key end

     0   :  { %vm63_vm0 = vcmask 125952   ;;  %s178_s0 = inlined_call_operand.vmem [shape: f32[2,2,16], index: 0, kind: input, shape index: {}]   ;;  %s179_s1 = inlined_call_operand.vmem [shape: f32[2,2,16], index: 1, kind: input, shape index: {}]   ;;  %s180_s2 = inlined_call_operand.vmem [shape: f32[2,4,16], index: 2, kind: input, shape index: {}]   ;;  %s181_s3 = inlined_call_operand.vmem [shape: f32[2,4,16], index: 3, kind: input, shape index: {}]   ;;  %s182_s4 = inlined_call_operand.vmem [shape: f32[2,2,4,16], index: 4, kind: output, shape index: {0}]   ;;  %s183_s5 = inlined_call_operand.vmem [shape: f32[2,2,4,16], index: 5, kind: output, shape index: {1}]  }
   0x1   :  { %v19_v0 = vld [vmem:[%s178_s0] sm:$0x3]  ;;  %v20_v8 = vld [vmem:[%s178_s0 + $0x2] sm:$0x3]  ;;  %v32_v14 = vld [vmem:[%s180_s2 + $0x4] sm:$0xf] }
   0x2   :  { %v25_v1 = vld [vmem:[%s179_s1] sm:$0x3]  ;;  %v35_v4 = vperm.slane %v19_v0, 0  ;;  %v23_v6 = vrot.slane %v19_v0, 1  ;;  %v26_v9 = vld [vmem:[%s179_s1 + $0x2] sm:$0x3] }
   0x3   :  { %v31_v2 = vld [vmem:[%s180_s2] sm:$0xf]  ;;  %v47_v5 = vperm.slane %v25_v1, 0  ;;  %v29_v7 = vrot.slane %v25_v1, 1  ;;  %v34_v15 = vld [vmem:[%s181_s3 + $0x4] sm:$0xf] }
   0x4   :  { %v33_v3 = vld [vmem:[%s181_s3] sm:$0xf]  ;;  %v43_v10 = vmul.f32 %v35_v4, %v31_v2  ;;  %v36_v12 = vperm.slane %v23_v6, 0  ;;  %v37_v16 = vperm.slane %v20_v8, 0  ;;  %v49_v17 = vperm.slane %v26_v9, 0 }
   0x5   :  { %v55_v11 = vmul.f32 %v47_v5, %v33_v3  ;;  %v48_v13 = vperm.slane %v29_v7, 0  ;;  %v24_v18 = vrot.slane %v20_v8, 1  ;;  %v30_v19 = vrot.slane %v26_v9, 1 }
   0x6   :  { %v44_v21 = vmul.f32 %v36_v12, %v31_v2  ;;  %v68_v23 = vmul.f32 %v35_v4, %v33_v3  ;;  %v45_v24 = vmul.f32 %v37_v16, %v32_v14  ;;  %v57_v25 = vmul.f32 %v49_v17, %v34_v15 }
   0x7   :  { %v59_v20 = vsub.f32 %v43_v10, %v55_v11  ;;  %v56_v22 = vmul.f32 %v48_v13, %v33_v3  ;;  %v38_v26 = vperm.slane %v24_v18, 0  ;;  %v50_v27 = vperm.slane %v30_v19, 0 }
   0x8   :  { %v72_v29 = vmul.f32 %v47_v5, %v31_v2  ;;  %v69_v30 = vmul.f32 %v36_v12, %v33_v3  ;;  %v73_v31 = vmul.f32 %v48_v13, %v31_v2  ;;  %v61_v32 = vsub.f32 %v45_v24, %v57_v25 }
   0x9   :  { %64 = vst.msk [vmem:[%s182_s4] sm:$0xf] %vm63_vm0, %v59_v20  ;;  %v60_v28 = vsub.f32 %v44_v21, %v56_v22  ;;  %v46_v33 = vmul.f32 %v38_v26, %v32_v14  ;;  %v58_v34 = vmul.f32 %v50_v27, %v34_v15  ;;  %v70_v35 = vmul.f32 %v37_v16, %v34_v15 }
   0xa   :  { %v76_v36 = vadd.f32 %v72_v29, %v68_v23  ;;  %v77_v37 = vadd.f32 %v73_v31, %v69_v30  ;;  %v74_v38 = vmul.f32 %v49_v17, %v32_v14  ;;  %v71_v39 = vmul.f32 %v38_v26, %v34_v15  ;;  %66 = vst.msk [vmem:[%s182_s4 + $0x8] sm:$0xf] %vm63_vm0, %v61_v32 }
   0xb   :  { %65 = vst.msk [vmem:[%s182_s4 + $0x4] sm:$0xf] %vm63_vm0, %v60_v28  ;;  %v62_v40 = vsub.f32 %v46_v33, %v58_v34  ;;  %v75_v41 = vmul.f32 %v50_v27, %v32_v14 }
   0xc   :  { %80 = vst.msk [vmem:[%s183_s5] sm:$0xf] %vm63_vm0, %v76_v36  ;;  %v78_v42 = vadd.f32 %v74_v38, %v70_v35 }
   0xd   :  { %67 = vst.msk [vmem:[%s182_s4 + $0xc] sm:$0xf] %vm63_vm0, %v62_v40  ;;  %v79_v43 = vadd.f32 %v75_v41, %v71_v39 }
   0xe   :  { %81 = vst.msk [vmem:[%s183_s5 + $0x4] sm:$0xf] %vm63_vm0, %v77_v37 }
   0xf   :  { %82 = vst.msk [vmem:[%s183_s5 + $0x8] sm:$0xf] %vm63_vm0, %v78_v42 }
  0x10   :  { %83 = vst.msk [vmem:[%s183_s5 + $0xc] sm:$0xf] %vm63_vm0, %v79_v43 }

// kernel: reverse.5
= control target key start
LH: loop header
LB: loop body
LE: loop exit
PB: predicated region body
PF: predicated region fallthrough
CT: control target
= control target key end

     0   :  { %v72_v3 = vlaneseq  ;;  %v65_v6 = vld [vmem:[#allocation0 + $0x7] ss:$-1 sm:$0xff]  ;;  %v79_v8 = vld [vmem:[#allocation0 + $0x17] ss:$-1 sm:$0xff]  ;;  %s331_s0 = inlined_call_operand.vmem [shape: f32[2,4,16,7], index: 0, kind: input, shape index: {}]   ;;  %s332_s1 = inlined_call_operand.vmem [shape: f32[2,4,16,7], index: 1, kind: output, shape index: {}]  }
   0x1   :  { %v45_v0 = vld [vmem:[%s331_s0] sm:$0xff]  ;;  %v47_v1 = vld [vmem:[%s331_s0 + $0x8] sm:$0xff]  ;;  %v49_v2 = vld [vmem:[%s331_s0 + $0x10] sm:$0xff]  ;;  %v66_v12 = vrot.slane %v65_v6, 1  ;;  %v80_v13 = vrot.slane %v79_v8, 1 }
   0x2   :  { %46 = vst [vmem:[#allocation0 + $0x8] sm:$0xff] %v45_v0  ;;  %v51_v4 = vld [vmem:[%s331_s0 + $0x18] sm:$0xff]  ;;  %v53_v5 = vld [vmem:[%s331_s0 + $0x20] sm:$0xff]  ;;  %v55_v7 = vld [vmem:[%s331_s0 + $0x28] sm:$0xff]  ;;  %v73_v10 = vshrl.u32 %v72_v3, 7 }
   0x3   :  { %48 = vst [vmem:[#allocation0 + $0x18] sm:$0xff] %v47_v1  ;;  %v57_v9 = vld [vmem:[%s331_s0 + $0x30] sm:$0xff]  ;;  %v59_v11 = vld [vmem:[%s331_s0 + $0x38] sm:$0xff]  ;;  %v93_v14 = vld [vmem:[#allocation0 + $0x27] ss:$-1 sm:$0xff] }
   0x4   :  { %50 = vst [vmem:[#allocation0 + $0x28] sm:$0xff] %v49_v2  ;;  %vm74_vm0 = vcmp.lt.s32.totalorder %v73_v10, 7  ;;  %v107_v16 = vld [vmem:[#allocation0 + $0x37] ss:$-1 sm:$0xff]  ;;  %v94_v19 = vrot.slane %v93_v14, 1 }
   0x5   :  { %52 = vst [vmem:[#allocation0 + $0x38] sm:$0xff] %v51_v4  ;;  %v121_v22 = vld [vmem:[#allocation0 + $0x47] ss:$-1 sm:$0xff]  ;;  %v108_v24 = vrot.slane %v107_v16, 1  ;;  %v135_v28 = vld [vmem:[#allocation0 + $0x57] ss:$-1 sm:$0xff] }
   0x6   :  { %54 = vst [vmem:[#allocation0 + $0x48] sm:$0xff] %v53_v5  ;;  %v122_v29 = vrot.slane %v121_v22, 1  ;;  %v149_v32 = vld [vmem:[#allocation0 + $0x67] ss:$-1 sm:$0xff]  ;;  %v136_v33 = vrot.slane %v135_v28, 1 }
   0x7   :  { %56 = vst [vmem:[#allocation0 + $0x58] sm:$0xff] %v55_v7  ;;  %v163_v36 = vld [vmem:[#allocation0 + $0x77] ss:$-1 sm:$0xff]  ;;  %v150_v37 = vrot.slane %v149_v32, 1 }
   0x8   :  { %58 = vst [vmem:[#allocation0 + $0x68] sm:$0xff] %v57_v9  ;;  %v164_v40 = vrot.slane %v163_v36, 1 }
   0x9   :  { %60 = vst [vmem:[#allocation0 + $0x78] sm:$0xff] %v59_v11  ;;  %v70_v15 = vld [vmem:[#allocation0 + $0xf] ss:$-1 sm:$0xff] }
   0xa   :  { %67 = vst [vmem:[#allocation1] sm:$0xff] %v66_v12  ;;  %v71_v17 = vrot.slane %v70_v15, 1  ;;  %v84_v18 = vld [vmem:[#allocation0 + $0x1f] ss:$-1 sm:$0xff] }
   0xb   :  { %81 = vst [vmem:[#allocation1 + $0x8] sm:$0xff] %v80_v13  ;;  %v85_v20 = vrot.slane %v84_v18, 1  ;;  %v98_v21 = vld [vmem:[#allocation0 + $0x2f] ss:$-1 sm:$0xff] }
   0xc   :  { %75 = vst.msk [vmem:[#allocation1] sm:$0xff] %vm74_vm0, %v71_v17  ;;  %v99_v23 = vrot.slane %v98_v21, 1  ;;  %v112_v25 = vld [vmem:[#allocation0 + $0x3f] ss:$-1 sm:$0xff] }
   0xd   :  { %89 = vst.msk [vmem:[#allocation1 + $0x8] sm:$0xff] %vm74_vm0, %v85_v20  ;;  %v113_v26 = vrot.slane %v112_v25, 1  ;;  %v126_v27 = vld [vmem:[#allocation0 + $0x4f] ss:$-1 sm:$0xff] }
   0xe   :  { %95 = vst [vmem:[#allocation1 + $0x10] sm:$0xff] %v94_v19  ;;  %v140_v30 = vld [vmem:[#allocation0 + $0x5f] ss:$-1 sm:$0xff]  ;;  %v127_v31 = vrot.slane %v126_v27, 1 }
   0xf   :  { %103 = vst.msk [vmem:[#allocation1 + $0x10] sm:$0xff] %vm74_vm0, %v99_v23  ;;  %v154_v34 = vld [vmem:[#allocation0 + $0x6f] ss:$-1 sm:$0xff]  ;;  %v141_v35 = vrot.slane %v140_v30, 1 }
  0x10   :  { %109 = vst [vmem:[#allocation1 + $0x18] sm:$0xff] %v108_v24  ;;  %v168_v38 = vld [vmem:[#allocation0 + $0x7f] ss:$-1 sm:$0xff]  ;;  %v155_v39 = vrot.slane %v154_v34, 1 }
  0x11   :  { %117 = vst.msk [vmem:[#allocation1 + $0x18] sm:$0xff] %vm74_vm0, %v113_v26  ;;  %v169_v41 = vrot.slane %v168_v38, 1 }
  0x12   :  { %123 = vst [vmem:[#allocation1 + $0x20] sm:$0xff] %v122_v29 }
  0x13   :  { %131 = vst.msk [vmem:[#allocation1 + $0x20] sm:$0xff] %vm74_vm0, %v127_v31  ;;  %v216_v42 = vld [vmem:[#allocation1] sm:$0xff] }
  0x14   :  { %137 = vst [vmem:[#allocation1 + $0x28] sm:$0xff] %v136_v33  ;;  %v218_v43 = vld [vmem:[#allocation1 + $0x8] sm:$0xff] }
  0x15   :  { %145 = vst.msk [vmem:[#allocation1 + $0x28] sm:$0xff] %vm74_vm0, %v141_v35 }
  0x16   :  { %151 = vst [vmem:[#allocation1 + $0x30] sm:$0xff] %v150_v37  ;;  %v220_v44 = vld [vmem:[#allocation1 + $0x10] sm:$0xff] }
  0x17   :  { %159 = vst.msk [vmem:[#allocation1 + $0x30] sm:$0xff] %vm74_vm0, %v155_v39 }
  0x18   :  { %165 = vst [vmem:[#allocation1 + $0x38] sm:$0xff] %v164_v40  ;;  %v222_v45 = vld [vmem:[#allocation1 + $0x18] sm:$0xff] }
  0x19   :  { %173 = vst.msk [vmem:[#allocation1 + $0x38] sm:$0xff] %vm74_vm0, %v169_v41 }
  0x1a   :  { %217 = vst [vmem:[%s332_s1] sm:$0xff] %v216_v42  ;;  %v224_v46 = vld [vmem:[#allocation1 + $0x20] sm:$0xff] }
  0x1b   :  { %219 = vst [vmem:[%s332_s1 + $0x8] sm:$0xff] %v218_v43 }
  0x1c   :  { %221 = vst [vmem:[%s332_s1 + $0x10] sm:$0xff] %v220_v44  ;;  %v226_v47 = vld [vmem:[#allocation1 + $0x28] sm:$0xff] }
  0x1d   :  { %223 = vst [vmem:[%s332_s1 + $0x18] sm:$0xff] %v222_v45 }
  0x1e   :  { %225 = vst [vmem:[%s332_s1 + $0x20] sm:$0xff] %v224_v46  ;;  %v228_v48 = vld [vmem:[#allocation1 + $0x30] sm:$0xff] }
  0x1f   :  { %227 = vst [vmem:[%s332_s1 + $0x28] sm:$0xff] %v226_v47 }
  0x20   :  { %229 = vst [vmem:[%s332_s1 + $0x30] sm:$0xff] %v228_v48  ;;  %v230_v49 = vld [vmem:[#allocation1 + $0x38] sm:$0xff] }
  0x21   :  { %231 = vst [vmem:[%s332_s1 + $0x38] sm:$0xff] %v230_v49 }

// kernel: generator_forward.44
= control target key start
LH: loop header
LB: loop body
LE: loop exit
PB: predicated region body
PF: predicated region fallthrough
CT: control target
= control target key end

     0   :  { %s284_s11 = smov 0   ;;  %s301_s0 = inlined_call_operand.<no memory space> [shape: f32[1,1], index: 0, kind: input, shape index: {}]   ;;  %s302_s1 = inlined_call_operand.vmem [shape: f32[2,8,256], index: 1, kind: input, shape index: {}]   ;;  %s303_s2 = inlined_call_operand.vmem [shape: f32[2,1,256], index: 2, kind: output, shape index: {}]  }
   0x1   :  { %v7_v0 = vstv %s301_s0 }
   0x2   :  { %8 = vst [vmem:[#allocation2] sm:$0x1] %v7_v0 }
   0x3 LB: > { %s235_s12 = sadd.s32 4294967295, %s263_s11   ;;  %p239_p0 = scmp.ge.s32.totalorder %s263_s11, 1  ;;  %s263_s11 = sphi %s284_s11, %s14_s11  }
   0x4   : > { %p114_p1 = scmp.lt.s32.totalorder %s263_s11, 3 }
   0x6   : > { %p115_p2 = pnand %p239_p0, %p114_p1 }
   0x7   : > { %p135_p3 = scmp.lt.s32.totalorder (!%p115_p2), %s235_s12, 1 }
   0x8   : > { %118 = sbr.rel (%p115_p2) target bundleno = 149 (0x95), region = 28 }
   0xd   : > { %v256_v1 = vld [vmem:[#allocation2] ss:$0 sm:$0xff]  ;;  %v265_v2 = vmov 0   ;;  %s305_s12 = smov (!%p135_p3, %s235_s12), 1  ;;  %v177_v18 = vlaneseq  ;;  %vm174_vm2 = vcmask 1040384  }
   0xe   : > { %255 = vset.pattern.permute.xlu0 %v265_v2  ;;  %s245_s0 = sshll.u32 %s305_s12, 4  ;;  %s242_s16 = sshll.u32 %s305_s12, 1 }
   0xf   : > { %152 = vperm.xlu0 %255, %v256_v1   ;;  %s139_s15 = scalar_lea.vmem %s302_s1, %s245_s0  ;;  %vm179_vm3 = vcmp.lt.s32.totalorder %v177_v18, 256  ;;  %s143_s19 = scalar_lea.vmem %s303_s2, %s242_s16 }
  0x10   : > { %v144_v3 = vld [vmem:[%s139_s15] sm:$0xff]  ;;  %v145_v4 = vld [vmem:[%s139_s15 + $0x8] sm:$0xff] }
  0x11   : > { %vm146_vm0 = vcmp.ge.f32.partialorder %v144_v3, 0.0  ;;  %vm147_vm1 = vcmp.ge.f32.partialorder %v145_v4, 0.0 }
  0x81   : > { %v153_v5 = vpop.permute.xlu0 %152 }
  0x82   : > { %v155_v6 = vmul.f32 %v153_v5, %v144_v3  ;;  %v156_v7 = vmul.f32 %v153_v5, %v145_v4 }
  0x84   : > { %v157_v8 = vsel %vm146_vm0, %v144_v3, %v155_v6  ;;  %v158_v9 = vsel %vm147_vm1, %v145_v4, %v156_v7 }
  0x85   : > { %v159_v10 = vrot.slane %v157_v8, 4  ;;  %v165_v11 = vrot.slane %v158_v9, 4 }
  0x87   : > { %v160_v12 = vadd.f32 %v159_v10, %v157_v8  ;;  %v166_v13 = vadd.f32 %v165_v11, %v158_v9 }
  0x89   : > { %v161_v14 = vrot.slane %v160_v12, 2  ;;  %v167_v15 = vrot.slane %v166_v13, 2 }
  0x8b   : > { %v162_v16 = vadd.f32 %v161_v14, %v160_v12  ;;  %v168_v17 = vadd.f32 %v167_v15, %v166_v13 }
  0x8d   : > { %v163_v19 = vrot.slane %v162_v16, 1  ;;  %v169_v20 = vrot.slane %v168_v17, 1 }
  0x8f   : > { %v170_v21 = vadd.f32 %v169_v20, %v168_v17  ;;  %v164_v22 = vadd.f32 %v163_v19, %v162_v16 }
  0x91   : > { %v173_v23 = vrot.slane %v170_v21, 7 }
  0x93   : > { %v175_v24 = vsel %vm174_vm2, %v164_v22, %v173_v23 }
  0x94   : > { %181 = vst.msk [vmem:[%s143_s19] sm:$0x3] %vm179_vm3, %v175_v24 }
  0x95 PF: > { %s14_s11 = sadd.s32 1, %s263_s11  }
  0x96   : > { %p11_p4 = scmp.ge.s32.totalorder %s14_s11, 4  }
  0x98   :  { %13 = sbr.rel (!%p11_p4) target bundleno = 3 (0x3), region = 58 }

// kernel: generator_forward.38
= control target key start
LH: loop header
LB: loop body
LE: loop exit
PB: predicated region body
PF: predicated region fallthrough
CT: control target
= control target key end

     0   :  { %s689_s18 = smov 0   ;;  %s783_s0 = inlined_call_operand.vmem [shape: f32[2,8,290], index: 0, kind: input, shape index: {}]   ;;  %s784_s1 = inlined_call_operand.vmem [shape: f32[4,72], index: 1, kind: input, shape index: {}]   ;;  %s785_s2 = inlined_call_operand.vmem [shape: f32[4,1], index: 2, kind: input, shape index: {}]   ;;  %s786_s3 = inlined_call_operand.vmem [shape: f32[2,4,256], index: 3, kind: output, shape index: {0}]   ;;  %s787_s4 = inlined_call_operand.vmem [shape: f32[2,4,1], index: 4, kind: output, shape index: {1}]   ;;  %s788_s5 = inlined_call_operand.vmem [shape: f32[2,4,1], index: 5, kind: output, shape index: {2}]  }
   0x1 LB: > { %s581_s19 = sadd.s32 4294967295, %s648_s18   ;;  %p585_p0 = scmp.ge.s32.totalorder %s648_s18, 1  ;;  %s648_s18 = sphi %s689_s18, %s16_s18  }
   0x2   : > { %p192_p1 = scmp.lt.s32.totalorder %s648_s18, 3 }
   0x4   : > { %p193_p2 = pnand %p585_p0, %p192_p1 }
   0x5   : > { %p228_p3 = scmp.lt.s32.totalorder (!%p193_p2), %s581_s19, 1  ;;  %s650_s24 = smov (!%p193_p2), 94  }
   0x6   : > { %196 = sbr.rel (%p193_p2) target bundleno = 436 (0x1b4), region = 32  ;;  %s651_s25 = smov (!%p193_p2), 95  }
   0x7   : > { %s652_s26 = smov (!%p193_p2), 96   ;;  %s653_s27 = smov (!%p193_p2), 110  }
   0x8   : > { %s654_s28 = smov (!%p193_p2), 111   ;;  %s655_s29 = smov (!%p193_p2), 112  }
   0x9   : > { %s656_s30 = smov (!%p193_p2), 126   ;;  %s657_s6 = smov (!%p193_p2), 127  }
   0xb   : > { %s798_s19 = smov (!%p228_p3, %s581_s19), 1  ;;  %v249_v5 = vlaneseq  ;;  %vm351_vm0 = vcmask 769024   ;;  %vm386_vm3 = vcmask 777216   ;;  %vm338_vm4 = vcmask 785408   ;;  %v392_v33 = vld [vmem:[%s785_s2] sm:$0xf] }
   0xc   : > { %s608_s20 = smul.u32 24, %s798_s19  ;;  %vm325_vm7 = vcmask 900096   ;;  %vm375_vm8 = vcmask 908288   ;;  %v658_v36 = vmov 0   ;;  %vm312_vm9 = vcmask 916480   ;;  %s607_s11 = sshll.u32 %s798_s19, 3 }
   0xd   : > { %v250_v6 = vand.u32 127, %v249_v5  ;;  %641 = vset.pattern.permute.xlu0 %v658_v36  ;;  %vm299_vm10 = vcmask 1031168   ;;  %vm364_vm11 = vcmask 1039360   ;;  %v391_v58 = vld [vmem:[%s784_s1] sm:$0xf]  ;;  %vm398_vm12 = vcmask 588800   ;;  %s237_s14 = scalar_lea.vmem %s786_s3, %s607_s11 }
   0xe   : > { %s232_s23 = scalar_lea.vmem %s783_s0, %s608_s20  ;;  %vm445_vm13 = vcmask 1043456   ;;  %s589_s15 = sshll.u32 %s798_s19, 2  ;;  %vm454_vm14 = vcmask 3072  }
   0xf   : > { %v248_v0 = vld [vmem:[%s232_s23 + $0x10] sm:$0xff]  ;;  %v703_v1 = vld [vmem:[%s232_s23] sm:$0xff]  ;;  %v706_v2 = vld [vmem:[%s232_s23 + $0x8] sm:$0xff]  ;;  %v251_v8 = vadd.s32 128, %v250_v6  ;;  %v256_v11 = vand.u32 15, %v250_v6  ;;  %s241_s20 = scalar_lea.vmem %s787_s4, %s589_s15  ;;  %s245_s23 = scalar_lea.vmem %s788_s5, %s589_s15 }
  0x10   : > { %349 = vrot.lane.b32.xlu1 %v248_v0, %s650_s24  ;;  %345 = vrot.lane.b32.xlu0 %v703_v1, %s650_s24  ;;  %v626_v3 = vpack.i.bf16 %v706_v2, %v703_v1 }
  0x11   : > { %384 = vrot.lane.b32.xlu2 %v248_v0, %s651_s25  ;;  %v263_v12 = vand.u32 15, %v251_v8  ;;  %vm719_vm1 = vcmp.ne.s32.totalorder %v256_v11, 15  ;;  %vm731_vm5 = vcmp.ne.s32.totalorder %v256_v11, 0 }
  0x13   : > { %vm723_vm2 = vcmp.ne.s32.totalorder %v263_v12, 15  ;;  %vm735_vm6 = vcmp.ne.s32.totalorder %v263_v12, 0 }
  0x18   : > { %627 = vrot.lane.b32.xlu1 %v626_v3, %s651_s25  ;;  %347 = vrot.lane.b32.xlu0 %v706_v2, %s650_s24 }
  0x19   : > { %332 = vrot.lane.b32.xlu2 %v703_v1, %s652_s26 }
  0x20   : > { %336 = vrot.lane.b32.xlu1 %v248_v0, %s652_s26  ;;  %334 = vrot.lane.b32.xlu0 %v706_v2, %s652_s26 }
  0x21   : > { %319 = vrot.lane.b32.xlu2 %v703_v1, %s653_s27 }
  0x28   : > { %323 = vrot.lane.b32.xlu1 %v248_v0, %s653_s27  ;;  %321 = vrot.lane.b32.xlu0 %v706_v2, %s653_s27 }
  0x29   : > { %632 = vrot.lane.b32.xlu2 %v626_v3, %s654_s28 }
  0x30   : > { %306 = vrot.lane.b32.xlu1 %v703_v1, %s655_s29  ;;  %373 = vrot.lane.b32.xlu0 %v248_v0, %s654_s28 }
  0x31   : > { %308 = vrot.lane.b32.xlu2 %v706_v2, %s655_s29 }
  0x38   : > { %293 = vrot.lane.b32.xlu1 %v703_v1, %s656_s30  ;;  %310 = vrot.lane.b32.xlu0 %v248_v0, %s655_s29 }
  0x39   : > { %295 = vrot.lane.b32.xlu2 %v706_v2, %s656_s30 }
  0x40   : > { %637 = vrot.lane.b32.xlu1 %v626_v3, %s657_s6  ;;  %297 = vrot.lane.b32.xlu0 %v248_v0, %s656_s30 }
  0x41   : > { %362 = vrot.lane.b32.xlu2 %v248_v0, %s657_s6 }
  0x48   : > { %395 = vperm.xlu0 %641, %v392_v33  }
  0x6b   : > { %v385_v4 = vpop.permute.xlu2 %384 }
  0x73   : > { %v333_v7 = vpop.permute.xlu2 %332 }
  0x7b   : > { %v320_v15 = vpop.permute.xlu2 %319 }
  0x82   : > { %v350_v9 = vpop.permute.xlu1 %349  ;;  %v346_v10 = vpop.permute.xlu0 %345 }
  0x83   : > { %v633_v30 = vpop.permute.xlu2 %632 }
  0x84   : > { %v635_v31 = vunpack.i.h.bf16 %v633_v30  ;;  %v634_v32 = vunpack.i.l.bf16 %v633_v30 }
  0x86   : > { %v376_v39 = vsel %vm375_vm8, %v634_v32, %v635_v31 }
  0x8a   : > { %v628_v16 = vpop.permute.xlu1 %627  ;;  %v348_v17 = vpop.permute.xlu0 %347 }
  0x8b   : > { %v630_v18 = vunpack.i.h.bf16 %v628_v16  ;;  %v629_v19 = vunpack.i.l.bf16 %v628_v16  ;;  %v352_v20 = vsel %vm351_vm0, %v346_v10, %v348_v17  ;;  %v353_v21 = vsel %vm351_vm0, %v348_v17, %v350_v9  ;;  %v309_v40 = vpop.permute.xlu2 %308 }
  0x8c   : > { %591 = vmatpush.msk.msra.mxu0 %vm719_vm1, %v352_v20  ;;  %598 = vmatpush.msk.msra.mxu1 %vm723_vm2, %v353_v21 }
  0x8d   : > { %v387_v22 = vsel %vm386_vm3, %v629_v19, %v630_v18  ;;  %v388_v23 = vsel %vm386_vm3, %v630_v18, %v385_v4 }
  0x8e   : > { %410 = vmatpush.msra.mxu0 %v387_v22  ;;  %430 = vmatpush.msra.mxu1 %v388_v23 }
  0x92   : > { %v337_v26 = vpop.permute.xlu1 %336  ;;  %v335_v27 = vpop.permute.xlu0 %334 }
  0x93   : > { %v339_v28 = vsel %vm338_vm4, %v333_v7, %v335_v27  ;;  %v340_v29 = vsel %vm338_vm4, %v335_v27, %v337_v26  ;;  %v296_v45 = vpop.permute.xlu2 %295 }
  0x94   : > { %592 = vmatpush.msk.msra.mxu0 %vm731_vm5, %v339_v28  ;;  %599 = vmatpush.msk.msra.mxu1 %vm735_vm6, %v340_v29 }
  0x9a   : > { %v324_v34 = vpop.permute.xlu1 %323  ;;  %v322_v35 = vpop.permute.xlu0 %321 }
  0x9b   : > { %v326_v37 = vsel %vm325_vm7, %v320_v15, %v322_v35  ;;  %v327_v38 = vsel %vm325_vm7, %v322_v35, %v324_v34  ;;  %v363_v50 = vpop.permute.xlu2 %362 }
  0x9c   : > { %593 = vmatpush.msk.msra.mxu0 %vm719_vm1, %v326_v37  ;;  %600 = vmatpush.msk.msra.mxu1 %vm723_vm2, %v327_v38 }
  0x9e   : > { %413 = vmatpush.msra.mxu0 %v376_v39 }
  0xa2   : > { %v307_v41 = vpop.permute.xlu1 %306  ;;  %v374_v42 = vpop.permute.xlu0 %373 }
  0xa3   : > { %v313_v43 = vsel %vm312_vm9, %v307_v41, %v309_v40  ;;  %v377_v44 = vsel %vm375_vm8, %v635_v31, %v374_v42 }
  0xa4   : > { %594 = vmatpush.msk.msra.mxu0 %vm731_vm5, %v313_v43  ;;  %433 = vmatpush.msra.mxu1 %v377_v44 }
  0xaa   : > { %v294_v46 = vpop.permute.xlu1 %293  ;;  %v311_v47 = vpop.permute.xlu0 %310 }
  0xab   : > { %v300_v48 = vsel %vm299_vm10, %v294_v46, %v296_v45  ;;  %v314_v49 = vsel %vm312_vm9, %v309_v40, %v311_v47 }
  0xac   : > { %595 = vmatpush.msk.msra.mxu0 %vm719_vm1, %v300_v48  ;;  %601 = vmatpush.msk.msra.mxu1 %vm735_vm6, %v314_v49 }
  0xb2   : > { %v638_v51 = vpop.permute.xlu1 %637  ;;  %v298_v52 = vpop.permute.xlu0 %297 }
  0xb3   : > { %v640_v53 = vunpack.i.h.bf16 %v638_v51  ;;  %v639_v54 = vunpack.i.l.bf16 %v638_v51  ;;  %v301_v55 = vsel %vm299_vm10, %v296_v45, %v298_v52 }
  0xb4   : > { %602 = vmatpush.msk.msra.mxu1 %vm723_vm2, %v301_v55 }
  0xb5   : > { %v365_v56 = vsel %vm364_vm11, %v639_v54, %v640_v53  ;;  %v366_v57 = vsel %vm364_vm11, %v640_v53, %v363_v50 }
  0xb6   : > { %416 = vmatpush.msra.mxu0 %v365_v56  ;;  %436 = vmatpush.msra.mxu1 %v366_v57 }
  0xb8   : > { %596 = vmatpush.msk.msra.mxu0 %vm731_vm5, %v703_v1  ;;  %603 = vmatpush.msk.msra.mxu1 %vm735_vm6, %v706_v2 }
  0xb9   : > { %597 = vmatmul.msk.f32.vlgmr.msra.gmra.mxu0 %vm398_vm12, %v391_v58  ;;  %604 = vmatmul.msk.f32.vlgmr.msra.gmra.mxu1 %vm398_vm12, %v391_v58 }
  0xba   : > { %v396_v59 = vpop.permute.xlu0 %395 }
 0x136   : > { %v419_v60 = vpop.f32.mrf.mxu0  ;;  %v439_v61 = vpop.f32.mrf.mxu1 }
 0x137   : > { %v420_v62 = vadd.f32 %v419_v60, %v396_v59  ;;  %v440_v63 = vadd.f32 %v439_v61, %v396_v59 }
 0x139   : > { %v444_v0 = vrot.slane %v440_v63, 4  ;;  %v449_v1 = vsel %vm445_vm13, %v420_v62, 0.0  ;;  %v450_v3 = vsel %vm445_vm13, %v440_v63, 0.0  ;;  %v456_v4 = vmul.f32 %v420_v62, %v420_v62 }
 0x13a   : > { %v451_v5 = vadd.f32 %v450_v3, %v449_v1  ;;  %v457_v2 = vmul.f32 %v440_v63, %v440_v63 }
 0x13b   : > { %v446_v6 = vsel %vm445_vm13, %v420_v62, %v444_v0  ;;  %v458_v7 = vsel %vm445_vm13, %v456_v4, 0.0 }
 0x13c   : > { %448 = vst [vmem:[%s237_s14] sm:$0xff] %v446_v6  ;;  %452 = vadd.xlane.f32.xlu1 %v451_v5  ;;  %v459_v8 = vsel %vm445_vm13, %v457_v2, 0.0 }
 0x13d   : > { %v460_v9 = vadd.f32 %v459_v8, %v458_v7 }
 0x13f   : > { %461 = vadd.xlane.f32.xlu2 %v460_v9 }
 0x1af   : > { %v453_v10 = vpop.xlane.xlu1 %452 }
 0x1b0   : > { %455 = vst.msk [vmem:[%s241_s20] sm:$0xf] %vm454_vm14, %v453_v10 }
 0x1b2   : > { %v462_v11 = vpop.xlane.xlu2 %461 }
 0x1b3   : > { %463 = vst.msk [vmem:[%s245_s23] sm:$0xf] %vm454_vm14, %v462_v11 }
 0x1b4 PF: > { %s16_s18 = sadd.s32 1, %s648_s18  }
 0x1b5   : > { %p13_p4 = scmp.ge.s32.totalorder %s16_s18, 4  }
 0x1b7   :  { %15 = sbr.rel (!%p13_p4) target bundleno = 1 (0x1), region = 86 }

// kernel: generator_forward.48
= control target key start
LH: loop header
LB: loop body
LE: loop exit
PB: predicated region body
PF: predicated region fallthrough
CT: control target
= control target key end

     0   :  { %s744_s23 = smov 0   ;;  %s840_s0 = inlined_call_operand.<no memory space> [shape: f32[1,1], index: 0, kind: input, shape index: {}]   ;;  %s841_s1 = inlined_call_operand.vmem [shape: f32[2,8,290], index: 1, kind: input, shape index: {}]   ;;  %s842_s2 = inlined_call_operand.vmem [shape: f32[4,72], index: 2, kind: input, shape index: {}]   ;;  %s843_s3 = inlined_call_operand.vmem [shape: f32[4,1], index: 3, kind: input, shape index: {}]   ;;  %s844_s4 = inlined_call_operand.vmem [shape: f32[2,4,256], index: 4, kind: output, shape index: {0}]   ;;  %s845_s5 = inlined_call_operand.vmem [shape: f32[2,4,1], index: 5, kind: output, shape index: {1}]   ;;  %s846_s6 = inlined_call_operand.vmem [shape: f32[2,4,1], index: 6, kind: output, shape index: {2}]  }
   0x1   :  { %v12_v0 = vstv %s840_s0 }
   0x2   :  { %13 = vst [vmem:[#allocation2] sm:$0x1] %v12_v0 }
   0x3 LB: > { %s626_s24 = sadd.s32 4294967295, %s695_s23   ;;  %p630_p0 = scmp.ge.s32.totalorder %s695_s23, 1  ;;  %s695_s23 = sphi %s744_s23, %s19_s23  }
   0x4   : > { %p219_p1 = scmp.lt.s32.totalorder %s695_s23, 3 }
   0x6   : > { %p220_p2 = pnand %p630_p0, %p219_p1 }
   0x7   : > { %p257_p3 = scmp.lt.s32.totalorder (!%p220_p2), %s626_s24, 1  ;;  %s698_s28 = smov (!%p220_p2), 94  }
   0x8   : > { %223 = sbr.rel (%p220_p2) target bundleno = 552 (0x228), region = 36  ;;  %s699_s29 = smov (!%p220_p2), 95  }
   0x9   : > { %s700_s30 = smov (!%p220_p2), 96   ;;  %s701_s7 = smov (!%p220_p2), 110  }
   0xa   : > { %s702_s8 = smov (!%p220_p2), 111   ;;  %s703_s9 = smov (!%p220_p2), 112  }
   0xb   : > { %s704_s10 = smov (!%p220_p2), 126   ;;  %s705_s11 = smov (!%p220_p2), 127  }
   0xd   : > { %v688_v1 = vld [vmem:[#allocation2] ss:$0 sm:$0xff]  ;;  %v697_v2 = vmov 0   ;;  %s856_s24 = smov (!%p257_p3, %s626_s24), 1  ;;  %v294_v16 = vlaneseq  ;;  %vm396_vm3 = vcmask 769024   ;;  %vm431_vm5 = vcmask 777216  }
   0xe   : > { %671 = vset.pattern.permute.xlu0 %v697_v2  ;;  %687 = vset.pattern.permute.xlu1 %v697_v2  ;;  %s653_s0 = smul.u32 24, %s856_s24  ;;  %vm383_vm7 = vcmask 785408   ;;  %vm370_vm10 = vcmask 900096   ;;  %v437_v42 = vld [vmem:[%s843_s3] sm:$0xf]  ;;  %vm420_vm11 = vcmask 908288  }
   0xf   : > { %285 = vperm.xlu0 %671, %v688_v1   ;;  %v295_v17 = vand.u32 127, %v294_v16  ;;  %vm357_vm12 = vcmask 916480   ;;  %vm344_vm13 = vcmask 1031168   ;;  %vm409_vm14 = vcmask 1039360   ;;  %v436_v63 = vld [vmem:[%s842_s2] sm:$0xf] }
  0x10   : > { %s261_s27 = scalar_lea.vmem %s841_s1, %s653_s0  ;;  %vm443_vm15 = vcmask 588800   ;;  %s652_s16 = sshll.u32 %s856_s24, 3 }
  0x11   : > { %v275_v3 = vld [vmem:[%s261_s27] sm:$0xff]  ;;  %v276_v4 = vld [vmem:[%s261_s27 + $0x8] sm:$0xff]  ;;  %v277_v10 = vld [vmem:[%s261_s27 + $0x10] sm:$0xff]  ;;  %v301_v19 = vand.u32 15, %v295_v17  ;;  %v296_v23 = vadd.s32 128, %v295_v17  ;;  %s266_s19 = scalar_lea.vmem %s844_s4, %s652_s16  ;;  %s634_s20 = sshll.u32 %s856_s24, 2 }
  0x12   : > { %vm278_vm0 = vcmp.ge.f32.partialorder %v275_v3, 0.0  ;;  %vm279_vm1 = vcmp.ge.f32.partialorder %v276_v4, 0.0  ;;  %vm280_vm2 = vcmp.ge.f32.partialorder %v277_v10, 0.0  ;;  %s270_s0 = scalar_lea.vmem %s845_s5, %s634_s20  ;;  %s274_s27 = scalar_lea.vmem %s846_s6, %s634_s20 }
  0x13   : > { %vm774_vm4 = vcmp.ne.s32.totalorder %v301_v19, 15  ;;  %v308_v28 = vand.u32 15, %v296_v23  ;;  %vm788_vm8 = vcmp.ne.s32.totalorder %v301_v19, 0 }
  0x15   : > { %vm781_vm6 = vcmp.ne.s32.totalorder %v308_v28, 15  ;;  %vm792_vm9 = vcmp.ne.s32.totalorder %v308_v28, 0 }
  0x81   : > { %v286_v5 = vpop.permute.xlu0 %285 }
  0x82   : > { %v288_v6 = vmul.f32 %v286_v5, %v275_v3  ;;  %v289_v7 = vmul.f32 %v286_v5, %v276_v4  ;;  %v290_v12 = vmul.f32 %v286_v5, %v277_v10 }
  0x84   : > { %v758_v8 = vsel %vm278_vm0, %v275_v3, %v288_v6  ;;  %v760_v9 = vsel %vm279_vm1, %v276_v4, %v289_v7  ;;  %v293_v13 = vsel %vm280_vm2, %v277_v10, %v290_v12  ;;  %vm490_vm0 = vcmask 1043456  }
  0x85   : > { %392 = vrot.lane.b32.xlu1 %v760_v9, %s698_s28  ;;  %390 = vrot.lane.b32.xlu0 %v758_v8, %s698_s28  ;;  %v672_v11 = vpack.i.bf16 %v760_v9, %v758_v8  ;;  %vm499_vm1 = vcmask 3072  }
  0x87   : > { %673 = vrot.lane.b32.xlu2 %v672_v11, %s699_s29 }
  0x8d   : > { %394 = vrot.lane.b32.xlu1 %v293_v13, %s698_s28  ;;  %377 = vrot.lane.b32.xlu0 %v758_v8, %s700_s30 }
  0x8f   : > { %429 = vrot.lane.b32.xlu2 %v293_v13, %s699_s29 }
  0x95   : > { %379 = vrot.lane.b32.xlu1 %v760_v9, %s700_s30  ;;  %364 = vrot.lane.b32.xlu0 %v758_v8, %s701_s7 }
  0x97   : > { %381 = vrot.lane.b32.xlu2 %v293_v13, %s700_s30 }
  0x9d   : > { %366 = vrot.lane.b32.xlu1 %v760_v9, %s701_s7  ;;  %678 = vrot.lane.b32.xlu0 %v672_v11, %s702_s8 }
  0x9f   : > { %368 = vrot.lane.b32.xlu2 %v293_v13, %s701_s7 }
  0xa5   : > { %418 = vrot.lane.b32.xlu1 %v293_v13, %s702_s8  ;;  %353 = vrot.lane.b32.xlu0 %v760_v9, %s703_s9 }
  0xa7   : > { %351 = vrot.lane.b32.xlu2 %v758_v8, %s703_s9 }
  0xad   : > { %355 = vrot.lane.b32.xlu1 %v293_v13, %s703_s9  ;;  %340 = vrot.lane.b32.xlu0 %v760_v9, %s704_s10 }
  0xaf   : > { %338 = vrot.lane.b32.xlu2 %v758_v8, %s704_s10 }
  0xb5   : > { %342 = vrot.lane.b32.xlu1 %v293_v13, %s704_s10  ;;  %407 = vrot.lane.b32.xlu0 %v293_v13, %s705_s11 }
  0xb7   : > { %683 = vrot.lane.b32.xlu2 %v672_v11, %s705_s11 }
  0xbd   : > { %440 = vperm.xlu1 %687, %v437_v42  }
  0xe1   : > { %v674_v14 = vpop.permute.xlu2 %673 }
  0xe2   : > { %v676_v20 = vunpack.i.h.bf16 %v674_v14  ;;  %v675_v21 = vunpack.i.l.bf16 %v674_v14 }
  0xe4   : > { %v432_v27 = vsel %vm431_vm5, %v675_v21, %v676_v20 }
  0xe9   : > { %v430_v15 = vpop.permute.xlu2 %429 }
  0xea   : > { %v433_v34 = vsel %vm431_vm5, %v676_v20, %v430_v15 }
  0xf1   : > { %v382_v18 = vpop.permute.xlu2 %381 }
  0xf7   : > { %v393_v24 = vpop.permute.xlu1 %392  ;;  %v391_v25 = vpop.permute.xlu0 %390 }
  0xf8   : > { %v397_v26 = vsel %vm396_vm3, %v391_v25, %v393_v24 }
  0xf9   : > { %636 = vmatpush.msk.msra.mxu0 %vm774_vm4, %v397_v26  ;;  %v369_v29 = vpop.permute.xlu2 %368 }
  0xfb   : > { %455 = vmatpush.msra.mxu0 %v432_v27 }
  0xff   : > { %v395_v31 = vpop.permute.xlu1 %394  ;;  %v378_v32 = vpop.permute.xlu0 %377 }
 0x100   : > { %v398_v33 = vsel %vm396_vm3, %v393_v24, %v395_v31 }
 0x101   : > { %643 = vmatpush.msk.msra.mxu1 %vm781_vm6, %v398_v33  ;;  %v352_v35 = vpop.permute.xlu2 %351 }
 0x103   : > { %475 = vmatpush.msra.mxu1 %v433_v34 }
 0x107   : > { %v380_v38 = vpop.permute.xlu1 %379  ;;  %v365_v39 = vpop.permute.xlu0 %364 }
 0x108   : > { %v384_v40 = vsel %vm383_vm7, %v378_v32, %v380_v38  ;;  %v385_v41 = vsel %vm383_vm7, %v380_v38, %v382_v18 }
 0x109   : > { %637 = vmatpush.msk.msra.mxu0 %vm788_vm8, %v384_v40  ;;  %644 = vmatpush.msk.msra.mxu1 %vm792_vm9, %v385_v41  ;;  %v339_v49 = vpop.permute.xlu2 %338 }
 0x10f   : > { %v367_v43 = vpop.permute.xlu1 %366  ;;  %v679_v44 = vpop.permute.xlu0 %678 }
 0x110   : > { %v681_v45 = vunpack.i.h.bf16 %v679_v44  ;;  %v680_v46 = vunpack.i.l.bf16 %v679_v44  ;;  %v371_v47 = vsel %vm370_vm10, %v365_v39, %v367_v43  ;;  %v372_v48 = vsel %vm370_vm10, %v367_v43, %v369_v29 }
 0x111   : > { %638 = vmatpush.msk.msra.mxu0 %vm774_vm4, %v371_v47  ;;  %645 = vmatpush.msk.msra.mxu1 %vm781_vm6, %v372_v48  ;;  %v684_v55 = vpop.permute.xlu2 %683 }
 0x112   : > { %v421_v50 = vsel %vm420_vm11, %v680_v46, %v681_v45  ;;  %v686_v56 = vunpack.i.h.bf16 %v684_v55  ;;  %v685_v57 = vunpack.i.l.bf16 %v684_v55 }
 0x113   : > { %458 = vmatpush.msra.mxu0 %v421_v50 }
 0x114   : > { %v410_v62 = vsel %vm409_vm14, %v685_v57, %v686_v56 }
 0x117   : > { %v419_v51 = vpop.permute.xlu1 %418  ;;  %v354_v52 = vpop.permute.xlu0 %353 }
 0x118   : > { %v358_v53 = vsel %vm357_vm12, %v352_v35, %v354_v52  ;;  %v422_v54 = vsel %vm420_vm11, %v681_v45, %v419_v51 }
 0x119   : > { %639 = vmatpush.msk.msra.mxu0 %vm788_vm8, %v358_v53  ;;  %478 = vmatpush.msra.mxu1 %v422_v54 }
 0x11f   : > { %v356_v58 = vpop.permute.xlu1 %355  ;;  %v341_v59 = vpop.permute.xlu0 %340 }
 0x120   : > { %v345_v60 = vsel %vm344_vm13, %v339_v49, %v341_v59  ;;  %v359_v61 = vsel %vm357_vm12, %v354_v52, %v356_v58 }
 0x121   : > { %640 = vmatpush.msk.msra.mxu0 %vm774_vm4, %v345_v60  ;;  %646 = vmatpush.msk.msra.mxu1 %vm792_vm9, %v359_v61 }
 0x123   : > { %461 = vmatpush.msra.mxu0 %v410_v62 }
 0x125   : > { %641 = vmatpush.msk.msra.mxu0 %vm788_vm8, %v758_v8 }
 0x126   : > { %642 = vmatmul.msk.f32.vlgmr.msra.gmra.mxu0 %vm443_vm15, %v436_v63 }
 0x127   : > { %v343_v0 = vpop.permute.xlu1 %342  ;;  %v408_v1 = vpop.permute.xlu0 %407 }
 0x128   : > { %v346_v2 = vsel %vm344_vm13, %v341_v59, %v343_v0  ;;  %v411_v3 = vsel %vm409_vm14, %v686_v56, %v408_v1 }
 0x129   : > { %647 = vmatpush.msk.msra.mxu1 %vm781_vm6, %v346_v2 }
 0x12b   : > { %481 = vmatpush.msra.mxu1 %v411_v3 }
 0x12d   : > { %648 = vmatpush.msk.msra.mxu1 %vm792_vm9, %v760_v9 }
 0x12e   : > { %649 = vmatmul.msk.f32.vlgmr.msra.gmra.mxu1 %vm443_vm15, %v436_v63 }
 0x12f   : > { %v441_v4 = vpop.permute.xlu1 %440 }
 0x1a3   : > { %v464_v5 = vpop.f32.mrf.mxu0 }
 0x1a4   : > { %v465_v6 = vadd.f32 %v464_v5, %v441_v4 }
 0x1a6   : > { %v501_v7 = vmul.f32 %v465_v6, %v465_v6  ;;  %v494_v11 = vsel %vm490_vm0, %v465_v6, 0.0 }
 0x1a8   : > { %v503_v15 = vsel %vm490_vm0, %v501_v7, 0.0 }
 0x1ab   : > { %v484_v8 = vpop.f32.mrf.mxu1 }
 0x1ac   : > { %v485_v10 = vadd.f32 %v484_v8, %v441_v4 }
 0x1ae   : > { %v489_v12 = vrot.slane %v485_v10, 4  ;;  %v495_v13 = vsel %vm490_vm0, %v485_v10, 0.0  ;;  %v502_v14 = vmul.f32 %v485_v10, %v485_v10 }
 0x1af   : > { %v496_v9 = vadd.f32 %v495_v13, %v494_v11 }
 0x1b0   : > { %v491_v16 = vsel %vm490_vm0, %v465_v6, %v489_v12  ;;  %v504_v17 = vsel %vm490_vm0, %v502_v14, 0.0 }
 0x1b1   : > { %497 = vadd.xlane.f32.xlu2 %v496_v9  ;;  %493 = vst [vmem:[%s266_s19] sm:$0xff] %v491_v16  ;;  %v505_v18 = vadd.f32 %v504_v17, %v503_v15 }
 0x1b3   : > { %506 = vadd.xlane.f32.xlu0 %v505_v18 }
 0x224   : > { %v498_v19 = vpop.xlane.xlu2 %497 }
 0x225   : > { %500 = vst.msk [vmem:[%s270_s0] sm:$0xf] %vm499_vm1, %v498_v19 }
 0x226   : > { %v507_v20 = vpop.xlane.xlu0 %506 }
 0x227   : > { %508 = vst.msk [vmem:[%s274_s27] sm:$0xf] %vm499_vm1, %v507_v20 }
 0x228 PF: > { %s19_s23 = sadd.s32 1, %s695_s23  }
 0x229   : > { %p16_p4 = scmp.ge.s32.totalorder %s19_s23, 4  }
 0x22b   :  { %18 = sbr.rel (!%p16_p4) target bundleno = 3 (0x3), region = 90 }

// kernel: generator_forward.42
= control target key start
LH: loop header
LB: loop body
LE: loop exit
PB: predicated region body
PF: predicated region fallthrough
CT: control target
= control target key end

     0   :  { %s796_s23 = smov 0   ;;  %s934_s0 = inlined_call_operand.<no memory space> [shape: f32[1,1], index: 0, kind: input, shape index: {}]   ;;  %s935_s1 = inlined_call_operand.vmem [shape: f32[2,8,290], index: 1, kind: input, shape index: {}]   ;;  %s936_s2 = inlined_call_operand.vmem [shape: f32[16,72], index: 2, kind: input, shape index: {}]   ;;  %s937_s3 = inlined_call_operand.vmem [shape: f32[16,1], index: 3, kind: input, shape index: {}]   ;;  %s938_s4 = inlined_call_operand.vmem [shape: f32[2,16,256], index: 4, kind: output, shape index: {0}]   ;;  %s939_s5 = inlined_call_operand.vmem [shape: f32[2,16,1], index: 5, kind: output, shape index: {1}]   ;;  %s940_s6 = inlined_call_operand.vmem [shape: f32[2,16,1], index: 6, kind: output, shape index: {2}]  }
   0x1   :  { %v12_v0 = vstv %s934_s0 }
   0x2   :  { %13 = vst [vmem:[#allocation2] sm:$0x1] %v12_v0 }
   0x3 LB: > { %s653_s24 = sadd.s32 4294967295, %s747_s23   ;;  %p657_p0 = scmp.ge.s32.totalorder %s747_s23, 1  ;;  %s747_s23 = sphi %s796_s23, %s19_s23  }
   0x4   : > { %p219_p1 = scmp.lt.s32.totalorder %s747_s23, 3 }
   0x6   : > { %p220_p2 = pnand %p657_p0, %p219_p1 }
   0x7   : > { %p259_p3 = scmp.lt.s32.totalorder (!%p220_p2), %s653_s24, 1  ;;  %s750_s28 = smov (!%p220_p2), 94  }
   0x8   : > { %223 = sbr.rel (%p220_p2) target bundleno = 559 (0x22f), region = 36  ;;  %s751_s29 = smov (!%p220_p2), 95  }
   0x9   : > { %s752_s30 = smov (!%p220_p2), 96   ;;  %s753_s7 = smov (!%p220_p2), 110  }
   0xa   : > { %s754_s8 = smov (!%p220_p2), 111   ;;  %s755_s9 = smov (!%p220_p2), 112  }
   0xb   : > { %s756_s10 = smov (!%p220_p2), 126   ;;  %s757_s11 = smov (!%p220_p2), 127  }
   0xd   : > { %v740_v1 = vld [vmem:[#allocation2] ss:$0 sm:$0xff]  ;;  %v749_v2 = vmov 0   ;;  %s950_s24 = smov (!%p259_p3, %s653_s24), 1  ;;  %v298_v16 = vlaneseq  ;;  %vm400_vm3 = vcmask 769024   ;;  %vm435_vm5 = vcmask 777216  }
   0xe   : > { %722 = vset.pattern.permute.xlu0 %v749_v2  ;;  %738 = vset.pattern.permute.xlu1 %v749_v2  ;;  %s704_s0 = smul.u32 24, %s950_s24  ;;  %vm387_vm7 = vcmask 785408   ;;  %vm374_vm10 = vcmask 900096   ;;  %v442_v42 = vld [vmem:[%s937_s3] sm:$0xff]  ;;  %v443_v43 = vld [vmem:[%s937_s3 + $0x8] sm:$0xff]  ;;  %vm424_vm11 = vcmask 908288  }
   0xf   : > { %289 = vperm.xlu0 %722, %v740_v1   ;;  %739 = vset.pattern.permute.xlu2 %v749_v2  ;;  %v299_v17 = vand.u32 127, %v298_v16  ;;  %vm361_vm12 = vcmask 916480   ;;  %vm348_vm13 = vcmask 1031168   ;;  %vm413_vm14 = vcmask 1039360   ;;  %v440_v0 = vld [vmem:[%s936_s2] sm:$0xff]  ;;  %v441_v1 = vld [vmem:[%s936_s2 + $0x8] sm:$0xff] }
  0x10   : > { %s263_s27 = scalar_lea.vmem %s935_s1, %s704_s0  ;;  %vm454_vm15 = vcmask 588800   ;;  %s683_s20 = sshll.u32 %s950_s24, 5 }
  0x11   : > { %v279_v3 = vld [vmem:[%s263_s27] sm:$0xff]  ;;  %v280_v4 = vld [vmem:[%s263_s27 + $0x8] sm:$0xff]  ;;  %v281_v10 = vld [vmem:[%s263_s27 + $0x10] sm:$0xff]  ;;  %v305_v19 = vand.u32 15, %v299_v17  ;;  %v300_v23 = vadd.s32 128, %v299_v17  ;;  %s268_s0 = scalar_lea.vmem %s938_s4, %s683_s20  ;;  %s684_s25 = sshll.u32 %s950_s24, 4 }
  0x12   : > { %vm282_vm0 = vcmp.ge.f32.partialorder %v279_v3, 0.0  ;;  %vm283_vm1 = vcmp.ge.f32.partialorder %v280_v4, 0.0  ;;  %vm284_vm2 = vcmp.ge.f32.partialorder %v281_v10, 0.0 }
  0x13   : > { %vm826_vm4 = vcmp.ne.s32.totalorder %v305_v19, 15  ;;  %v312_v28 = vand.u32 15, %v300_v23  ;;  %vm844_vm8 = vcmp.ne.s32.totalorder %v305_v19, 0 }
  0x15   : > { %vm835_vm6 = vcmp.ne.s32.totalorder %v312_v28, 15  ;;  %vm848_vm9 = vcmp.ne.s32.totalorder %v312_v28, 0 }
  0x81   : > { %v290_v5 = vpop.permute.xlu0 %289 }
  0x82   : > { %v292_v6 = vmul.f32 %v290_v5, %v279_v3  ;;  %v293_v7 = vmul.f32 %v290_v5, %v280_v4  ;;  %v294_v12 = vmul.f32 %v290_v5, %v281_v10 }
  0x84   : > { %v810_v8 = vsel %vm282_vm0, %v279_v3, %v292_v6  ;;  %v812_v9 = vsel %vm283_vm1, %v280_v4, %v293_v7  ;;  %v297_v13 = vsel %vm284_vm2, %v281_v10, %v294_v12  ;;  %vm517_vm0 = vcmask 7168  }
  0x85   : > { %396 = vrot.lane.b32.xlu1 %v812_v9, %s750_s28  ;;  %394 = vrot.lane.b32.xlu0 %v810_v8, %s750_s28  ;;  %v723_v11 = vpack.i.bf16 %v812_v9, %v810_v8 }
  0x87   : > { %724 = vrot.lane.b32.xlu2 %v723_v11, %s751_s29 }
  0x8d   : > { %398 = vrot.lane.b32.xlu1 %v297_v13, %s750_s28  ;;  %381 = vrot.lane.b32.xlu0 %v810_v8, %s752_s30  ;;  %s273_s28 = scalar_lea.vmem %s939_s5, %s684_s25 }
  0x8f   : > { %433 = vrot.lane.b32.xlu2 %v297_v13, %s751_s29 }
  0x95   : > { %383 = vrot.lane.b32.xlu1 %v812_v9, %s752_s30  ;;  %368 = vrot.lane.b32.xlu0 %v810_v8, %s753_s7 }
  0x97   : > { %385 = vrot.lane.b32.xlu2 %v297_v13, %s752_s30 }
  0x9d   : > { %370 = vrot.lane.b32.xlu1 %v812_v9, %s753_s7  ;;  %729 = vrot.lane.b32.xlu0 %v723_v11, %s754_s8 }
  0x9f   : > { %372 = vrot.lane.b32.xlu2 %v297_v13, %s753_s7  ;;  %s278_s7 = scalar_lea.vmem %s940_s6, %s684_s25 }
  0xa5   : > { %422 = vrot.lane.b32.xlu1 %v297_v13, %s754_s8  ;;  %357 = vrot.lane.b32.xlu0 %v812_v9, %s755_s9 }
  0xa7   : > { %355 = vrot.lane.b32.xlu2 %v810_v8, %s755_s9 }
  0xad   : > { %359 = vrot.lane.b32.xlu1 %v297_v13, %s755_s9  ;;  %344 = vrot.lane.b32.xlu0 %v812_v9, %s756_s10 }
  0xaf   : > { %342 = vrot.lane.b32.xlu2 %v810_v8, %s756_s10 }
  0xb5   : > { %346 = vrot.lane.b32.xlu1 %v297_v13, %s756_s10  ;;  %411 = vrot.lane.b32.xlu0 %v297_v13, %s757_s11 }
  0xb7   : > { %734 = vrot.lane.b32.xlu2 %v723_v11, %s757_s11 }
  0xbd   : > { %446 = vperm.xlu1 %738, %v442_v42  }
  0xbf   : > { %451 = vperm.xlu2 %739, %v443_v43  }
  0xe1   : > { %v725_v14 = vpop.permute.xlu2 %724 }
  0xe2   : > { %v727_v20 = vunpack.i.h.bf16 %v725_v14  ;;  %v726_v21 = vunpack.i.l.bf16 %v725_v14 }
  0xe4   : > { %v436_v27 = vsel %vm435_vm5, %v726_v21, %v727_v20 }
  0xe9   : > { %v434_v15 = vpop.permute.xlu2 %433 }
  0xea   : > { %v437_v34 = vsel %vm435_vm5, %v727_v20, %v434_v15 }
  0xf1   : > { %v386_v18 = vpop.permute.xlu2 %385 }
  0xf7   : > { %v397_v24 = vpop.permute.xlu1 %396  ;;  %v395_v25 = vpop.permute.xlu0 %394 }
  0xf8   : > { %v401_v26 = vsel %vm400_vm3, %v395_v25, %v397_v24 }
  0xf9   : > { %665 = vmatpush.msk.msra.mxu0 %vm826_vm4, %v401_v26  ;;  %686 = vmatpush.msk.msra.mxu2 %vm826_vm4, %v401_v26  ;;  %v373_v29 = vpop.permute.xlu2 %372 }
  0xfb   : > { %469 = vmatpush.msra.mxu0 %v436_v27  ;;  %687 = vmatpush.msra.mxu2 %v436_v27 }
  0xff   : > { %v399_v31 = vpop.permute.xlu1 %398  ;;  %v382_v32 = vpop.permute.xlu0 %381 }
 0x100   : > { %v402_v33 = vsel %vm400_vm3, %v397_v24, %v399_v31 }
 0x101   : > { %673 = vmatpush.msk.msra.mxu1 %vm835_vm6, %v402_v33  ;;  %695 = vmatpush.msk.msra.mxu3 %vm835_vm6, %v402_v33  ;;  %v356_v35 = vpop.permute.xlu2 %355 }
 0x103   : > { %492 = vmatpush.msra.mxu1 %v437_v34  ;;  %696 = vmatpush.msra.mxu3 %v437_v34 }
 0x107   : > { %v384_v37 = vpop.permute.xlu1 %383  ;;  %v369_v38 = vpop.permute.xlu0 %368 }
 0x108   : > { %v388_v40 = vsel %vm387_vm7, %v382_v32, %v384_v37  ;;  %v389_v41 = vsel %vm387_vm7, %v384_v37, %v386_v18 }
 0x109   : > { %666 = vmatpush.msk.msra.mxu0 %vm844_vm8, %v388_v40  ;;  %688 = vmatpush.msk.msra.mxu2 %vm844_vm8, %v388_v40  ;;  %v343_v50 = vpop.permute.xlu2 %342 }
 0x10a   : > { %674 = vmatpush.msk.msra.mxu1 %vm848_vm9, %v389_v41  ;;  %697 = vmatpush.msk.msra.mxu3 %vm848_vm9, %v389_v41 }
 0x10f   : > { %v371_v44 = vpop.permute.xlu1 %370  ;;  %v730_v45 = vpop.permute.xlu0 %729 }
 0x110   : > { %v732_v46 = vunpack.i.h.bf16 %v730_v45  ;;  %v731_v47 = vunpack.i.l.bf16 %v730_v45  ;;  %v375_v48 = vsel %vm374_vm10, %v369_v38, %v371_v44  ;;  %v376_v49 = vsel %vm374_vm10, %v371_v44, %v373_v29 }
 0x111   : > { %667 = vmatpush.msk.msra.mxu0 %vm826_vm4, %v375_v48  ;;  %689 = vmatpush.msk.msra.mxu2 %vm826_vm4, %v375_v48  ;;  %v735_v56 = vpop.permute.xlu2 %734 }
 0x112   : > { %675 = vmatpush.msk.msra.mxu1 %vm835_vm6, %v376_v49  ;;  %698 = vmatpush.msk.msra.mxu3 %vm835_vm6, %v376_v49  ;;  %v425_v51 = vsel %vm424_vm11, %v731_v47, %v732_v46  ;;  %v737_v57 = vunpack.i.h.bf16 %v735_v56  ;;  %v736_v58 = vunpack.i.l.bf16 %v735_v56 }
 0x113   : > { %472 = vmatpush.msra.mxu0 %v425_v51  ;;  %690 = vmatpush.msra.mxu2 %v425_v51 }
 0x114   : > { %v414_v63 = vsel %vm413_vm14, %v736_v58, %v737_v57 }
 0x117   : > { %v423_v52 = vpop.permute.xlu1 %422  ;;  %v358_v53 = vpop.permute.xlu0 %357 }
 0x118   : > { %v362_v54 = vsel %vm361_vm12, %v356_v35, %v358_v53  ;;  %v426_v55 = vsel %vm424_vm11, %v732_v46, %v423_v52 }
 0x119   : > { %668 = vmatpush.msk.msra.mxu0 %vm844_vm8, %v362_v54  ;;  %691 = vmatpush.msk.msra.mxu2 %vm844_vm8, %v362_v54  ;;  %v452_v10 = vpop.permute.xlu2 %451 }
 0x11a   : > { %495 = vmatpush.msra.mxu1 %v426_v55  ;;  %699 = vmatpush.msra.mxu3 %v426_v55 }
 0x11f   : > { %v360_v59 = vpop.permute.xlu1 %359  ;;  %v345_v60 = vpop.permute.xlu0 %344 }
 0x120   : > { %v349_v61 = vsel %vm348_vm13, %v343_v50, %v345_v60  ;;  %v363_v62 = vsel %vm361_vm12, %v358_v53, %v360_v59 }
 0x121   : > { %669 = vmatpush.msk.msra.mxu0 %vm826_vm4, %v349_v61  ;;  %692 = vmatpush.msk.msra.mxu2 %vm826_vm4, %v349_v61 }
 0x122   : > { %676 = vmatpush.msk.msra.mxu1 %vm848_vm9, %v363_v62  ;;  %700 = vmatpush.msk.msra.mxu3 %vm848_vm9, %v363_v62 }
 0x123   : > { %475 = vmatpush.msra.mxu0 %v414_v63  ;;  %693 = vmatpush.msra.mxu2 %v414_v63 }
 0x125   : > { %670 = vmatpush.msk.msra.mxu0 %vm844_vm8, %v810_v8  ;;  %694 = vmatpush.msk.msra.mxu2 %vm844_vm8, %v810_v8 }
 0x126   : > { %671 = vmatmul.msk.f32.vlgmr.msra.gmra.mxu0 %vm454_vm15, %v440_v0  ;;  %672 = vmatmul.msk.f32.vlgmr.msra.gmra.mxu2 %vm454_vm15, %v441_v1 }
 0x127   : > { %v347_v2 = vpop.permute.xlu1 %346  ;;  %v412_v3 = vpop.permute.xlu0 %411 }
 0x128   : > { %v350_v4 = vsel %vm348_vm13, %v345_v60, %v347_v2  ;;  %v415_v5 = vsel %vm413_vm14, %v737_v57, %v412_v3 }
 0x129   : > { %677 = vmatpush.msk.msra.mxu1 %vm835_vm6, %v350_v4  ;;  %701 = vmatpush.msk.msra.mxu3 %vm835_vm6, %v350_v4 }
 0x12b   : > { %498 = vmatpush.msra.mxu1 %v415_v5  ;;  %702 = vmatpush.msra.mxu3 %v415_v5 }
 0x12d   : > { %678 = vmatpush.msk.msra.mxu1 %vm848_vm9, %v812_v9  ;;  %703 = vmatpush.msk.msra.mxu3 %vm848_vm9, %v812_v9 }
 0x12e   : > { %679 = vmatmul.msk.f32.vlgmr.msra.gmra.mxu1 %vm454_vm15, %v440_v0  ;;  %680 = vmatmul.msk.f32.vlgmr.msra.gmra.mxu3 %vm454_vm15, %v441_v1 }
 0x12f   : > { %v447_v6 = vpop.permute.xlu1 %446 }
 0x1a3   : > { %v478_v7 = vpop.f32.mrf.mxu0 }
 0x1a4   : > { %v479_v8 = vadd.f32 %v478_v7, %v447_v6 }
 0x1a6   : > { %507 = vst [vmem:[%s268_s0] sm:$0xff] %v479_v8  ;;  %v520_v15 = vmul.f32 %v479_v8, %v479_v8 }
 0x1a9   : > { %v481_v11 = vpop.f32.mrf.mxu2 }
 0x1aa   : > { %v482_v12 = vadd.f32 %v481_v11, %v452_v10 }
 0x1ab   : > { %v501_v13 = vpop.f32.mrf.mxu1 }
 0x1ac   : > { %v502_v14 = vadd.f32 %v501_v13, %v447_v6  ;;  %509 = vst [vmem:[%s268_s0 + $0x10] sm:$0xff] %v482_v12  ;;  %v522_v20 = vmul.f32 %v482_v12, %v482_v12 }
 0x1ae   : > { %508 = vst [vmem:[%s268_s0 + $0x8] sm:$0xff] %v502_v14  ;;  %v511_v9 = vadd.f32 %v502_v14, %v479_v8  ;;  %v521_v16 = vmul.f32 %v502_v14, %v502_v14 }
 0x1b0   : > { %512 = vadd.xlane.f32.xlu0 %v511_v9  ;;  %v524_v17 = vadd.f32 %v521_v16, %v520_v15 }
 0x1b1   : > { %v504_v18 = vpop.f32.mrf.mxu3 }
 0x1b2   : > { %525 = vadd.xlane.f32.xlu2 %v524_v17  ;;  %v505_v19 = vadd.f32 %v504_v18, %v452_v10 }
 0x1b4   : > { %510 = vst [vmem:[%s268_s0 + $0x18] sm:$0xff] %v505_v19  ;;  %v514_v21 = vadd.f32 %v505_v19, %v482_v12  ;;  %v523_v22 = vmul.f32 %v505_v19, %v505_v19 }
 0x1b6   : > { %515 = vadd.xlane.f32.xlu1 %v514_v21  ;;  %v527_v23 = vadd.f32 %v523_v22, %v522_v20 }
 0x1ba   : > { %528 = vadd.xlane.f32.xlu2 %v527_v23 }
 0x223   : > { %v513_v24 = vpop.xlane.xlu0 %512 }
 0x224   : > { %518 = vst.msk [vmem:[%s273_s28] sm:$0xff] %vm517_vm0, %v513_v24 }
 0x225   : > { %v526_v25 = vpop.xlane.xlu2 %525 }
 0x226   : > { %530 = vst.msk [vmem:[%s278_s7] sm:$0xff] %vm517_vm0, %v526_v25 }
 0x229   : > { %v516_v26 = vpop.xlane.xlu1 %515 }
 0x22a   : > { %519 = vst.msk [vmem:[%s273_s28 + $0x8] sm:$0xff] %vm517_vm0, %v516_v26 }
 0x22d   : > { %v529_v27 = vpop.xlane.xlu2 %528 }
 0x22e   : > { %531 = vst.msk [vmem:[%s278_s7 + $0x8] sm:$0xff] %vm517_vm0, %v529_v27 }
 0x22f PF: > { %s19_s23 = sadd.s32 1, %s747_s23  }
 0x230   : > { %p16_p4 = scmp.ge.s32.totalorder %s19_s23, 4  }
 0x232   :  { %18 = sbr.rel (!%p16_p4) target bundleno = 3 (0x3), region = 90 }

// kernel: generator_forward.50
= control target key start
LH: loop header
LB: loop body
LE: loop exit
PB: predicated region body
PF: predicated region fallthrough
CT: control target
= control target key end

     0   :  { %s500_s20 = smov 0   ;;  %s532_s0 = inlined_call_operand.vmem [shape: f32[2,4,256], index: 0, kind: input, shape index: {}]   ;;  %s533_s1 = inlined_call_operand.vmem [shape: f32[1,4], index: 1, kind: input, shape index: {}]   ;;  %s534_s2 = inlined_call_operand.<no memory space> [shape: f32[1,1], index: 2, kind: input, shape index: {}]   ;;  %s535_s3 = inlined_call_operand.vmem [shape: f32[2,1,256], index: 3, kind: output, shape index: {0}]   ;;  %s536_s4 = inlined_call_operand.vmem [shape: f32[2,1,1], index: 4, kind: output, shape index: {1}]   ;;  %s537_s5 = inlined_call_operand.vmem [shape: f32[2,1,1], index: 5, kind: output, shape index: {2}]  }
   0x1   :  { %v11_v0 = vstv %s534_s2 }
   0x2   :  { %12 = vst [vmem:[#allocation2] sm:$0x1] %v11_v0 }
   0x3 LB: > { %s433_s21 = sadd.s32 4294967295, %s464_s20   ;;  %p437_p0 = scmp.ge.s32.totalorder %s464_s20, 1  ;;  %s464_s20 = sphi %s500_s20, %s18_s20  }
   0x4   : > { %p194_p1 = scmp.lt.s32.totalorder %s464_s20, 3 }
   0x6   : > { %p195_p2 = pnand %p437_p0, %p194_p1 }
   0x7   : > { %p227_p3 = scmp.lt.s32.totalorder (!%p195_p2), %s433_s21, 1 }
   0x8   : > { %198 = sbr.rel (%p195_p2) target bundleno = 277 (0x115), region = 32 }
   0xd   : > { %v466_v1 = vmov 0   ;;  %v244_v2 = vld [vmem:[#allocation2] sm:$0x1]  ;;  %s539_s21 = smov (!%p227_p3, %s433_s21), 1  ;;  %vm259_vm0 = vcmask 1043456   ;;  %vm255_vm1 = vcmask 31744   ;;  %v310_v9 = vlaneseq }
   0xe   : > { %457 = vset.pattern.permute.xlu0 %v466_v1  ;;  %s447_s2 = sshll.u32 %s539_s21, 3  ;;  %v243_v4 = vld [vmem:[%s533_s1] sm:$0x1]  ;;  %s440_s27 = sshll.u32 %s539_s21, 1  ;;  %vm307_vm2 = vcmask 1040384   ;;  %vm320_vm4 = vcmask 0  }
   0xf   : > { %247 = vperm.xlu0 %457, %v244_v2   ;;  %s231_s24 = scalar_lea.vmem %s532_s0, %s447_s2  ;;  %vm312_vm3 = vcmp.lt.s32.totalorder %v310_v9, 256  ;;  %s235_s30 = scalar_lea.vmem %s535_s3, %s440_s27 }
  0x10   : > { %v242_v3 = vld [vmem:[%s231_s24] sm:$0xff]  ;;  %s238_s8 = scalar_lea.vmem %s536_s4, %s539_s21  ;;  %s241_s11 = scalar_lea.vmem %s537_s5, %s539_s21 }
  0x11   : > { %252 = vst [vmem:[#allocation1] ss:$2 sm:$0xff] %v242_v3 }
  0x18   : > { %v253_v5 = vld.sshfl [vmem:[#allocation1] sm:$0xff pattern:$0x75316420]  ;;  %v254_v6 = vld.sshfl [vmem:[#allocation1 + $0x8] sm:$0xff pattern:$0x75316420] }
  0x19   : > { %441 = vmatpush.msk.msra.mxu0 %vm259_vm0, %v253_v5  ;;  %443 = vmatpush.msk.msra.mxu1 %vm259_vm0, %v254_v6 }
  0x1a   : > { %442 = vmatmul.msk.f32.vlgmr.msra.gmra.mxu0 %vm255_vm1, %v243_v4  ;;  %444 = vmatmul.msk.f32.vlgmr.msra.gmra.mxu1 %vm255_vm1, %v243_v4 }
  0x81   : > { %v248_v7 = vpop.permute.xlu0 %247 }
  0x82   : > { %v250_v8 = vperm.slane %v248_v7, 0 }
  0x97   : > { %v281_v10 = vpop.f32.mrf.mxu0  ;;  %v301_v11 = vpop.f32.mrf.mxu1 }
  0x98   : > { %v282_v12 = vadd.f32 %v281_v10, %v250_v8  ;;  %v302_v13 = vadd.f32 %v301_v11, %v250_v8 }
  0x9a   : > { %v306_v14 = vrot.slane %v302_v13, 7  ;;  %v315_v15 = vsel %vm307_vm2, %v282_v12, 0.0  ;;  %v316_v16 = vsel %vm307_vm2, %v302_v13, 0.0  ;;  %v322_v17 = vmul.f32 %v282_v12, %v282_v12 }
  0x9b   : > { %v317_v18 = vadd.f32 %v316_v16, %v315_v15  ;;  %v323_v19 = vmul.f32 %v302_v13, %v302_v13 }
  0x9c   : > { %v308_v20 = vsel %vm307_vm2, %v282_v12, %v306_v14  ;;  %v324_v21 = vsel %vm307_vm2, %v322_v17, 0.0 }
  0x9d   : > { %318 = vadd.xlane.f32.xlu0 %v317_v18  ;;  %314 = vst.msk [vmem:[%s235_s30] sm:$0x3] %vm312_vm3, %v308_v20  ;;  %v325_v22 = vsel %vm307_vm2, %v323_v19, 0.0 }
  0x9e   : > { %v326_v23 = vadd.f32 %v325_v22, %v324_v21 }
  0xa0   : > { %327 = vadd.xlane.f32.xlu1 %v326_v23 }
 0x110   : > { %v319_v24 = vpop.xlane.xlu0 %318 }
 0x111   : > { %321 = vst.msk [vmem:[%s238_s8] sm:$0x1] %vm320_vm4, %v319_v24 }
 0x113   : > { %v328_v25 = vpop.xlane.xlu1 %327 }
 0x114   : > { %329 = vst.msk [vmem:[%s241_s11] sm:$0x1] %vm320_vm4, %v328_v25 }
 0x115 PF: > { %s18_s20 = sadd.s32 1, %s464_s20  }
 0x116   : > { %p15_p4 = scmp.ge.s32.totalorder %s18_s20, 4  }
 0x118   :  { %17 = sbr.rel (!%p15_p4) target bundleno = 3 (0x3), region = 86 }

// kernel: generator_forward.51
= control target key start
LH: loop header
LB: loop body
LE: loop exit
PB: predicated region body
PF: predicated region fallthrough
CT: control target
= control target key end

     0   :  { %s299_s16 = smov 0   ;;  %s316_s0 = inlined_call_operand.vmem [shape: f32[2,1,256], index: 0, kind: input, shape index: {}]   ;;  %s317_s1 = inlined_call_operand.<no memory space> [shape: f32[1,1], index: 1, kind: input, shape index: {}]   ;;  %s318_s3 = inlined_call_operand.vmem [shape: f32[2,1,256], index: 3, kind: output, shape index: {}]   ;;  %s319_s2 = inlined_call_operand.<no memory space> [shape: f32[1,1], index: 2, kind: input, shape index: {}]  }
   0x1   :  { %v8_v0 = vstv %s317_s1  ;;  %v10_v1 = vstv %s319_s2 }
   0x2   :  { %9 = vst [vmem:[#allocation2] sm:$0x1] %v8_v0 }
   0x3   :  { %11 = vst [vmem:[#allocation3] sm:$0x1] %v10_v1 }
   0x4 LB: > { %s245_s17 = sadd.s32 4294967295, %s270_s16   ;;  %p249_p0 = scmp.ge.s32.totalorder %s270_s16, 1  ;;  %s270_s16 = sphi %s299_s16, %s17_s16  }
   0x5   : > { %p140_p1 = scmp.lt.s32.totalorder %s270_s16, 3 }
   0x7   : > { %p141_p2 = pnand %p249_p0, %p140_p1 }
   0x8   : > { %p162_p3 = scmp.lt.s32.totalorder (!%p141_p2), %s245_s17, 1 }
   0x9   : > { %144 = sbr.rel (%p141_p2) target bundleno = 144 (0x90), region = 32 }
   0xe   : > { %v171_v2 = vld [vmem:[#allocation2] sm:$0x1]  ;;  %v272_v3 = vmov 0   ;;  %v179_v4 = vld [vmem:[#allocation3] sm:$0x1]  ;;  %s321_s17 = smov (!%p162_p3, %s245_s17), 1  ;;  %v187_v8 = vlaneseq }
   0xf   : > { %263 = vset.pattern.permute.xlu0 %v272_v3  ;;  %s250_s1 = sshll.u32 %s321_s17, 1 }
  0x10   : > { %174 = vperm.xlu0 %263, %v171_v2   ;;  %s165_s19 = scalar_lea.vmem %s316_s0, %s250_s1  ;;  %s169_s22 = scalar_lea.vmem %s318_s3, %s250_s1  ;;  %vm189_vm0 = vcmp.lt.s32.totalorder %v187_v8, 256 }
  0x11   : > { %v170_v7 = vld [vmem:[%s165_s19] sm:$0x3] }
  0x18   : > { %182 = vperm.xlu0 %263, %v179_v4  }
  0x82   : > { %v175_v5 = vpop.permute.xlu0 %174 }
  0x83   : > { %v177_v6 = vperm.slane %v175_v5, 0 }
  0x85   : > { %v178_v10 = vmul.f32 %v177_v6, %v170_v7 }
  0x8a   : > { %v183_v9 = vpop.permute.xlu0 %182 }
  0x8b   : > { %v185_v11 = vperm.slane %v183_v9, 0 }
  0x8d   : > { %v186_v12 = vadd.f32 %v185_v11, %v178_v10 }
  0x8f   : > { %191 = vst.msk [vmem:[%s169_s22] sm:$0x3] %vm189_vm0, %v186_v12 }
  0x90 PF: > { %s17_s16 = sadd.s32 1, %s270_s16  }
  0x91   : > { %p14_p4 = scmp.ge.s32.totalorder %s17_s16, 4  }
  0x93   :  { %16 = sbr.rel (!%p14_p4) target bundleno = 4 (0x4), region = 62 }

</bundles_post_ra>
